<compile_context>
chip_gen: v5e
topology: v5e:2x2
jax: 0.10.0
libtpu: 0.0.40
codegen_flags: <defaults>
</compile_context>

<pallas_src>
import functools

import jax
import jax.numpy as jnp
from jax import lax
from jax.experimental import pallas as pl
from jax.experimental.pallas import tpu as pltpu

HIDDEN_DIM = 128
INPUT_DIM = 768
NUM_LAYERS = 3
OUTPUT_DIM = 768
MAX_TIME_CHUNK = 8   # timesteps processed (unrolled) per grid step


# ---------------------------------------------------------------------------
# Kernel 1: layer-0 input projection (non-recurrent, big parallel GEMM)
# ---------------------------------------------------------------------------
def _proj_kernel(x_ref, w_ref, b_ref, o_ref):
    o_ref[...] = (jnp.dot(x_ref[...], w_ref[...],
                          preferred_element_type=jnp.float32) + b_ref[...])


def input_projection(x2d, w, b, *, block_rows=512):
    """x2d: (R, D); w: (D, G); b: (1, G) -> (R, G)."""
    R, D = x2d.shape
    G = w.shape[1]
    rm = min(R, block_rows)
    return pl.pallas_call(
        _proj_kernel,
        out_shape=jax.ShapeDtypeStruct((R, G), jnp.float32),
        grid_spec=pltpu.PrefetchScalarGridSpec(
            num_scalar_prefetch=0,
            grid=(pl.cdiv(R, rm),),
            in_specs=[
                pl.BlockSpec((rm, D), lambda r: (r, 0)),
                pl.BlockSpec((D, G), lambda r: (0, 0)),
                pl.BlockSpec((1, G), lambda r: (0, 0)),
            ],
            out_specs=pl.BlockSpec((rm, G), lambda r: (r, 0)),
        ),
        compiler_params=pltpu.CompilerParams(
            dimension_semantics=("parallel",)),
    )(x2d, w, b)


# ---------------------------------------------------------------------------
# Kernel 2: fused 6-layer LSTM recurrence + final Linear
# ---------------------------------------------------------------------------
def _fused_kernel(gx0_ref, whh0_ref, wih_ref, whh_ref, b_ref,
                  fcw_ref, fcb_ref, out_ref, h_scr, c_scr, *,
                  tc, hidden, num_deep):
    """Grid axis = time chunks (sequential).

    gx0_ref : (B, tc, 4H)  precomputed x @ W_ih0 + b0 for this chunk
    whh0_ref: (H, 4H)      layer-0 recurrent weights
    wih_ref : (L, H, 4H)   input weights for layers 1..L (stacked)
    whh_ref : (L, H, 4H)   recurrent weights for layers 1..L
    b_ref   : (L, 1, 4H)   combined biases for layers 1..L
    fcw_ref : (H, O), fcb_ref: (1, O)
    out_ref : (B, O)       written only on the last chunk
    h_scr, c_scr: (1+L, B, H) persistent hidden / cell states
    """
    step = pl.program_id(0)

    @pl.when(step == 0)
    def _():
        h_scr[...] = jnp.zeros_like(h_scr)
        c_scr[...] = jnp.zeros_like(c_scr)

    def cell(gates, c_prev):
        # PyTorch gate order: i, f, g, o
        i = jax.nn.sigmoid(gates[:, 0 * hidden:1 * hidden])
        f = jax.nn.sigmoid(gates[:, 1 * hidden:2 * hidden])
        g = jnp.tanh(gates[:, 2 * hidden:3 * hidden])
        o = jax.nn.sigmoid(gates[:, 3 * hidden:4 * hidden])
        c = f * c_prev + i * g
        h = o * jnp.tanh(c)
        return h, c

    # Fully unrolled over the time chunk (gives the scheduler visibility).
    for tl in range(tc):
        # Layer 0: input projection was hoisted; only h @ W_hh is serial.
        gates = gx0_ref[:, tl, :] + jnp.dot(
            h_scr[0], whh0_ref[...], preferred_element_type=jnp.float32)
        h, c = cell(gates, c_scr[0])
        h_scr[0] = h
        c_scr[0] = c
        # Deep layers (lstm1 layers 1-2, lstm2 layers 0-2).
        for l in range(num_deep):
            gates = (jnp.dot(h, wih_ref[l],
                             preferred_element_type=jnp.float32)
                     + jnp.dot(h_scr[l + 1], whh_ref[l],
                               preferred_element_type=jnp.float32)
                     + b_ref[l])
            h, c = cell(gates, c_scr[l + 1])
            h_scr[l + 1] = h
            c_scr[l + 1] = c

    # Fused fc epilogue on the final hidden state of the last layer.
    @pl.when(step == pl.num_programs(0) - 1)
    def _():
        out_ref[...] = (jnp.dot(h_scr[num_deep], fcw_ref[...],
                                preferred_element_type=jnp.float32)
                        + fcb_ref[...])


def fused_lstm_fc(gx0, w_hh0, w_ih_d, w_hh_d, b_d, fc_w, fc_b, *, time_chunk):
    B, T, G = gx0.shape
    H = w_hh0.shape[0]
    O = fc_w.shape[1]
    L = w_ih_d.shape[0]
    assert T % time_chunk == 0, (T, time_chunk)
    n_chunks = T // time_chunk
    kernel = functools.partial(_fused_kernel, tc=time_chunk, hidden=H,
                               num_deep=L)
    return pl.pallas_call(
        kernel,
        out_shape=jax.ShapeDtypeStruct((B, O), jnp.float32),
        grid_spec=pltpu.PrefetchScalarGridSpec(
            num_scalar_prefetch=0,
            grid=(n_chunks,),
            in_specs=[
                pl.BlockSpec((B, time_chunk, G), lambda s: (0, s, 0)),
                pl.BlockSpec((H, G), lambda s: (0, 0)),
                pl.BlockSpec((L, H, G), lambda s: (0, 0, 0)),
                pl.BlockSpec((L, H, G), lambda s: (0, 0, 0)),
                pl.BlockSpec((L, 1, G), lambda s: (0, 0, 0)),
                pl.BlockSpec((H, O), lambda s: (0, 0)),
                pl.BlockSpec((1, O), lambda s: (0, 0)),
            ],
            out_specs=pl.BlockSpec((B, O), lambda s: (0, 0)),
            scratch_shapes=[
                pltpu.VMEM((1 + L, B, H), jnp.float32),   # h states
                pltpu.VMEM((1 + L, B, H), jnp.float32),   # c states
            ],
        ),
        compiler_params=pltpu.CompilerParams(
            dimension_semantics=("arbitrary",)),   # recurrence => sequential
    )(gx0, w_hh0, w_ih_d, w_hh_d, b_d, fc_w, fc_b)


def _pick_time_chunk(T, max_chunk=MAX_TIME_CHUNK):
    if T <= max_chunk:
        return T
    for tc in range(max_chunk, 0, -1):          # prefer sublane-aligned chunks
        if T % tc == 0 and tc % 8 == 0:
            return tc
    for tc in range(max_chunk, 0, -1):
        if T % tc == 0:
            return tc
    return 1


# ---------------------------------------------------------------------------
# Parameter init (deterministic, PyTorch-style uniform(-1/sqrt(H), 1/sqrt(H)))
# ---------------------------------------------------------------------------
def init_lstm_params(key, input_size, hidden, num_layers):
    params = []
    bound = 1.0 / float(hidden) ** 0.5
    for layer in range(num_layers):
        d_in = input_size if layer == 0 else hidden
        key, k1, k2, k3, k4 = jax.random.split(key, 5)
        w_ih = jax.random.uniform(k1, (4 * hidden, d_in), jnp.float32,
                                  -bound, bound)
        w_hh = jax.random.uniform(k2, (4 * hidden, hidden), jnp.float32,
                                  -bound, bound)
        b_ih = jax.random.uniform(k3, (4 * hidden,), jnp.float32, -bound, bound)
        b_hh = jax.random.uniform(k4, (4 * hidden,), jnp.float32, -bound, bound)
        # Pre-transpose so kernels compute x @ W (keeps lanes dense).
        params.append((w_ih.T, w_hh.T, (b_ih + b_hh)[None, :]))
    return key, params


def init_fc_params(key, in_dim, out_dim):
    bound = 1.0 / float(in_dim) ** 0.5
    key, k1, k2 = jax.random.split(key, 3)
    w = jax.random.uniform(k1, (out_dim, in_dim), jnp.float32, -bound, bound)
    b = jax.random.uniform(k2, (out_dim,), jnp.float32, -bound, bound)
    return key, (w.T, b[None, :])


def pack_params(lstm1_params, lstm2_params):
    """Layer 0 stays separate (its input projection is hoisted);
    layers 1..5 are stacked so the fused kernel takes few, large operands."""
    layers = list(lstm1_params) + list(lstm2_params)
    w_ih0, w_hh0, b0 = layers[0]
    deep = layers[1:]
    w_ih_d = jnp.stack([p[0] for p in deep])   # (5, H, 4H)
    w_hh_d = jnp.stack([p[1] for p in deep])   # (5, H, 4H)
    b_d = jnp.stack([p[2] for p in deep])      # (5, 1, 4H)
    return w_ih0, b0, w_hh0, w_ih_d, w_hh_d, b_d


# ---------------------------------------------------------------------------
# Forward pass
# ---------------------------------------------------------------------------
def rekomendatel_forward(x_btd, lstm1_params, lstm2_params, fc_w, fc_b):
    B, T, D = x_btd.shape
    w_ih0, b0, w_hh0, w_ih_d, w_hh_d, b_d = pack_params(lstm1_params,
                                                        lstm2_params)
    # Hoisted layer-0 input projection: one large parallel GEMM.
    # (B,T,D)->(B*T,D) reshape is contiguous -> no transpose / extra HBM pass.
    gx0 = input_projection(x_btd.reshape(B * T, D), w_ih0, b0)
    gx0 = gx0.reshape(B, T, 4 * HIDDEN_DIM)
    tc = _pick_time_chunk(T)
    # nn.Dropout in eval mode is the identity.
    # TODO(synk): training-mode dropout (inter-layer + pre-fc) not implemented.
    return fused_lstm_fc(gx0, w_hh0, w_ih_d, w_hh_d, b_d, fc_w, fc_b,
                         time_chunk=tc)                    # (B, OUTPUT_DIM)


# ---------------------------------------------------------------------------
# Pure-JAX reference (lax.scan) for correctness check
# ---------------------------------------------------------------------------
def _lstm_layer_ref(x_tbd, w_ih, w_hh, b):
    H = w_hh.shape[0]
    B = x_tbd.shape[1]

    def step(carry, x_t):
        h, c = carry
        gates = x_t @ w_ih + h @ w_hh + b
        i = jax.nn.sigmoid(gates[:, :H])
        f = jax.nn.sigmoid(gates[:, H:2 * H])
        g = jnp.tanh(gates[:, 2 * H:3 * H])
        o = jax.nn.sigmoid(gates[:, 3 * H:])
        c = f * c + i * g
        h = o * jnp.tanh(c)
        return (h, c), h

    init = (jnp.zeros((B, H), jnp.float32), jnp.zeros((B, H), jnp.float32))
    _, ys = lax.scan(step, init, x_tbd)
    return ys


def reference_forward(x_btd, lstm1_params, lstm2_params, fc_w, fc_b):
    h = jnp.transpose(x_btd, (1, 0, 2))
    for (w_ih, w_hh, b) in lstm1_params:
        h = _lstm_layer_ref(h, w_ih, w_hh, b)
    for (w_ih, w_hh, b) in lstm2_params:
        h = _lstm_layer_ref(h, w_ih, w_hh, b)
    return h[-1] @ fc_w + fc_b


# ---------------------------------------------------------------------------
if __name__ == "__main__":
    B, T = 8, 16   # B=8 fills a sublane group; T=16 -> 2 time chunks of 8

    key = jax.random.PRNGKey(0)
    key, params1 = init_lstm_params(key, INPUT_DIM, HIDDEN_DIM, NUM_LAYERS)
    key, params2 = init_lstm_params(key, HIDDEN_DIM, HIDDEN_DIM, NUM_LAYERS)
    key, (fc_w, fc_b) = init_fc_params(key, HIDDEN_DIM, OUTPUT_DIM)

    key, kx = jax.random.split(key)
    x = jax.random.normal(kx, (B, T, INPUT_DIM), jnp.float32)

    out = rekomendatel_forward(x, params1, params2, fc_w, fc_b)
    out = jax.block_until_ready(out)

    ref = jax.block_until_ready(
        reference_forward(x, params1, params2, fc_w, fc_b))

    assert out.shape == (B, OUTPUT_DIM), out.shape
    assert jnp.allclose(out, ref, rtol=1e-4, atol=1e-4), (
        float(jnp.max(jnp.abs(out - ref))))

    print("KERNEL_OK")
</pallas_src>

<mosaic_0001>
module attributes {stable_mosaic.version = 11 : i64} {
  func.func @_proj_kernel(%arg0: i32, %arg1: memref<128x768xf32, #tpu.memory_space<vmem>>, %arg2: memref<768x512xf32, #tpu.memory_space<vmem>>, %arg3: memref<1x512xf32, #tpu.memory_space<vmem>>, %arg4: memref<128x512xf32, #tpu.memory_space<vmem>>) attributes {dimension_semantics = [#tpu.dimension_semantics<parallel>], iteration_bounds = array<i64: 1>, scalar_prefetch = 0 : i64, scratch_operands = 0 : i64, tpu.core_type = #tpu.core_type<tc>, window_params = [{transform_indices = @transform_0, window_bounds = array<i64: 128, 768>}, {pipeline_mode = #tpu.pipeline_mode<synchronous>, transform_indices = @transform_1, window_bounds = array<i64: 768, 512>}, {pipeline_mode = #tpu.pipeline_mode<synchronous>, transform_indices = @transform_2, window_bounds = array<i64: 1, 512>}, {transform_indices = @transform_3, window_bounds = array<i64: 128, 512>}]} {
    %c0 = arith.constant 0 : index
    %c0_0 = arith.constant 0 : index
    %0 = vector.load %arg1[%c0, %c0_0] : memref<128x768xf32, #tpu.memory_space<vmem>>, vector<128x768xf32>
    %c0_1 = arith.constant 0 : index
    %c0_2 = arith.constant 0 : index
    %1 = vector.load %arg2[%c0_1, %c0_2] : memref<768x512xf32, #tpu.memory_space<vmem>>, vector<768x512xf32>
    %cst = arith.constant dense<0.000000e+00> : vector<128x512xf32>
    %2 = tpu.matmul %0, %1, %cst {dimension_numbers = #tpu.dot_dimension_numbers<[1], [0], [0], [1], [0, 0, 1, 1], [], []>} : vector<128x768xf32>, vector<768x512xf32>, vector<128x512xf32> -> vector<128x512xf32>
    %c0_3 = arith.constant 0 : index
    %c0_4 = arith.constant 0 : index
    %3 = vector.load %arg3[%c0_3, %c0_4] : memref<1x512xf32, #tpu.memory_space<vmem>>, vector<1x512xf32>
    %4 = vector.broadcast %3 : vector<1x512xf32> to vector<128x512xf32>
    %5 = arith.addf %2, %4 : vector<128x512xf32>
    %c0_5 = arith.constant 0 : index
    %c0_6 = arith.constant 0 : index
    %6 = vector.load %arg4[%c0_5, %c0_6] : memref<128x512xf32, #tpu.memory_space<vmem>>, vector<128x512xf32>
    tpu.vector_store %arg4[%c0_5, %c0_6], %5 {strides = array<i32>} : memref<128x512xf32, #tpu.memory_space<vmem>>, vector<128x512xf32>,
    return
  }
  func.func @transform_0(%arg0: i32) -> (i32, i32) {
    %c0_i32 = arith.constant 0 : i32
    %c0_i32_0 = arith.constant 0 : i32
    return %arg0, %c0_i32 : i32, i32
  }
  func.func @transform_1(%arg0: i32) -> (i32, i32) {
    %c0_i32 = arith.constant 0 : i32
    %c0_i32_0 = arith.constant 0 : i32
    %c0_i32_1 = arith.constant 0 : i32
    return %c0_i32, %c0_i32_0 : i32, i32
  }
  func.func @transform_2(%arg0: i32) -> (i32, i32) {
    %c0_i32 = arith.constant 0 : i32
    %c0_i32_0 = arith.constant 0 : i32
    %c0_i32_1 = arith.constant 0 : i32
    return %c0_i32, %c0_i32_0 : i32, i32
  }
  func.func @transform_3(%arg0: i32) -> (i32, i32) {
    %c0_i32 = arith.constant 0 : i32
    %c0_i32_0 = arith.constant 0 : i32
    return %arg0, %c0_i32 : i32, i32
  }
}

</mosaic_0001>

<bundles_post_ra>
// kernel: tpu_custom_call.1
= control target key start
LH: loop header
LB: loop body
LE: loop exit
PB: predicated region body
PF: predicated region fallthrough
CT: control target
= control target key end

     0   :  { %8 = vsyncpa [#allocation3], 0  ;;  %s3391_s0 = inlined_call_operand.hbm [shape: f32[128,768], index: 0, kind: input, shape index: {}]   ;;  %s3392_s1 = inlined_call_operand.hbm [shape: f32[768,512], index: 1, kind: input, shape index: {}]   ;;  %s3393_s2 = inlined_call_operand.hbm [shape: f32[1,512], index: 2, kind: input, shape index: {}]   ;;  %s3394_s3 = inlined_call_operand.hbm [shape: f32[128,512], index: 3, kind: output, shape index: {}]  }
   0x1   :  { %9 = vsyncpa [#allocation6], 0  ;;  %s28_s14 = sshll.u32 %s3392_s1, 4  ;;  %s29_s14 = int_to_ptr.hbm [resolvable:$true] %s28_s14 }
   0x2   :  { %10 = vsyncpa [#allocation4], 0  ;;  %s2433_s15 = smov [#allocation5]   ;;  %s15_s19 = sshll.u32 %s3391_s0, 4  ;;  %s16_s19 = int_to_ptr.hbm [resolvable:$true] %s15_s19 }
   0x3   :  { %s30_s16 = sshll.u32 %s2433_s15, 4  ;;  %s2434_s20 = smov 512   ;;  %s31_s16 = int_to_ptr.vmem [resolvable:$true] %s30_s16 }
   0x4   :  { %s2435_s21 = smov 32   ;;  %s2436_s22 = smov [#allocation2]  }
   0x5   :  { %36 = dma.hbm_to_vmem [thread:$0]  %s29_s14, 49152, %s31_s16, [#allocation6], %s2434_s20, %s2434_s20, %s2435_s21  }
   0x6   :  { %s17_s23 = sshll.u32 %s2436_s22, 4  ;;  %s2437_s1 = smov 768   ;;  %s18_s23 = int_to_ptr.vmem [resolvable:$true] %s17_s23 }
   0x7   :  { %s2438_s24 = smov 48   ;;  %s42_s27 = sshll.u32 %s3393_s2, 4  ;;  %s43_s27 = int_to_ptr.hbm [resolvable:$true] %s42_s27 }
   0x8   :  { %23 = dma.hbm_to_vmem [thread:$0]  %s16_s19, 12288, %s18_s23, [#allocation3], %s2437_s1, %s2437_s1, %s2438_s24  }
   0x9   :  { %s2439_s28 = smov [#allocation7]  }
   0xa   :  { %s44_s0 = sshll.u32 %s2439_s28, 4  ;;  %s45_s0 = int_to_ptr.vmem [resolvable:$true] %s44_s0 }
   0xb   :  { %47 = dma.hbm_to_vmem [thread:$0]  %s43_s27, 64, %s45_s0, [#allocation6]  }
   0xc   :  { %2427 = dma.done.wait [#allocation3], 12288  }
   0xd   :  { %2428 = vsyncadd [#allocation3], 4294955008 }
   0xe   :  { %2429 = dma.done.wait [#allocation6], 49216  }
   0xf   :  { %2430 = vsyncadd [#allocation6], 4294918080  ;;  %v216_v0 = vld [vmem:[#allocation5 + $0x1e0] sm:$0xff]  ;;  %v62_v63 = vld [vmem:[#allocation2 + $0x10] sm:$0xff]  ;;  %s2440_s2 = smov [#allocation8]   ;;  %s2180_s5 = sshll.u32 %s3394_s3, 4  ;;  %s2181_s5 = int_to_ptr.hbm [resolvable:$true] %s2180_s5 }
  0x10   :  { %v344_v1 = vld [vmem:[#allocation5 + $0x5e0] sm:$0xff]  ;;  %550 = vmatpush.msra.mxu0 %v216_v0  ;;  %v217_v0 = vld [vmem:[#allocation5 + $0x1e8] sm:$0xff]  ;;  %s2178_s29 = sshll.u32 %s2440_s2, 4  ;;  %s2179_s29 = int_to_ptr.vmem [resolvable:$true] %s2178_s29 }
  0x11   :  { %v212_v2 = vld [vmem:[#allocation5 + $0x1c0] sm:$0xff]  ;;  %680 = vmatpush.msra.mxu2 %v344_v1 }
  0x12   :  { %v280_v3 = vld [vmem:[#allocation5 + $0x3e0] sm:$0xff]  ;;  %551 = vmatpush.msra.mxu0 %v212_v2 }
  0x13   :  { %v340_v4 = vld [vmem:[#allocation5 + $0x5c0] sm:$0xff]  ;;  %615 = vmatpush.msra.mxu1 %v280_v3  ;;  %v2475_v3 = vld [vmem:[#allocation2 + $0x8] sm:$0xff] }
  0x14   :  { %v408_v5 = vld [vmem:[#allocation5 + $0x7e0] sm:$0xff]  ;;  %681 = vmatpush.msra.mxu2 %v340_v4  ;;  %v63_v4 = vld [vmem:[#allocation2 + $0x18] sm:$0xff] }
  0x15   :  { %745 = vmatpush.msra.mxu3 %v408_v5  ;;  %v208_v6 = vld [vmem:[#allocation5 + $0x1a0] sm:$0xff] }
  0x16   :  { %v276_v7 = vld [vmem:[#allocation5 + $0x3c0] sm:$0xff]  ;;  %552 = vmatpush.msra.mxu0 %v208_v6  ;;  %v281_v6 = vld [vmem:[#allocation5 + $0x3e8] sm:$0xff] }
  0x17   :  { %v336_v8 = vld [vmem:[#allocation5 + $0x5a0] sm:$0xff]  ;;  %616 = vmatpush.msra.mxu1 %v276_v7 }
  0x18   :  { %v404_v9 = vld [vmem:[#allocation5 + $0x7c0] sm:$0xff]  ;;  %682 = vmatpush.msra.mxu2 %v336_v8  ;;  %v213_v8 = vld [vmem:[#allocation5 + $0x1c8] sm:$0xff] }
  0x19   :  { %v272_v10 = vld [vmem:[#allocation5 + $0x3a0] sm:$0xff]  ;;  %746 = vmatpush.msra.mxu3 %v404_v9 }
  0x1a   :  { %v204_v11 = vld [vmem:[#allocation5 + $0x180] sm:$0xff]  ;;  %617 = vmatpush.msra.mxu1 %v272_v10  ;;  %v277_v10 = vld [vmem:[#allocation5 + $0x3c8] sm:$0xff] }
  0x1b   :  { %v332_v12 = vld [vmem:[#allocation5 + $0x580] sm:$0xff]  ;;  %553 = vmatpush.msra.mxu0 %v204_v11 }
  0x1c   :  { %v400_v13 = vld [vmem:[#allocation5 + $0x7a0] sm:$0xff]  ;;  %683 = vmatpush.msra.mxu2 %v332_v12  ;;  %v209_v12 = vld [vmem:[#allocation5 + $0x1a8] sm:$0xff] }
  0x1d   :  { %v268_v14 = vld [vmem:[#allocation5 + $0x380] sm:$0xff]  ;;  %747 = vmatpush.msra.mxu3 %v400_v13 }
  0x1e   :  { %v396_v15 = vld [vmem:[#allocation5 + $0x780] sm:$0xff]  ;;  %618 = vmatpush.msra.mxu1 %v268_v14  ;;  %v2479_v14 = vld [vmem:[#allocation2 + $0x30] sm:$0xff] }
  0x1f   :  { %v200_v16 = vld [vmem:[#allocation5 + $0x160] sm:$0xff]  ;;  %748 = vmatpush.msra.mxu3 %v396_v15 }
  0x20   :  { %v328_v17 = vld [vmem:[#allocation5 + $0x560] sm:$0xff]  ;;  %554 = vmatpush.msra.mxu0 %v200_v16  ;;  %v273_v16 = vld [vmem:[#allocation5 + $0x3a8] sm:$0xff] }
  0x21   :  { %v264_v18 = vld [vmem:[#allocation5 + $0x360] sm:$0xff]  ;;  %684 = vmatpush.msra.mxu2 %v328_v17 }
  0x22   :  { %v392_v19 = vld [vmem:[#allocation5 + $0x760] sm:$0xff]  ;;  %619 = vmatpush.msra.mxu1 %v264_v18  ;;  %v2481_v18 = vld [vmem:[#allocation2 + $0x38] sm:$0xff] }
  0x23   :  { %v196_v20 = vld [vmem:[#allocation5 + $0x140] sm:$0xff]  ;;  %749 = vmatpush.msra.mxu3 %v392_v19  ;;  %v205_v19 = vld [vmem:[#allocation5 + $0x188] sm:$0xff] }
  0x24   :  { %v324_v21 = vld [vmem:[#allocation5 + $0x540] sm:$0xff]  ;;  %555 = vmatpush.msra.mxu0 %v196_v20  ;;  %v69_v20 = vld [vmem:[#allocation2 + $0x48] sm:$0xff] }
  0x25   :  { %v260_v22 = vld [vmem:[#allocation5 + $0x340] sm:$0xff]  ;;  %685 = vmatpush.msra.mxu2 %v324_v21 }
  0x26   :  { %v388_v23 = vld [vmem:[#allocation5 + $0x740] sm:$0xff]  ;;  %620 = vmatpush.msra.mxu1 %v260_v22  ;;  %v269_v22 = vld [vmem:[#allocation5 + $0x388] sm:$0xff] }
  0x27   :  { %v192_v24 = vld [vmem:[#allocation5 + $0x120] sm:$0xff]  ;;  %750 = vmatpush.msra.mxu3 %v388_v23 }
  0x28   :  { %v320_v25 = vld [vmem:[#allocation5 + $0x520] sm:$0xff]  ;;  %556 = vmatpush.msra.mxu0 %v192_v24  ;;  %v201_v24 = vld [vmem:[#allocation5 + $0x168] sm:$0xff] }
  0x29   :  { %v256_v26 = vld [vmem:[#allocation5 + $0x320] sm:$0xff]  ;;  %686 = vmatpush.msra.mxu2 %v320_v25 }
  0x2a   :  { %v384_v27 = vld [vmem:[#allocation5 + $0x720] sm:$0xff]  ;;  %621 = vmatpush.msra.mxu1 %v256_v26  ;;  %v265_v26 = vld [vmem:[#allocation5 + $0x368] sm:$0xff] }
  0x2b   :  { %v188_v28 = vld [vmem:[#allocation5 + $0x100] sm:$0xff]  ;;  %751 = vmatpush.msra.mxu3 %v384_v27 }
  0x2c   :  { %v316_v29 = vld [vmem:[#allocation5 + $0x500] sm:$0xff]  ;;  %557 = vmatpush.msra.mxu0 %v188_v28  ;;  %v197_v28 = vld [vmem:[#allocation5 + $0x148] sm:$0xff] }
  0x2d   :  { %v252_v30 = vld [vmem:[#allocation5 + $0x300] sm:$0xff]  ;;  %687 = vmatpush.msra.mxu2 %v316_v29 }
  0x2e   :  { %v380_v31 = vld [vmem:[#allocation5 + $0x700] sm:$0xff]  ;;  %622 = vmatpush.msra.mxu1 %v252_v30 }
  0x2f   :  { %v184_v32 = vld [vmem:[#allocation5 + $0xe0] sm:$0xff]  ;;  %752 = vmatpush.msra.mxu3 %v380_v31  ;;  %v74_v31 = vld [vmem:[#allocation2 + $0x70] sm:$0xff] }
  0x30   :  { %v312_v33 = vld [vmem:[#allocation5 + $0x4e0] sm:$0xff]  ;;  %558 = vmatpush.msra.mxu0 %v184_v32  ;;  %v261_v32 = vld [vmem:[#allocation5 + $0x348] sm:$0xff] }
  0x31   :  { %v248_v34 = vld [vmem:[#allocation5 + $0x2e0] sm:$0xff]  ;;  %688 = vmatpush.msra.mxu2 %v312_v33 }
  0x32   :  { %v376_v35 = vld [vmem:[#allocation5 + $0x6e0] sm:$0xff]  ;;  %623 = vmatpush.msra.mxu1 %v248_v34  ;;  %v2487_v34 = vld [vmem:[#allocation2 + $0x68] sm:$0xff] }
  0x33   :  { %v180_v36 = vld [vmem:[#allocation5 + $0xc0] sm:$0xff]  ;;  %753 = vmatpush.msra.mxu3 %v376_v35  ;;  %v75_v35 = vld [vmem:[#allocation2 + $0x78] sm:$0xff] }
  0x34   :  { %v308_v37 = vld [vmem:[#allocation5 + $0x4c0] sm:$0xff]  ;;  %559 = vmatpush.msra.mxu0 %v180_v36  ;;  %v193_v36 = vld [vmem:[#allocation5 + $0x128] sm:$0xff] }
  0x35   :  { %v244_v38 = vld [vmem:[#allocation5 + $0x2c0] sm:$0xff]  ;;  %689 = vmatpush.msra.mxu2 %v308_v37 }
  0x36   :  { %v372_v39 = vld [vmem:[#allocation5 + $0x6c0] sm:$0xff]  ;;  %624 = vmatpush.msra.mxu1 %v244_v38  ;;  %v257_v38 = vld [vmem:[#allocation5 + $0x328] sm:$0xff] }
  0x37   :  { %v176_v40 = vld [vmem:[#allocation5 + $0xa0] sm:$0xff]  ;;  %754 = vmatpush.msra.mxu3 %v372_v39 }
  0x38   :  { %v304_v41 = vld [vmem:[#allocation5 + $0x4a0] sm:$0xff]  ;;  %560 = vmatpush.msra.mxu0 %v176_v40  ;;  %v2491_v40 = vld [vmem:[#allocation2 + $0x90] sm:$0xff] }
  0x39   :  { %v240_v42 = vld [vmem:[#allocation5 + $0x2a0] sm:$0xff]  ;;  %690 = vmatpush.msra.mxu2 %v304_v41 }
  0x3a   :  { %v368_v43 = vld [vmem:[#allocation5 + $0x6a0] sm:$0xff]  ;;  %625 = vmatpush.msra.mxu1 %v240_v42  ;;  %v2493_v42 = vld [vmem:[#allocation2 + $0x98] sm:$0xff] }
  0x3b   :  { %v172_v44 = vld [vmem:[#allocation5 + $0x80] sm:$0xff]  ;;  %755 = vmatpush.msra.mxu3 %v368_v43  ;;  %v81_v43 = vld [vmem:[#allocation2 + $0xa8] sm:$0xff] }
  0x3c   :  { %v300_v45 = vld [vmem:[#allocation5 + $0x480] sm:$0xff]  ;;  %561 = vmatpush.msra.mxu0 %v172_v44  ;;  %v189_v44 = vld [vmem:[#allocation5 + $0x108] sm:$0xff] }
  0x3d   :  { %v236_v46 = vld [vmem:[#allocation5 + $0x280] sm:$0xff]  ;;  %691 = vmatpush.msra.mxu2 %v300_v45 }
  0x3e   :  { %v364_v47 = vld [vmem:[#allocation5 + $0x680] sm:$0xff]  ;;  %626 = vmatpush.msra.mxu1 %v236_v46  ;;  %v253_v46 = vld [vmem:[#allocation5 + $0x308] sm:$0xff] }
  0x3f   :  { %v168_v48 = vld [vmem:[#allocation5 + $0x60] sm:$0xff]  ;;  %756 = vmatpush.msra.mxu3 %v364_v47 }
  0x40   :  { %v296_v49 = vld [vmem:[#allocation5 + $0x460] sm:$0xff]  ;;  %562 = vmatpush.msra.mxu0 %v168_v48 }
  0x41   :  { %v232_v50 = vld [vmem:[#allocation5 + $0x260] sm:$0xff]  ;;  %692 = vmatpush.msra.mxu2 %v296_v49  ;;  %v86_v49 = vld [vmem:[#allocation2 + $0xd0] sm:$0xff] }
  0x42   :  { %v360_v51 = vld [vmem:[#allocation5 + $0x660] sm:$0xff]  ;;  %627 = vmatpush.msra.mxu1 %v232_v50  ;;  %v2499_v50 = vld [vmem:[#allocation2 + $0xc8] sm:$0xff] }
  0x43   :  { %v164_v52 = vld [vmem:[#allocation5 + $0x40] sm:$0xff]  ;;  %757 = vmatpush.msra.mxu3 %v360_v51  ;;  %v87_v51 = vld [vmem:[#allocation2 + $0xd8] sm:$0xff] }
  0x44   :  { %v292_v53 = vld [vmem:[#allocation5 + $0x440] sm:$0xff]  ;;  %563 = vmatpush.msra.mxu0 %v164_v52  ;;  %v185_v52 = vld [vmem:[#allocation5 + $0xe8] sm:$0xff] }
  0x45   :  { %v228_v54 = vld [vmem:[#allocation5 + $0x240] sm:$0xff]  ;;  %693 = vmatpush.msra.mxu2 %v292_v53 }
  0x46   :  { %v356_v55 = vld [vmem:[#allocation5 + $0x640] sm:$0xff]  ;;  %628 = vmatpush.msra.mxu1 %v228_v54  ;;  %v249_v54 = vld [vmem:[#allocation5 + $0x2e8] sm:$0xff] }
  0x47   :  { %v160_v56 = vld [vmem:[#allocation5 + $0x20] sm:$0xff]  ;;  %758 = vmatpush.msra.mxu3 %v356_v55 }
  0x48   :  { %v288_v57 = vld [vmem:[#allocation5 + $0x420] sm:$0xff]  ;;  %564 = vmatpush.msra.mxu0 %v160_v56  ;;  %v2503_v56 = vld [vmem:[#allocation2 + $0xf0] sm:$0xff] }
  0x49   :  { %v224_v58 = vld [vmem:[#allocation5 + $0x220] sm:$0xff]  ;;  %694 = vmatpush.msra.mxu2 %v288_v57 }
  0x4a   :  { %v352_v59 = vld [vmem:[#allocation5 + $0x620] sm:$0xff]  ;;  %629 = vmatpush.msra.mxu1 %v224_v58  ;;  %v2505_v58 = vld [vmem:[#allocation2 + $0xf8] sm:$0xff] }
  0x4b   :  { %v156_v60 = vld [vmem:[#allocation5] sm:$0xff]  ;;  %759 = vmatpush.msra.mxu3 %v352_v59  ;;  %v93_v59 = vld [vmem:[#allocation2 + $0x108] sm:$0xff] }
  0x4c   :  { %v284_v61 = vld [vmem:[#allocation5 + $0x400] sm:$0xff]  ;;  %565 = vmatpush.msra.mxu0 %v156_v60  ;;  %v181_v60 = vld [vmem:[#allocation5 + $0xc8] sm:$0xff] }
  0x4d   :  { %v2473_v62 = vld [vmem:[#allocation2] sm:$0xff]  ;;  %695 = vmatpush.msra.mxu2 %v284_v61 }
  0x4e   :  { %v220_v1 = vld [vmem:[#allocation5 + $0x200] sm:$0xff]  ;;  %566 = vmatmul.f32.vlgmr.msra.gmra.mxu0 %v2473_v62  ;;  %696 = vmatmul.f32.vlgmr.msra.gmra.mxu2 %v62_v63  ;;  %v245_v63 = vld [vmem:[#allocation5 + $0x2c8] sm:$0xff] }
  0x4f   :  { %v348_v2 = vld [vmem:[#allocation5 + $0x600] sm:$0xff]  ;;  %940 = vmatpush.msrb.mxu2 %v217_v0  ;;  %630 = vmatpush.msra.mxu1 %v220_v1 }
  0x50   :  { %v472_v5 = vld [vmem:[#allocation5 + $0x9e0] sm:$0xff]  ;;  %760 = vmatpush.msra.mxu3 %v348_v2  ;;  %631 = vmatmul.f32.vlgmr.msra.gmra.mxu1 %v2475_v3  ;;  %v98_v2 = vld [vmem:[#allocation2 + $0x130] sm:$0xff] }
  0x51   :  { %v536_v7 = vld [vmem:[#allocation5 + $0xbe0] sm:$0xff]  ;;  %761 = vmatmul.f32.vlgmr.msra.gmra.mxu3 %v63_v4  ;;  %810 = vmatpush.msrb.mxu0 %v472_v5  ;;  %v2511_v4 = vld [vmem:[#allocation2 + $0x128] sm:$0xff]  ;;  %v99_v5 = vld [vmem:[#allocation2 + $0x138] sm:$0xff] }
  0x52   :  { %v468_v9 = vld [vmem:[#allocation5 + $0x9c0] sm:$0xff]  ;;  %1005 = vmatpush.msrb.mxu3 %v281_v6  ;;  %875 = vmatpush.msrb.mxu1 %v536_v7  ;;  %v177_v6 = vld [vmem:[#allocation5 + $0xa8] sm:$0xff] }
  0x53   :  { %v532_v11 = vld [vmem:[#allocation5 + $0xbc0] sm:$0xff]  ;;  %941 = vmatpush.msrb.mxu2 %v213_v8  ;;  %811 = vmatpush.msrb.mxu0 %v468_v9  ;;  %v241_v8 = vld [vmem:[#allocation5 + $0x2a8] sm:$0xff] }
  0x54   :  { %v464_v13 = vld [vmem:[#allocation5 + $0x9a0] sm:$0xff]  ;;  %1006 = vmatpush.msrb.mxu3 %v277_v10  ;;  %876 = vmatpush.msrb.mxu1 %v532_v11  ;;  %v2515_v10 = vld [vmem:[#allocation2 + $0x150] sm:$0xff] }
  0x55   :  { %v68_v15 = vld [vmem:[#allocation2 + $0x40] sm:$0xff]  ;;  %942 = vmatpush.msrb.mxu2 %v209_v12  ;;  %812 = vmatpush.msrb.mxu0 %v464_v13  ;;  %v2517_v12 = vld [vmem:[#allocation2 + $0x158] sm:$0xff]  ;;  %v105_v13 = vld [vmem:[#allocation2 + $0x168] sm:$0xff] }
  0x56   :  { %v528_v17 = vld [vmem:[#allocation5 + $0xba0] sm:$0xff]  ;;  %569 = vmatmul.f32.gmra.mxu0 %v2479_v14  ;;  %699 = vmatmul.f32.gmra.mxu2 %v68_v15  ;;  %v173_v15 = vld [vmem:[#allocation5 + $0x88] sm:$0xff] }
  0x57   :  { %v460_v21 = vld [vmem:[#allocation5 + $0x980] sm:$0xff]  ;;  %1007 = vmatpush.msrb.mxu3 %v273_v16  ;;  %877 = vmatpush.msrb.mxu1 %v528_v17  ;;  %v237_v17 = vld [vmem:[#allocation5 + $0x288] sm:$0xff] }
  0x58   :  { %v524_v23 = vld [vmem:[#allocation5 + $0xb80] sm:$0xff]  ;;  %634 = vmatmul.f32.gmra.mxu1 %v2481_v18  ;;  %943 = vmatpush.msrb.mxu2 %v205_v19 }
  0x59   :  { %v456_v25 = vld [vmem:[#allocation5 + $0x960] sm:$0xff]  ;;  %764 = vmatmul.f32.gmra.mxu3 %v69_v20  ;;  %813 = vmatpush.msrb.mxu0 %v460_v21  ;;  %v110_v21 = vld [vmem:[#allocation2 + $0x190] sm:$0xff] }
  0x5a   :  { %v520_v27 = vld [vmem:[#allocation5 + $0xb60] sm:$0xff]  ;;  %1008 = vmatpush.msrb.mxu3 %v269_v22  ;;  %878 = vmatpush.msrb.mxu1 %v524_v23  ;;  %v2523_v22 = vld [vmem:[#allocation2 + $0x188] sm:$0xff]  ;;  %v111_v23 = vld [vmem:[#allocation2 + $0x198] sm:$0xff] }
  0x5b   :  { %v452_v29 = vld [vmem:[#allocation5 + $0x940] sm:$0xff]  ;;  %944 = vmatpush.msrb.mxu2 %v201_v24  ;;  %814 = vmatpush.msrb.mxu0 %v456_v25  ;;  %v169_v24 = vld [vmem:[#allocation5 + $0x68] sm:$0xff] }
  0x5c   :  { %v2485_v30 = vld [vmem:[#allocation2 + $0x60] sm:$0xff]  ;;  %1009 = vmatpush.msrb.mxu3 %v265_v26  ;;  %879 = vmatpush.msrb.mxu1 %v520_v27  ;;  %v233_v26 = vld [vmem:[#allocation5 + $0x268] sm:$0xff] }
  0x5d   :  { %v516_v33 = vld [vmem:[#allocation5 + $0xb40] sm:$0xff]  ;;  %945 = vmatpush.msrb.mxu2 %v197_v28  ;;  %815 = vmatpush.msrb.mxu0 %v452_v29  ;;  %v2527_v28 = vld [vmem:[#allocation2 + $0x1b0] sm:$0xff] }
  0x5e   :  { %572 = vmatmul.f32.gmra.mxu0 %v2485_v30  ;;  %702 = vmatmul.f32.gmra.mxu2 %v74_v31  ;;  %v448_v37 = vld [vmem:[#allocation5 + $0x920] sm:$0xff]  ;;  %v2529_v31 = vld [vmem:[#allocation2 + $0x1b8] sm:$0xff] }
  0x5f   :  { %1010 = vmatpush.msrb.mxu3 %v261_v32  ;;  %880 = vmatpush.msrb.mxu1 %v516_v33  ;;  %v512_v39 = vld [vmem:[#allocation5 + $0xb20] sm:$0xff]  ;;  %v117_v32 = vld [vmem:[#allocation2 + $0x1c8] sm:$0xff] }
  0x60   :  { %637 = vmatmul.f32.gmra.mxu1 %v2487_v34  ;;  %946 = vmatpush.msrb.mxu2 %v193_v36  ;;  %v80_v41 = vld [vmem:[#allocation2 + $0xa0] sm:$0xff]  ;;  %v165_v33 = vld [vmem:[#allocation5 + $0x48] sm:$0xff] }
  0x61   :  { %767 = vmatmul.f32.gmra.mxu3 %v75_v35  ;;  %816 = vmatpush.msrb.mxu0 %v448_v37  ;;  %v444_v45 = vld [vmem:[#allocation5 + $0x900] sm:$0xff]  ;;  %v229_v36 = vld [vmem:[#allocation5 + $0x248] sm:$0xff] }
  0x62   :  { %1011 = vmatpush.msrb.mxu3 %v257_v38  ;;  %881 = vmatpush.msrb.mxu1 %v512_v39  ;;  %v508_v47 = vld [vmem:[#allocation5 + $0xb00] sm:$0xff]  ;;  %v122_v39 = vld [vmem:[#allocation2 + $0x1f0] sm:$0xff] }
  0x63   :  { %947 = vmatpush.msrb.mxu2 %v189_v44  ;;  %817 = vmatpush.msrb.mxu0 %v444_v45  ;;  %v2497_v48 = vld [vmem:[#allocation2 + $0xc0] sm:$0xff]  ;;  %v161_v44 = vld [vmem:[#allocation5 + $0x28] sm:$0xff] }
  0x64   :  { %1012 = vmatpush.msrb.mxu3 %v253_v46  ;;  %882 = vmatpush.msrb.mxu1 %v508_v47  ;;  %v440_v53 = vld [vmem:[#allocation5 + $0x8e0] sm:$0xff]  ;;  %v225_v46 = vld [vmem:[#allocation5 + $0x228] sm:$0xff] }
  0x65   :  { %948 = vmatpush.msrb.mxu2 %v185_v52  ;;  %v504_v55 = vld [vmem:[#allocation5 + $0xae0] sm:$0xff]  ;;  %818 = vmatpush.msrb.mxu0 %v440_v53  ;;  %v2541_v52 = vld [vmem:[#allocation2 + $0x218] sm:$0xff]  ;;  %v129_v53 = vld [vmem:[#allocation2 + $0x228] sm:$0xff] }
  0x66   :  { %575 = vmatmul.f32.gmra.mxu0 %v2491_v40  ;;  %705 = vmatmul.f32.gmra.mxu2 %v80_v41  ;;  %v92_v57 = vld [vmem:[#allocation2 + $0x100] sm:$0xff]  ;;  %v2535_v41 = vld [vmem:[#allocation2 + $0x1e8] sm:$0xff] }
  0x67   :  { %1013 = vmatpush.msrb.mxu3 %v249_v54  ;;  %883 = vmatpush.msrb.mxu1 %v504_v55  ;;  %v436_v61 = vld [vmem:[#allocation5 + $0x8c0] sm:$0xff]  ;;  %v157_v54 = vld [vmem:[#allocation5 + $0x8] sm:$0xff] }
  0x68   :  { %640 = vmatmul.f32.gmra.mxu1 %v2493_v42  ;;  %949 = vmatpush.msrb.mxu2 %v181_v60  ;;  %v500_v0 = vld [vmem:[#allocation5 + $0xac0] sm:$0xff] }
  0x69   :  { %770 = vmatmul.f32.gmra.mxu3 %v81_v43  ;;  %819 = vmatpush.msrb.mxu0 %v436_v61  ;;  %v2509_v1 = vld [vmem:[#allocation2 + $0x120] sm:$0xff]  ;;  %v123_v43 = vld [vmem:[#allocation2 + $0x1f8] sm:$0xff]  ;;  %v134_v61 = vld [vmem:[#allocation2 + $0x250] sm:$0xff] }
  0x6a   :  { %1014 = vmatpush.msrb.mxu3 %v245_v63  ;;  %884 = vmatpush.msrb.mxu1 %v500_v0  ;;  %v432_v7 = vld [vmem:[#allocation5 + $0x8a0] sm:$0xff]  ;;  %v2547_v63 = vld [vmem:[#allocation2 + $0x248] sm:$0xff]  ;;  %v135_v0 = vld [vmem:[#allocation2 + $0x258] sm:$0xff] }
  0x6b   :  { %950 = vmatpush.msrb.mxu2 %v177_v6  ;;  %v496_v9 = vld [vmem:[#allocation5 + $0xaa0] sm:$0xff]  ;;  %820 = vmatpush.msrb.mxu0 %v432_v7  ;;  %v537_v6 = vld [vmem:[#allocation5 + $0xbe8] sm:$0xff] }
  0x6c   :  { %1015 = vmatpush.msrb.mxu3 %v241_v8  ;;  %v104_v11 = vld [vmem:[#allocation2 + $0x160] sm:$0xff]  ;;  %885 = vmatpush.msrb.mxu1 %v496_v9  ;;  %v409_v7 = vld [vmem:[#allocation5 + $0x7e8] sm:$0xff]  ;;  %v2551_v8 = vld [vmem:[#allocation2 + $0x270] sm:$0xff] }
  0x6d   :  { %951 = vmatpush.msrb.mxu2 %v173_v15  ;;  %v428_v16 = vld [vmem:[#allocation5 + $0x880] sm:$0xff]  ;;  %v469_v15 = vld [vmem:[#allocation5 + $0x9c8] sm:$0xff] }
  0x6e   :  { %578 = vmatmul.f32.gmra.mxu0 %v2497_v48  ;;  %708 = vmatmul.f32.gmra.mxu2 %v86_v49  ;;  %v492_v19 = vld [vmem:[#allocation5 + $0xa80] sm:$0xff]  ;;  %v2539_v49 = vld [vmem:[#allocation2 + $0x210] sm:$0xff] }
  0x6f   :  { %821 = vmatpush.msrb.mxu0 %v428_v16  ;;  %1016 = vmatpush.msrb.mxu3 %v237_v17  ;;  %v2521_v20 = vld [vmem:[#allocation2 + $0x180] sm:$0xff]  ;;  %v341_v16 = vld [vmem:[#allocation5 + $0x5c8] sm:$0xff] }
  0x70   :  { %643 = vmatmul.f32.gmra.mxu1 %v2499_v50  ;;  %952 = vmatpush.msrb.mxu2 %v169_v24  ;;  %v424_v25 = vld [vmem:[#allocation5 + $0x860] sm:$0xff]  ;;  %v533_v17 = vld [vmem:[#allocation5 + $0xbc8] sm:$0xff] }
  0x71   :  { %773 = vmatmul.f32.gmra.mxu3 %v87_v51  ;;  %886 = vmatpush.msrb.mxu1 %v492_v19  ;;  %v488_v27 = vld [vmem:[#allocation5 + $0xa60] sm:$0xff]  ;;  %v405_v19 = vld [vmem:[#allocation5 + $0x7c8] sm:$0xff] }
  0x72   :  { %822 = vmatpush.msrb.mxu0 %v424_v25  ;;  %1017 = vmatpush.msrb.mxu3 %v233_v26  ;;  %v116_v29 = vld [vmem:[#allocation2 + $0x1c0] sm:$0xff]  ;;  %v2559_v24 = vld [vmem:[#allocation2 + $0x2a8] sm:$0xff]  ;;  %v147_v25 = vld [vmem:[#allocation2 + $0x2b8] sm:$0xff] }
  0x73   :  { %887 = vmatpush.msrb.mxu1 %v488_v27  ;;  %953 = vmatpush.msrb.mxu2 %v165_v33  ;;  %v420_v35 = vld [vmem:[#allocation5 + $0x840] sm:$0xff]  ;;  %v465_v26 = vld [vmem:[#allocation5 + $0x9a8] sm:$0xff]  ;;  %v2563_v33 = vld [vmem:[#allocation2 + $0x2d0] sm:$0xff] }
  0x74   :  { %v484_v37 = vld [vmem:[#allocation5 + $0xa40] sm:$0xff]  ;;  %823 = vmatpush.msrb.mxu0 %v420_v35  ;;  %1018 = vmatpush.msrb.mxu3 %v229_v36  ;;  %v337_v27 = vld [vmem:[#allocation5 + $0x5a8] sm:$0xff]  ;;  %v2565_v36 = vld [vmem:[#allocation2 + $0x2d8] sm:$0xff] }
  0x75   :  { %v2533_v38 = vld [vmem:[#allocation2 + $0x1e0] sm:$0xff]  ;;  %888 = vmatpush.msrb.mxu1 %v484_v37  ;;  %954 = vmatpush.msrb.mxu2 %v161_v44 }
  0x76   :  { %581 = vmatmul.f32.gmra.mxu0 %v2503_v56  ;;  %711 = vmatmul.f32.gmra.mxu2 %v92_v57  ;;  %v416_v45 = vld [vmem:[#allocation5 + $0x820] sm:$0xff]  ;;  %v221_v57 = vld [vmem:[#allocation5 + $0x208] sm:$0xff] }
  0x77   :  { %v480_v47 = vld [vmem:[#allocation5 + $0xa20] sm:$0xff]  ;;  %824 = vmatpush.msrb.mxu0 %v416_v45  ;;  %1019 = vmatpush.msrb.mxu3 %v225_v46  ;;  %v333_v45 = vld [vmem:[#allocation5 + $0x588] sm:$0xff] }
  0x78   :  { %646 = vmatmul.f32.gmra.mxu1 %v2505_v58  ;;  %v128_v51 = vld [vmem:[#allocation2 + $0x220] sm:$0xff]  ;;  %955 = vmatpush.msrb.mxu2 %v157_v54  ;;  %v525_v46 = vld [vmem:[#allocation5 + $0xb88] sm:$0xff] }
  0x79   :  { %776 = vmatmul.f32.gmra.mxu3 %v93_v59  ;;  %889 = vmatpush.msrb.mxu1 %v480_v47  ;;  %v412_v55 = vld [vmem:[#allocation5 + $0x800] sm:$0xff]  ;;  %v397_v47 = vld [vmem:[#allocation5 + $0x788] sm:$0xff] }
  0x7a   :  { %v476_v59 = vld [vmem:[#allocation5 + $0xa00] sm:$0xff]  ;;  %825 = vmatpush.msrb.mxu0 %v412_v55  ;;  %1020 = vmatpush.msrb.mxu3 %v221_v57  ;;  %v2577_v57 = vld [vmem:[#allocation2 + $0x28] sm:$0xff] }
  0x7b   :  { %v2545_v60 = vld [vmem:[#allocation2 + $0x240] sm:$0xff]  ;;  %890 = vmatpush.msrb.mxu1 %v476_v59 }
  0x7c   :  { %1265 = vmatpush.msra.mxu3 %v537_v6  ;;  %v140_v9 = vld [vmem:[#allocation2 + $0x280] sm:$0xff] }
  0x7d   :  { %1135 = vmatpush.msra.mxu1 %v409_v7  ;;  %v152_v35 = vld [vmem:[#allocation2 + $0x2e0] sm:$0xff]  ;;  %v393_v7 = vld [vmem:[#allocation5 + $0x768] sm:$0xff] }
  0x7e   :  { %584 = vmatmul.f32.gmra.mxu0 %v2509_v1  ;;  %714 = vmatmul.f32.gmra.mxu2 %v98_v2  ;;  %v473_v2 = vld [vmem:[#allocation5 + $0x9e8] sm:$0xff]  ;;  %v2567_v37 = vld [vmem:[#allocation7] sm:$0xf] }
  0x7f   :  { %1200 = vmatpush.msra.mxu2 %v473_v2  ;;  %1266 = vmatpush.msra.mxu3 %v533_v17  ;;  %v2572_v44 = vperm.slane %v2567_v37, 0  ;;  %v329_v2 = vld [vmem:[#allocation5 + $0x568] sm:$0xff] }
  0x80   :  { %649 = vmatmul.f32.gmra.mxu1 %v2511_v4 }
  0x81   :  { %779 = vmatmul.f32.gmra.mxu3 %v99_v5  ;;  %v345_v5 = vld [vmem:[#allocation5 + $0x5e8] sm:$0xff]  ;;  %1201 = vmatpush.msra.mxu2 %v469_v15 }
  0x82   :  { %1070 = vmatpush.msra.mxu0 %v345_v5  ;;  %1136 = vmatpush.msra.mxu1 %v405_v19  ;;  %v521_v5 = vld [vmem:[#allocation5 + $0xb68] sm:$0xff]  ;;  %v2588_v19 = vld [vmem:[#allocation2 + $0x58] sm:$0xff] }
  0x83   :  { %1202 = vmatpush.msra.mxu2 %v465_v26  ;;  %v325_v26 = vld [vmem:[#allocation5 + $0x548] sm:$0xff] }
  0x84   :  { %1071 = vmatpush.msra.mxu0 %v341_v16 }
  0x86   :  { %587 = vmatmul.f32.gmra.mxu0 %v2515_v10  ;;  %717 = vmatmul.f32.gmra.mxu2 %v104_v11  ;;  %v2553_v11 = vld [vmem:[#allocation2 + $0x278] sm:$0xff] }
  0x87   :  { %1072 = vmatpush.msra.mxu0 %v337_v27  ;;  %v517_v27 = vld [vmem:[#allocation5 + $0xb48] sm:$0xff] }
  0x88   :  { %652 = vmatmul.f32.gmra.mxu1 %v2517_v12 }
  0x89   :  { %782 = vmatmul.f32.gmra.mxu3 %v105_v13  ;;  %v141_v13 = vld [vmem:[#allocation2 + $0x288] sm:$0xff]  ;;  %1073 = vmatpush.msra.mxu0 %v333_v45 }
  0x8b   :  { %1074 = vmatpush.msra.mxu0 %v329_v2 }
  0x8d   :  { %1075 = vmatpush.msra.mxu0 %v325_v26  ;;  %v381_v26 = vld [vmem:[#allocation5 + $0x708] sm:$0xff] }
  0x8e   :  { %590 = vmatmul.f32.gmra.mxu0 %v2521_v20  ;;  %720 = vmatmul.f32.gmra.mxu2 %v110_v21  ;;  %v2557_v21 = vld [vmem:[#allocation2 + $0x2a0] sm:$0xff] }
  0x90   :  { %655 = vmatmul.f32.gmra.mxu1 %v2523_v22 }
  0x91   :  { %785 = vmatmul.f32.gmra.mxu3 %v111_v23  ;;  %v146_v23 = vld [vmem:[#allocation2 + $0x2b0] sm:$0xff] }
  0x96   :  { %593 = vmatmul.f32.gmra.mxu0 %v2527_v28  ;;  %723 = vmatmul.f32.gmra.mxu2 %v116_v29  ;;  %v529_v29 = vld [vmem:[#allocation5 + $0xba8] sm:$0xff] }
  0x97   :  { %1267 = vmatpush.msra.mxu3 %v529_v29 }
  0x98   :  { %658 = vmatmul.f32.gmra.mxu1 %v2529_v31 }
  0x99   :  { %788 = vmatmul.f32.gmra.mxu3 %v117_v32  ;;  %v401_v32 = vld [vmem:[#allocation5 + $0x7a8] sm:$0xff] }
  0x9a   :  { %1137 = vmatpush.msra.mxu1 %v401_v32  ;;  %1268 = vmatpush.msra.mxu3 %v525_v46  ;;  %v389_v32 = vld [vmem:[#allocation5 + $0x748] sm:$0xff] }
  0x9c   :  { %1138 = vmatpush.msra.mxu1 %v397_v47  ;;  %1269 = vmatpush.msra.mxu3 %v521_v5  ;;  %v2599_v47 = vld [vmem:[#allocation2 + $0x88] sm:$0xff]  ;;  %v2605_v5 = vld [vmem:[#allocation2 + $0xb0] sm:$0xff] }
  0x9e   :  { %596 = vmatmul.f32.gmra.mxu0 %v2533_v38  ;;  %726 = vmatmul.f32.gmra.mxu2 %v122_v39  ;;  %v153_v39 = vld [vmem:[#allocation2 + $0x2e8] sm:$0xff] }
  0x9f   :  { %1139 = vmatpush.msra.mxu1 %v393_v7  ;;  %1270 = vmatpush.msra.mxu3 %v517_v27 }
  0xa0   :  { %661 = vmatmul.f32.gmra.mxu1 %v2535_v41 }
  0xa1   :  { %791 = vmatmul.f32.gmra.mxu3 %v123_v43  ;;  %v461_v43 = vld [vmem:[#allocation5 + $0x988] sm:$0xff]  ;;  %1140 = vmatpush.msra.mxu1 %v389_v32 }
  0xa2   :  { %1203 = vmatpush.msra.mxu2 %v461_v43 }
  0xa6   :  { %599 = vmatmul.f32.gmra.mxu0 %v2539_v49  ;;  %729 = vmatmul.f32.gmra.mxu2 %v128_v51 }
  0xa8   :  { %664 = vmatmul.f32.gmra.mxu1 %v2541_v52 }
  0xa9   :  { %794 = vmatmul.f32.gmra.mxu3 %v129_v53  ;;  %v2574_v53 = vld [vmem:[#allocation2 + $0x20] sm:$0xff] }
  0xae   :  { %602 = vmatmul.f32.gmra.mxu0 %v2545_v60  ;;  %732 = vmatmul.f32.gmra.mxu2 %v134_v61  ;;  %v457_v61 = vld [vmem:[#allocation5 + $0x968] sm:$0xff] }
  0xaf   :  { %1204 = vmatpush.msra.mxu2 %v457_v61 }
  0xb0   :  { %667 = vmatmul.f32.gmra.mxu1 %v2547_v63 }
  0xb1   :  { %797 = vmatmul.f32.gmra.mxu3 %v135_v0 }
  0xb6   :  { %605 = vmatmul.f32.gmra.mxu0 %v2551_v8  ;;  %735 = vmatmul.f32.gmra.mxu2 %v140_v9 }
  0xb8   :  { %670 = vmatmul.f32.gmra.mxu1 %v2553_v11 }
  0xb9   :  { %800 = vmatmul.f32.gmra.mxu3 %v141_v13  ;;  %v2583_v13 = vld [vmem:[#allocation2 + $0x50] sm:$0xff] }
  0xbe   :  { %608 = vmatmul.f32.gmra.mxu0 %v2557_v21  ;;  %738 = vmatmul.f32.gmra.mxu2 %v146_v23  ;;  %v453_v23 = vld [vmem:[#allocation5 + $0x948] sm:$0xff] }
  0xbf   :  { %1205 = vmatpush.msra.mxu2 %v453_v23  ;;  %v509_v23 = vld [vmem:[#allocation5 + $0xb08] sm:$0xff] }
  0xc0   :  { %673 = vmatmul.f32.gmra.mxu1 %v2559_v24 }
  0xc1   :  { %803 = vmatmul.f32.gmra.mxu3 %v147_v25 }
  0xc6   :  { %611 = vmatmul.f32.gmra.mxu0 %v2563_v33  ;;  %741 = vmatmul.f32.gmra.mxu2 %v152_v35 }
  0xc8   :  { %676 = vmatmul.f32.gmra.mxu1 %v2565_v36 }
  0xc9   :  { %806 = vmatmul.f32.gmra.mxu3 %v153_v39  ;;  %v2594_v39 = vld [vmem:[#allocation2 + $0x80] sm:$0xff] }
  0xcb   :  { %v567_v51 = vpop.f32.mrf.mxu0 }
  0xcc   :  { %v568_v54 = vadd.f32 %v567_v51, %v2572_v44  ;;  %v449_v51 = vld [vmem:[#allocation5 + $0x928] sm:$0xff] }
  0xcd   :  { %v632_v55 = vpop.f32.mrf.mxu1  ;;  %1206 = vmatpush.msra.mxu2 %v449_v51  ;;  %v313_v51 = vld [vmem:[#allocation5 + $0x4e8] sm:$0xff] }
  0xce   :  { %v633_v59 = vadd.f32 %v632_v55, %v568_v54  ;;  %826 = vmatmul.f32.vlgmr.msrb.gmra.mxu0 %v2574_v53  ;;  %956 = vmatmul.f32.vlgmr.msrb.gmra.mxu2 %v2473_v62  ;;  %v321_v55 = vld [vmem:[#allocation5 + $0x528] sm:$0xff] }
  0xcf   :  { %1076 = vmatpush.msra.mxu0 %v321_v55 }
  0xd0   :  { %891 = vmatmul.f32.vlgmr.msrb.gmra.mxu1 %v2577_v57 }
  0xd1   :  { %1021 = vmatmul.f32.vlgmr.msrb.gmra.mxu3 %v2475_v3  ;;  %v697_v0 = vpop.f32.mrf.mxu2 }
  0xd2   :  { %v698_v6 = vadd.f32 %v697_v0, %v633_v59  ;;  %v513_v59 = vld [vmem:[#allocation5 + $0xb28] sm:$0xff] }
  0xd3   :  { %v570_v9 = vpop.f32.mrf.mxu0  ;;  %1271 = vmatpush.msra.mxu3 %v513_v59  ;;  %v385_v0 = vld [vmem:[#allocation5 + $0x728] sm:$0xff] }
  0xd4   :  { %v571_v15 = vadd.f32 %v570_v9, %v2572_v44  ;;  %v762_v62 = vpop.f32.mrf.mxu3  ;;  %1141 = vmatpush.msra.mxu1 %v385_v0  ;;  %v377_v59 = vld [vmem:[#allocation5 + $0x6e8] sm:$0xff]  ;;  %v2627_v0 = vld [vmem:[#allocation2 + $0x110] sm:$0xff] }
  0xd5   :  { %v2586_v16 = vadd.f32 %v762_v62, %v698_v6  ;;  %v635_v17 = vpop.f32.mrf.mxu1  ;;  %v445_v62 = vld [vmem:[#allocation5 + $0x908] sm:$0xff]  ;;  %1272 = vmatpush.msra.mxu3 %v509_v23 }
  0xd6   :  { %v636_v3 = vadd.f32 %v635_v17, %v571_v15  ;;  %829 = vmatmul.f32.gmra.mxu0 %v2583_v13  ;;  %959 = vmatmul.f32.gmra.mxu2 %v2479_v14  ;;  %v2610_v15 = vld [vmem:[#allocation2 + $0xb8] sm:$0xff] }
  0xd7   :  { %1207 = vmatpush.msra.mxu2 %v445_v62  ;;  %1142 = vmatpush.msra.mxu1 %v381_v26 }
  0xd8   :  { %894 = vmatmul.f32.gmra.mxu1 %v2588_v19 }
  0xd9   :  { %1024 = vmatmul.f32.gmra.mxu3 %v2481_v18  ;;  %v700_v25 = vpop.f32.mrf.mxu2  ;;  %1143 = vmatpush.msra.mxu1 %v377_v59  ;;  %v369_v59 = vld [vmem:[#allocation5 + $0x6a8] sm:$0xff] }
  0xda   :  { %v701_v29 = vadd.f32 %v700_v25, %v636_v3  ;;  %v317_v3 = vld [vmem:[#allocation5 + $0x508] sm:$0xff] }
  0xdb   :  { %v573_v35 = vpop.f32.mrf.mxu0  ;;  %1077 = vmatpush.msra.mxu0 %v317_v3  ;;  %v501_v3 = vld [vmem:[#allocation5 + $0xac8] sm:$0xff] }
  0xdc   :  { %v574_v43 = vadd.f32 %v573_v35, %v2572_v44  ;;  %v765_v14 = vpop.f32.mrf.mxu3 }
  0xdd   :  { %v2597_v45 = vadd.f32 %v765_v14, %v701_v29  ;;  %v638_v46 = vpop.f32.mrf.mxu1  ;;  %v2616_v29 = vld [vmem:[#allocation2 + $0xe0] sm:$0xff]  ;;  %v2621_v14 = vld [vmem:[#allocation2 + $0xe8] sm:$0xff]  ;;  %1078 = vmatpush.msra.mxu0 %v313_v51 }
  0xde   :  { %v639_v18 = vadd.f32 %v638_v46, %v574_v43  ;;  %832 = vmatmul.f32.gmra.mxu0 %v2594_v39  ;;  %962 = vmatmul.f32.gmra.mxu2 %v2485_v30  ;;  %v441_v46 = vld [vmem:[#allocation5 + $0x8e8] sm:$0xff] }
  0xdf   :  { %1208 = vmatpush.msra.mxu2 %v441_v46  ;;  %v433_v46 = vld [vmem:[#allocation5 + $0x8a8] sm:$0xff] }
  0xe0   :  { %897 = vmatmul.f32.gmra.mxu1 %v2599_v47  ;;  %v305_v51 = vld [vmem:[#allocation5 + $0x4a8] sm:$0xff] }
  0xe1   :  { %1027 = vmatmul.f32.gmra.mxu3 %v2487_v34  ;;  %v703_v54 = vpop.f32.mrf.mxu2 }
  0xe2   :  { %v704_v61 = vadd.f32 %v703_v54, %v639_v18  ;;  %v505_v54 = vld [vmem:[#allocation5 + $0xae8] sm:$0xff] }
  0xe3   :  { %v576_v2 = vpop.f32.mrf.mxu0  ;;  %1273 = vmatpush.msra.mxu3 %v505_v54  ;;  %v497_v54 = vld [vmem:[#allocation5 + $0xaa8] sm:$0xff] }
  0xe4   :  { %v577_v6 = vadd.f32 %v576_v2, %v2572_v44  ;;  %v768_v30 = vpop.f32.mrf.mxu3 }
  0xe5   :  { %v2608_v7 = vadd.f32 %v768_v30, %v704_v61  ;;  %v641_v9 = vpop.f32.mrf.mxu1  ;;  %1274 = vmatpush.msra.mxu3 %v501_v3  ;;  %v301_v3 = vld [vmem:[#allocation5 + $0x488] sm:$0xff] }
  0xe6   :  { %v642_v34 = vadd.f32 %v641_v9, %v577_v6  ;;  %835 = vmatmul.f32.gmra.mxu0 %v2605_v5  ;;  %965 = vmatmul.f32.gmra.mxu2 %v2491_v40  ;;  %v2632_v9 = vld [vmem:[#allocation2 + $0x118] sm:$0xff] }
  0xe7   :  { %1275 = vmatpush.msra.mxu3 %v497_v54 }
  0xe8   :  { %900 = vmatmul.f32.gmra.mxu1 %v2610_v15 }
  0xe9   :  { %1030 = vmatmul.f32.gmra.mxu3 %v2493_v42  ;;  %v706_v17 = vpop.f32.mrf.mxu2 }
  0xea   :  { %v707_v25 = vadd.f32 %v706_v17, %v642_v34  ;;  %v437_v34 = vld [vmem:[#allocation5 + $0x8c8] sm:$0xff] }
  0xeb   :  { %v579_v27 = vpop.f32.mrf.mxu0  ;;  %1209 = vmatpush.msra.mxu2 %v437_v34  ;;  %v309_v17 = vld [vmem:[#allocation5 + $0x4c8] sm:$0xff]  ;;  %v2654_v34 = vld [vmem:[#allocation2 + $0x178] sm:$0xff] }
  0xec   :  { %v580_v32 = vadd.f32 %v579_v27, %v2572_v44  ;;  %v771_v40 = vpop.f32.mrf.mxu3  ;;  %1079 = vmatpush.msra.mxu0 %v309_v17  ;;  %v2638_v27 = vld [vmem:[#allocation2 + $0x140] sm:$0xff] }
  0xed   :  { %v2619_v35 = vadd.f32 %v771_v40, %v707_v25  ;;  %v644_v43 = vpop.f32.mrf.mxu1  ;;  %v373_v25 = vld [vmem:[#allocation5 + $0x6c8] sm:$0xff]  ;;  %1210 = vmatpush.msra.mxu2 %v433_v46 }
  0xee   :  { %v645_v42 = vadd.f32 %v644_v43, %v580_v32  ;;  %838 = vmatmul.f32.gmra.mxu0 %v2616_v29  ;;  %968 = vmatmul.f32.gmra.mxu2 %v2497_v48 }
  0xef   :  { %1144 = vmatpush.msra.mxu1 %v373_v25  ;;  %1080 = vmatpush.msra.mxu0 %v305_v51  ;;  %v425_v51 = vld [vmem:[#allocation5 + $0x868] sm:$0xff] }
  0xf0   :  { %903 = vmatmul.f32.gmra.mxu1 %v2621_v14 }
  0xf1   :  { %1033 = vmatmul.f32.gmra.mxu3 %v2499_v50  ;;  %v709_v18 = vpop.f32.mrf.mxu2  ;;  %1145 = vmatpush.msra.mxu1 %v369_v59  ;;  %v489_v59 = vld [vmem:[#allocation5 + $0xa68] sm:$0xff] }
  0xf2   :  { %v710_v55 = vadd.f32 %v709_v18, %v645_v42  ;;  %v2643_v42 = vld [vmem:[#allocation2 + $0x148] sm:$0xff]  ;;  %1081 = vmatpush.msra.mxu0 %v301_v3  ;;  %v2676_v3 = vld [vmem:[#allocation2 + $0x1d8] sm:$0xff] }
  0xf3   :  { %v582_v61 = vpop.f32.mrf.mxu0 }
  0xf4   :  { %v583_v2 = vadd.f32 %v582_v61, %v2572_v44  ;;  %v774_v48 = vpop.f32.mrf.mxu3 }
  0xf5   :  { %v2630_v6 = vadd.f32 %v774_v48, %v710_v55  ;;  %v647_v30 = vpop.f32.mrf.mxu1 }
  0xf6   :  { %v648_v50 = vadd.f32 %v647_v30, %v583_v2  ;;  %841 = vmatmul.f32.gmra.mxu0 %v2627_v0  ;;  %971 = vmatmul.f32.gmra.mxu2 %v2503_v56  ;;  %v2649_v2 = vld [vmem:[#allocation2 + $0x170] sm:$0xff] }
  0xf8   :  { %906 = vmatmul.f32.gmra.mxu1 %v2632_v9 }
  0xf9   :  { %1036 = vmatmul.f32.gmra.mxu3 %v2505_v58  ;;  %v712_v62 = vpop.f32.mrf.mxu2 }
  0xfa   :  { %v713_v23 = vadd.f32 %v712_v62, %v648_v50  ;;  %v429_v62 = vld [vmem:[#allocation5 + $0x888] sm:$0xff] }
  0xfb   :  { %v585_v26 = vpop.f32.mrf.mxu0  ;;  %1211 = vmatpush.msra.mxu2 %v429_v62 }
  0xfc   :  { %v586_v32 = vadd.f32 %v585_v26, %v2572_v44  ;;  %v777_v56 = vpop.f32.mrf.mxu3  ;;  %v365_v26 = vld [vmem:[#allocation5 + $0x688] sm:$0xff] }
  0xfd   :  { %v2641_v40 = vadd.f32 %v777_v56, %v713_v23  ;;  %v650_v43 = vpop.f32.mrf.mxu1  ;;  %v493_v23 = vld [vmem:[#allocation5 + $0xa88] sm:$0xff]  ;;  %v2660_v56 = vld [vmem:[#allocation2 + $0x1a0] sm:$0xff]  ;;  %1146 = vmatpush.msra.mxu1 %v365_v26  ;;  %1212 = vmatpush.msra.mxu2 %v425_v51 }
  0xfe   :  { %v651_v58 = vadd.f32 %v650_v43, %v586_v32  ;;  %844 = vmatmul.f32.gmra.mxu0 %v2638_v27  ;;  %974 = vmatmul.f32.gmra.mxu2 %v2509_v1  ;;  %v293_v26 = vld [vmem:[#allocation5 + $0x448] sm:$0xff] }
  0xff   :  { %1276 = vmatpush.msra.mxu3 %v493_v23  ;;  %v421_v23 = vld [vmem:[#allocation5 + $0x848] sm:$0xff] }
 0x100   :  { %909 = vmatmul.f32.gmra.mxu1 %v2643_v42  ;;  %1213 = vmatpush.msra.mxu2 %v421_v23  ;;  %v2693_v23 = vld [vmem:[#allocation2 + $0x230] sm:$0xff] }
 0x101   :  { %1039 = vmatmul.f32.gmra.mxu3 %v2511_v4  ;;  %v715_v18 = vpop.f32.mrf.mxu2 }
 0x102   :  { %v716_v55 = vadd.f32 %v715_v18, %v651_v58  ;;  %v2665_v18 = vld [vmem:[#allocation2 + $0x1a8] sm:$0xff]  ;;  %1277 = vmatpush.msra.mxu3 %v489_v59 }
 0x103   :  { %v588_v61 = vpop.f32.mrf.mxu0  ;;  %v2687_v59 = vld [vmem:[#allocation2 + $0x208] sm:$0xff] }
 0x104   :  { %v589_v48 = vadd.f32 %v588_v61, %v2572_v44  ;;  %v780_v1 = vpop.f32.mrf.mxu3 }
 0x105   :  { %v2652_v30 = vadd.f32 %v780_v1, %v716_v55  ;;  %v653_v50 = vpop.f32.mrf.mxu1  ;;  %v297_v55 = vld [vmem:[#allocation5 + $0x468] sm:$0xff] }
 0x106   :  { %v654_v4 = vadd.f32 %v653_v50, %v589_v48  ;;  %847 = vmatmul.f32.gmra.mxu0 %v2649_v2  ;;  %977 = vmatmul.f32.gmra.mxu2 %v2515_v10  ;;  %v361_v48 = vld [vmem:[#allocation5 + $0x668] sm:$0xff]  ;;  %v2671_v50 = vld [vmem:[#allocation2 + $0x1d0] sm:$0xff] }
 0x107   :  { %1082 = vmatpush.msra.mxu0 %v297_v55  ;;  %1147 = vmatpush.msra.mxu1 %v361_v48 }
 0x108   :  { %912 = vmatmul.f32.gmra.mxu1 %v2654_v34 }
 0x109   :  { %1042 = vmatmul.f32.gmra.mxu3 %v2517_v12  ;;  %v718_v17 = vpop.f32.mrf.mxu2  ;;  %1083 = vmatpush.msra.mxu0 %v293_v26 }
 0x10a   :  { %v719_v25 = vadd.f32 %v718_v17, %v654_v4 }
 0x10b   :  { %v591_v32 = vpop.f32.mrf.mxu0 }
 0x10c   :  { %v592_v43 = vadd.f32 %v591_v32, %v2572_v44  ;;  %v783_v10 = vpop.f32.mrf.mxu3  ;;  %v485_v32 = vld [vmem:[#allocation5 + $0xa48] sm:$0xff] }
 0x10d   :  { %v2663_v58 = vadd.f32 %v783_v10, %v719_v25  ;;  %v656_v46 = vpop.f32.mrf.mxu1  ;;  %1278 = vmatpush.msra.mxu3 %v485_v32  ;;  %v357_v10 = vld [vmem:[#allocation5 + $0x648] sm:$0xff] }
 0x10e   :  { %v657_v12 = vadd.f32 %v656_v46, %v592_v43  ;;  %850 = vmatmul.f32.gmra.mxu0 %v2660_v56  ;;  %980 = vmatmul.f32.gmra.mxu2 %v2521_v20 }
 0x10f   :  { %1148 = vmatpush.msra.mxu1 %v357_v10  ;;  %v413_v10 = vld [vmem:[#allocation5 + $0x808] sm:$0xff] }
 0x110   :  { %915 = vmatmul.f32.gmra.mxu1 %v2665_v18 }
 0x111   :  { %1045 = vmatmul.f32.gmra.mxu3 %v2523_v22  ;;  %v721_v54 = vpop.f32.mrf.mxu2 }
 0x112   :  { %v722_v61 = vadd.f32 %v721_v54, %v657_v12  ;;  %v2682_v12 = vld [vmem:[#allocation2 + $0x200] sm:$0xff] }
 0x113   :  { %v594_v1 = vpop.f32.mrf.mxu0 }
 0x114   :  { %v595_v4 = vadd.f32 %v594_v1, %v2572_v44  ;;  %v786_v20 = vpop.f32.mrf.mxu3  ;;  %v289_v1 = vld [vmem:[#allocation5 + $0x428] sm:$0xff] }
 0x115   :  { %v2674_v62 = vadd.f32 %v786_v20, %v722_v61  ;;  %v659_v17 = vpop.f32.mrf.mxu1  ;;  %v417_v61 = vld [vmem:[#allocation5 + $0x828] sm:$0xff]  ;;  %1084 = vmatpush.msra.mxu0 %v289_v1 }
 0x116   :  { %v660_v22 = vadd.f32 %v659_v17, %v595_v4  ;;  %853 = vmatmul.f32.gmra.mxu0 %v2671_v50  ;;  %983 = vmatmul.f32.gmra.mxu2 %v2527_v28  ;;  %v481_v4 = vld [vmem:[#allocation5 + $0xa28] sm:$0xff] }
 0x117   :  { %1214 = vmatpush.msra.mxu2 %v417_v61  ;;  %1279 = vmatpush.msra.mxu3 %v481_v4  ;;  %v353_v17 = vld [vmem:[#allocation5 + $0x628] sm:$0xff] }
 0x118   :  { %918 = vmatmul.f32.gmra.mxu1 %v2676_v3 }
 0x119   :  { %1048 = vmatmul.f32.gmra.mxu3 %v2529_v31  ;;  %v724_v25 = vpop.f32.mrf.mxu2  ;;  %1149 = vmatpush.msra.mxu1 %v353_v17  ;;  %v2709_v17 = vld [vmem:[#allocation2 + $0x268] sm:$0xff] }
 0x11a   :  { %v725_v43 = vadd.f32 %v724_v25, %v660_v22  ;;  %1215 = vmatpush.msra.mxu2 %v413_v10  ;;  %v282_v10 = vld [vmem:[#allocation5 + $0x3f0] sm:$0xff] }
 0x11b   :  { %v597_v46 = vpop.f32.mrf.mxu0 }
 0x11c   :  { %v598_v51 = vadd.f32 %v597_v46, %v2572_v44  ;;  %v789_v28 = vpop.f32.mrf.mxu3 }
 0x11d   :  { %v2685_v54 = vadd.f32 %v789_v28, %v725_v43  ;;  %v662_v55 = vpop.f32.mrf.mxu1  ;;  %v2698_v43 = vld [vmem:[#allocation2 + $0x238] sm:$0xff]  ;;  %v477_v28 = vld [vmem:[#allocation5 + $0xa08] sm:$0xff] }
 0x11e   :  { %v663_v31 = vadd.f32 %v662_v55, %v598_v51  ;;  %856 = vmatmul.f32.gmra.mxu0 %v2682_v12  ;;  %986 = vmatmul.f32.gmra.mxu2 %v2533_v38  ;;  %v285_v51 = vld [vmem:[#allocation5 + $0x408] sm:$0xff] }
 0x11f   :  { %1085 = vmatpush.msra.mxu0 %v285_v51  ;;  %1280 = vmatpush.msra.mxu3 %v477_v28  ;;  %v2715_v51 = vld [vmem:[#allocation2 + $0x290] sm:$0xff] }
 0x120   :  { %921 = vmatmul.f32.gmra.mxu1 %v2687_v59 }
 0x121   :  { %1051 = vmatmul.f32.gmra.mxu3 %v2535_v41  ;;  %v727_v48 = vpop.f32.mrf.mxu2 }
 0x122   :  { %v728_v20 = vadd.f32 %v727_v48, %v663_v31  ;;  %v349_v31 = vld [vmem:[#allocation5 + $0x608] sm:$0xff]  ;;  %v2704_v48 = vld [vmem:[#allocation2 + $0x260] sm:$0xff] }
 0x123   :  { %v600_v22 = vpop.f32.mrf.mxu0  ;;  %1150 = vmatpush.msra.mxu1 %v349_v31 }
 0x124   :  { %v601_v25 = vadd.f32 %v600_v22, %v2572_v44  ;;  %v792_v38 = vpop.f32.mrf.mxu3  ;;  %v346_v22 = vld [vmem:[#allocation5 + $0x5f0] sm:$0xff] }
 0x125   :  { %v2696_v26 = vadd.f32 %v792_v38, %v728_v20  ;;  %v665_v32 = vpop.f32.mrf.mxu1  ;;  %1460 = vmatpush.msrb.mxu2 %v346_v22  ;;  %v218_v38 = vld [vmem:[#allocation5 + $0x1f0] sm:$0xff]  ;;  %1395 = vmatpush.msrb.mxu1 %v282_v10 }
 0x126   :  { %v666_v41 = vadd.f32 %v665_v32, %v601_v25  ;;  %859 = vmatmul.f32.gmra.mxu0 %v2693_v23  ;;  %989 = vmatmul.f32.gmra.mxu2 %v2539_v49  ;;  %v410_v32 = vld [vmem:[#allocation5 + $0x7f0] sm:$0xff] }
 0x127   :  { %1330 = vmatpush.msrb.mxu0 %v218_v38  ;;  %1525 = vmatpush.msrb.mxu3 %v410_v32  ;;  %v2726_v32 = vld [vmem:[#allocation2 + $0x2c0] sm:$0xff] }
 0x128   :  { %924 = vmatmul.f32.gmra.mxu1 %v2698_v43 }
 0x129   :  { %1054 = vmatmul.f32.gmra.mxu3 %v2541_v52  ;;  %v730_v46 = vpop.f32.mrf.mxu2 }
 0x12a   :  { %v731_v55 = vadd.f32 %v730_v46, %v666_v41 }
 0x12b   :  { %v603_v61 = vpop.f32.mrf.mxu0 }
 0x12c   :  { %v604_v1 = vadd.f32 %v603_v61, %v2572_v44  ;;  %v795_v49 = vpop.f32.mrf.mxu3  ;;  %v2720_v61 = vld [vmem:[#allocation2 + $0x298] sm:$0xff] }
 0x12d   :  { %v2707_v4 = vadd.f32 %v795_v49, %v731_v55  ;;  %v668_v20 = vpop.f32.mrf.mxu1 }
 0x12e   :  { %v669_v52 = vadd.f32 %v668_v20, %v604_v1  ;;  %862 = vmatmul.f32.gmra.mxu0 %v2704_v48  ;;  %992 = vmatmul.f32.gmra.mxu2 %v2545_v60  ;;  %v342_v1 = vld [vmem:[#allocation5 + $0x5d0] sm:$0xff] }
 0x12f   :  { %1461 = vmatpush.msrb.mxu2 %v342_v1  ;;  %v214_v20 = vld [vmem:[#allocation5 + $0x1d0] sm:$0xff] }
 0x130   :  { %927 = vmatmul.f32.gmra.mxu1 %v2709_v17  ;;  %1331 = vmatpush.msrb.mxu0 %v214_v20  ;;  %v402_v1 = vld [vmem:[#allocation5 + $0x7b0] sm:$0xff] }
 0x131   :  { %1057 = vmatmul.f32.gmra.mxu3 %v2547_v63  ;;  %v733_v25 = vpop.f32.mrf.mxu2  ;;  %v274_v20 = vld [vmem:[#allocation5 + $0x3b0] sm:$0xff] }
 0x132   :  { %v734_v41 = vadd.f32 %v733_v25, %v669_v52  ;;  %v406_v52 = vld [vmem:[#allocation5 + $0x7d0] sm:$0xff] }
 0x133   :  { %v606_v46 = vpop.f32.mrf.mxu0  ;;  %1526 = vmatpush.msrb.mxu3 %v406_v52  ;;  %v278_v25 = vld [vmem:[#allocation5 + $0x3d0] sm:$0xff] }
 0x134   :  { %v607_v28 = vadd.f32 %v606_v46, %v2572_v44  ;;  %v798_v60 = vpop.f32.mrf.mxu3  ;;  %1396 = vmatpush.msrb.mxu1 %v278_v25 }
 0x135   :  { %v2718_v55 = vadd.f32 %v798_v60, %v734_v41  ;;  %v671_v31 = vpop.f32.mrf.mxu1  ;;  %v338_v60 = vld [vmem:[#allocation5 + $0x5b0] sm:$0xff]  ;;  %1527 = vmatpush.msrb.mxu3 %v402_v1 }
 0x136   :  { %v672_v63 = vadd.f32 %v671_v31, %v607_v28  ;;  %865 = vmatmul.f32.gmra.mxu0 %v2715_v51  ;;  %995 = vmatmul.f32.gmra.mxu2 %v2551_v8  ;;  %v2731_v28 = vld [vmem:[#allocation2 + $0x2c8] sm:$0xff] }
 0x137   :  { %1462 = vmatpush.msrb.mxu2 %v338_v60  ;;  %1397 = vmatpush.msrb.mxu1 %v274_v20  ;;  %v206_v60 = vld [vmem:[#allocation5 + $0x190] sm:$0xff] }
 0x138   :  { %930 = vmatmul.f32.gmra.mxu1 %v2720_v61 }
 0x139   :  { %1060 = vmatmul.f32.gmra.mxu3 %v2553_v11  ;;  %v736_v49 = vpop.f32.mrf.mxu2 }
 0x13a   :  { %v737_v22 = vadd.f32 %v736_v49, %v672_v63  ;;  %v210_v63 = vld [vmem:[#allocation5 + $0x1b0] sm:$0xff] }
 0x13b   :  { %v609_v38 = vpop.f32.mrf.mxu0  ;;  %1332 = vmatpush.msrb.mxu0 %v210_v63  ;;  %v270_v63 = vld [vmem:[#allocation5 + $0x390] sm:$0xff] }
 0x13c   :  { %v610_v41 = vadd.f32 %v609_v38, %v2572_v44  ;;  %v801_v8 = vpop.f32.mrf.mxu3  ;;  %1398 = vmatpush.msrb.mxu1 %v270_v63 }
 0x13d   :  { %v2729_v10 = vadd.f32 %v801_v8, %v737_v22  ;;  %v674_v46 = vpop.f32.mrf.mxu1  ;;  %v2737_v22 = vld [vmem:[#allocation2 + $0x2f0] sm:$0xff]  ;;  %v2742_v8 = vld [vmem:[#allocation2 + $0x2f8] sm:$0xff]  ;;  %1333 = vmatpush.msrb.mxu0 %v206_v60 }
 0x13e   :  { %v675_v11 = vadd.f32 %v674_v46, %v610_v41  ;;  %868 = vmatmul.f32.gmra.mxu0 %v2726_v32  ;;  %998 = vmatmul.f32.gmra.mxu2 %v2557_v21  ;;  %v334_v46 = vld [vmem:[#allocation5 + $0x590] sm:$0xff] }
 0x13f   :  { %1463 = vmatpush.msrb.mxu2 %v334_v46  ;;  %v202_v46 = vld [vmem:[#allocation5 + $0x170] sm:$0xff] }
 0x140   :  { %933 = vmatmul.f32.gmra.mxu1 %v2731_v28  ;;  %1334 = vmatpush.msrb.mxu0 %v202_v46  ;;  %v262_v46 = vld [vmem:[#allocation5 + $0x350] sm:$0xff] }
 0x141   :  { %1063 = vmatmul.f32.gmra.mxu3 %v2559_v24  ;;  %v739_v31 = vpop.f32.mrf.mxu2 }
 0x142   :  { %v740_v49 = vadd.f32 %v739_v31, %v675_v11 }
 0x143   :  { %v612_v52 = vpop.f32.mrf.mxu0 }
 0x144   :  { %v613_v25 = vadd.f32 %v612_v52, %v2572_v44  ;;  %v804_v21 = vpop.f32.mrf.mxu3  ;;  %v398_v44 = vld [vmem:[#allocation5 + $0x790] sm:$0xff] }
 0x145   :  { %v2740_v38 = vadd.f32 %v804_v21, %v740_v49  ;;  %v677_v41 = vpop.f32.mrf.mxu1  ;;  %1528 = vmatpush.msrb.mxu3 %v398_v44  ;;  %v2751_v21 = vld [vmem:[#allocation2 + $0x10] sm:$0xff] }
 0x146   :  { %v678_v24 = vadd.f32 %v677_v41, %v613_v25  ;;  %871 = vmatmul.f32.gmra.mxu0 %v2737_v22  ;;  %1001 = vmatmul.f32.gmra.mxu2 %v2563_v33  ;;  %v2758_v41 = vld [vmem:[#allocation2 + $0x18] sm:$0xff] }
 0x148   :  { %936 = vmatmul.f32.gmra.mxu1 %v2742_v8 }
 0x149   :  { %1066 = vmatmul.f32.gmra.mxu3 %v2565_v36  ;;  %v742_v11 = vpop.f32.mrf.mxu2  ;;  %v2756_v36 = vperm.slane %v2567_v37, 1 }
 0x14a   :  { %v743_v31 = vadd.f32 %v742_v11, %v678_v24  ;;  %v330_v24 = vld [vmem:[#allocation5 + $0x570] sm:$0xff] }
 0x14b   :  { %v827_v1 = vpop.f32.mrf.mxu0  ;;  %1464 = vmatpush.msrb.mxu2 %v330_v24  ;;  %v394_v11 = vld [vmem:[#allocation5 + $0x770] sm:$0xff] }
 0x14c   :  { %v807_v49 = vpop.f32.mrf.mxu3  ;;  %v828_v20 = vadd.f32 %v827_v1, %v2586_v16  ;;  %1529 = vmatpush.msrb.mxu3 %v394_v11  ;;  %v390_v24 = vld [vmem:[#allocation5 + $0x750] sm:$0xff] }
 0x14d   :  { %v2749_v52 = vadd.f32 %v807_v49, %v743_v31  ;;  %v892_v33 = vpop.f32.mrf.mxu1 }
 0x14e   :  { %v893_v25 = vadd.f32 %v892_v33, %v828_v20  ;;  %1086 = vmatmul.f32.vlgmr.msra.gmra.mxu0 %v2751_v21  ;;  %1216 = vmatmul.f32.vlgmr.msra.gmra.mxu2 %v2574_v53  ;;  %v266_v53 = vld [vmem:[#allocation5 + $0x370] sm:$0xff]  ;;  %v2766_v20 = vld [vmem:[#allocation2 + $0x40] sm:$0xff] }
 0x14f   :  { %1399 = vmatpush.msrb.mxu1 %v266_v53  ;;  %v326_v33 = vld [vmem:[#allocation5 + $0x550] sm:$0xff]  ;;  %1530 = vmatpush.msrb.mxu3 %v390_v24 }
 0x150   :  { %2110 = vst [vmem:[#allocation8] sm:$0xff] %v893_v25  ;;  %1151 = vmatmul.f32.vlgmr.msra.gmra.mxu1 %v2758_v41  ;;  %1465 = vmatpush.msrb.mxu2 %v326_v33  ;;  %v198_v25 = vld [vmem:[#allocation5 + $0x150] sm:$0xff] }
 0x151   :  { %1281 = vmatmul.f32.vlgmr.msra.gmra.mxu3 %v2577_v57  ;;  %v957_v16 = vpop.f32.mrf.mxu2  ;;  %v2770_v57 = vld [vmem:[#allocation2 + $0x48] sm:$0xff]  ;;  %1335 = vmatpush.msrb.mxu0 %v198_v25  ;;  %v386_v33 = vld [vmem:[#allocation5 + $0x730] sm:$0xff] }
 0x152   :  { %v958_v60 = vadd.f32 %v957_v16, %v2756_v36  ;;  %1400 = vmatpush.msrb.mxu1 %v262_v46  ;;  %1531 = vmatpush.msrb.mxu3 %v386_v33  ;;  %v258_v25 = vld [vmem:[#allocation5 + $0x330] sm:$0xff] }
 0x153   :  { %v830_v44 = vpop.f32.mrf.mxu0 }
 0x154   :  { %v831_v37 = vadd.f32 %v830_v44, %v2597_v45  ;;  %v1022_v31 = vpop.f32.mrf.mxu3  ;;  %1401 = vmatpush.msrb.mxu1 %v258_v25 }
 0x155   :  { %v2764_v63 = vadd.f32 %v1022_v31, %v958_v60  ;;  %v895_v1 = vpop.f32.mrf.mxu1  ;;  %v2778_v31 = vld [vmem:[#allocation2 + $0x70] sm:$0xff] }
 0x156   :  { %v896_v49 = vadd.f32 %v895_v1, %v831_v37  ;;  %1089 = vmatmul.f32.gmra.mxu0 %v2766_v20  ;;  %1219 = vmatmul.f32.gmra.mxu2 %v2583_v13  ;;  %v322_v1 = vld [vmem:[#allocation5 + $0x530] sm:$0xff] }
 0x157   :  { %1466 = vmatpush.msrb.mxu2 %v322_v1  ;;  %v382_v1 = vld [vmem:[#allocation5 + $0x710] sm:$0xff] }
 0x158   :  { %2114 = vst [vmem:[#allocation8 + $0x20] sm:$0xff] %v896_v49  ;;  %1154 = vmatmul.f32.gmra.mxu1 %v2770_v57  ;;  %v194_v49 = vld [vmem:[#allocation5 + $0x130] sm:$0xff]  ;;  %1532 = vmatpush.msrb.mxu3 %v382_v1 }
 0x159   :  { %1284 = vmatmul.f32.gmra.mxu3 %v2588_v19  ;;  %v960_v45 = vpop.f32.mrf.mxu2  ;;  %v2782_v19 = vld [vmem:[#allocation2 + $0x78] sm:$0xff]  ;;  %1336 = vmatpush.msrb.mxu0 %v194_v49  ;;  %v254_v49 = vld [vmem:[#allocation5 + $0x310] sm:$0xff] }
 0x15a   :  { %v961_v16 = vadd.f32 %v960_v45, %v2756_v36  ;;  %1402 = vmatpush.msrb.mxu1 %v254_v49 }
 0x15b   :  { %v833_v11 = vpop.f32.mrf.mxu0 }
 0x15c   :  { %v834_v13 = vadd.f32 %v833_v11, %v2608_v7  ;;  %v1025_v60 = vpop.f32.mrf.mxu3 }
 0x15d   :  { %v2776_v53 = vadd.f32 %v1025_v60, %v961_v16  ;;  %v898_v44 = vpop.f32.mrf.mxu1  ;;  %v2790_v60 = vld [vmem:[#allocation2 + $0xa0] sm:$0xff] }
 0x15e   :  { %v899_v37 = vadd.f32 %v898_v44, %v834_v13  ;;  %1092 = vmatmul.f32.gmra.mxu0 %v2778_v31  ;;  %1222 = vmatmul.f32.gmra.mxu2 %v2594_v39  ;;  %v318_v44 = vld [vmem:[#allocation5 + $0x510] sm:$0xff] }
 0x15f   :  { %1467 = vmatpush.msrb.mxu2 %v318_v44  ;;  %v378_v44 = vld [vmem:[#allocation5 + $0x6f0] sm:$0xff] }
 0x160   :  { %2118 = vst [vmem:[#allocation8 + $0x40] sm:$0xff] %v899_v37  ;;  %1157 = vmatmul.f32.gmra.mxu1 %v2782_v19  ;;  %v190_v37 = vld [vmem:[#allocation5 + $0x110] sm:$0xff]  ;;  %1533 = vmatpush.msrb.mxu3 %v378_v44 }
 0x161   :  { %1287 = vmatmul.f32.gmra.mxu3 %v2599_v47  ;;  %v963_v7 = vpop.f32.mrf.mxu2  ;;  %v2794_v47 = vld [vmem:[#allocation2 + $0xa8] sm:$0xff]  ;;  %1337 = vmatpush.msrb.mxu0 %v190_v37  ;;  %v250_v37 = vld [vmem:[#allocation5 + $0x2f0] sm:$0xff] }
 0x162   :  { %v964_v45 = vadd.f32 %v963_v7, %v2756_v36  ;;  %1403 = vmatpush.msrb.mxu1 %v250_v37 }
 0x163   :  { %v836_v24 = vpop.f32.mrf.mxu0 }
 0x164   :  { %v837_v39 = vadd.f32 %v836_v24, %v2619_v35  ;;  %v1028_v16 = vpop.f32.mrf.mxu3 }
 0x165   :  { %v2788_v46 = vadd.f32 %v1028_v16, %v964_v45  ;;  %v901_v11 = vpop.f32.mrf.mxu1  ;;  %v2802_v16 = vld [vmem:[#allocation2 + $0xd0] sm:$0xff] }
 0x166   :  { %v902_v13 = vadd.f32 %v901_v11, %v837_v39  ;;  %1095 = vmatmul.f32.gmra.mxu0 %v2790_v60  ;;  %1225 = vmatmul.f32.gmra.mxu2 %v2605_v5  ;;  %v314_v11 = vld [vmem:[#allocation5 + $0x4f0] sm:$0xff] }
 0x167   :  { %1468 = vmatpush.msrb.mxu2 %v314_v11  ;;  %v374_v11 = vld [vmem:[#allocation5 + $0x6d0] sm:$0xff] }
 0x168   :  { %2122 = vst [vmem:[#allocation8 + $0x60] sm:$0xff] %v902_v13  ;;  %1160 = vmatmul.f32.gmra.mxu1 %v2794_v47  ;;  %v186_v13 = vld [vmem:[#allocation5 + $0xf0] sm:$0xff]  ;;  %1534 = vmatpush.msrb.mxu3 %v374_v11 }
 0x169   :  { %1290 = vmatmul.f32.gmra.mxu3 %v2610_v15  ;;  %v966_v35 = vpop.f32.mrf.mxu2  ;;  %v2806_v15 = vld [vmem:[#allocation2 + $0xd8] sm:$0xff]  ;;  %1338 = vmatpush.msrb.mxu0 %v186_v13  ;;  %v246_v13 = vld [vmem:[#allocation5 + $0x2d0] sm:$0xff] }
 0x16a   :  { %v967_v7 = vadd.f32 %v966_v35, %v2756_v36  ;;  %1404 = vmatpush.msrb.mxu1 %v246_v13 }
 0x16b   :  { %v839_v33 = vpop.f32.mrf.mxu0 }
 0x16c   :  { %v840_v5 = vadd.f32 %v839_v33, %v2630_v6  ;;  %v1031_v45 = vpop.f32.mrf.mxu3 }
 0x16d   :  { %v2800_v25 = vadd.f32 %v1031_v45, %v967_v7  ;;  %v904_v24 = vpop.f32.mrf.mxu1  ;;  %v2814_v45 = vld [vmem:[#allocation2 + $0x100] sm:$0xff] }
 0x16e   :  { %v905_v39 = vadd.f32 %v904_v24, %v840_v5  ;;  %1098 = vmatmul.f32.gmra.mxu0 %v2802_v16  ;;  %1228 = vmatmul.f32.gmra.mxu2 %v2616_v29  ;;  %v310_v24 = vld [vmem:[#allocation5 + $0x4d0] sm:$0xff] }
 0x16f   :  { %1469 = vmatpush.msrb.mxu2 %v310_v24  ;;  %v370_v24 = vld [vmem:[#allocation5 + $0x6b0] sm:$0xff] }
 0x170   :  { %2126 = vst [vmem:[#allocation8 + $0x80] sm:$0xff] %v905_v39  ;;  %1163 = vmatmul.f32.gmra.mxu1 %v2806_v15  ;;  %v182_v39 = vld [vmem:[#allocation5 + $0xd0] sm:$0xff]  ;;  %1535 = vmatpush.msrb.mxu3 %v370_v24 }
 0x171   :  { %1293 = vmatmul.f32.gmra.mxu3 %v2621_v14  ;;  %v969_v6 = vpop.f32.mrf.mxu2  ;;  %v2818_v14 = vld [vmem:[#allocation2 + $0x108] sm:$0xff]  ;;  %1339 = vmatpush.msrb.mxu0 %v182_v39  ;;  %v242_v39 = vld [vmem:[#allocation5 + $0x2b0] sm:$0xff] }
 0x172   :  { %v970_v35 = vadd.f32 %v969_v6, %v2756_v36  ;;  %1405 = vmatpush.msrb.mxu1 %v242_v39 }
 0x173   :  { %v842_v1 = vpop.f32.mrf.mxu0 }
 0x174   :  { %v843_v29 = vadd.f32 %v842_v1, %v2641_v40  ;;  %v1034_v7 = vpop.f32.mrf.mxu3 }
 0x175   :  { %v2812_v49 = vadd.f32 %v1034_v7, %v970_v35  ;;  %v907_v33 = vpop.f32.mrf.mxu1  ;;  %v2826_v7 = vld [vmem:[#allocation2 + $0x130] sm:$0xff] }
 0x176   :  { %v908_v5 = vadd.f32 %v907_v33, %v843_v29  ;;  %1101 = vmatmul.f32.gmra.mxu0 %v2814_v45  ;;  %1231 = vmatmul.f32.gmra.mxu2 %v2627_v0  ;;  %v306_v33 = vld [vmem:[#allocation5 + $0x4b0] sm:$0xff] }
 0x177   :  { %1470 = vmatpush.msrb.mxu2 %v306_v33  ;;  %v366_v33 = vld [vmem:[#allocation5 + $0x690] sm:$0xff] }
 0x178   :  { %2130 = vst [vmem:[#allocation8 + $0xa0] sm:$0xff] %v908_v5  ;;  %1166 = vmatmul.f32.gmra.mxu1 %v2818_v14  ;;  %v178_v5 = vld [vmem:[#allocation5 + $0xb0] sm:$0xff]  ;;  %1536 = vmatpush.msrb.mxu3 %v366_v33 }
 0x179   :  { %1296 = vmatmul.f32.gmra.mxu3 %v2632_v9  ;;  %v972_v40 = vpop.f32.mrf.mxu2  ;;  %v2830_v9 = vld [vmem:[#allocation2 + $0x138] sm:$0xff]  ;;  %1340 = vmatpush.msrb.mxu0 %v178_v5  ;;  %v238_v5 = vld [vmem:[#allocation5 + $0x290] sm:$0xff] }
 0x17a   :  { %v973_v6 = vadd.f32 %v972_v40, %v2756_v36  ;;  %1406 = vmatpush.msrb.mxu1 %v238_v5 }
 0x17b   :  { %v845_v44 = vpop.f32.mrf.mxu0 }
 0x17c   :  { %v846_v0 = vadd.f32 %v845_v44, %v2652_v30  ;;  %v1037_v35 = vpop.f32.mrf.mxu3 }
 0x17d   :  { %v2824_v37 = vadd.f32 %v1037_v35, %v973_v6  ;;  %v910_v1 = vpop.f32.mrf.mxu1  ;;  %v2838_v35 = vld [vmem:[#allocation2 + $0x160] sm:$0xff] }
 0x17e   :  { %v911_v29 = vadd.f32 %v910_v1, %v846_v0  ;;  %1104 = vmatmul.f32.gmra.mxu0 %v2826_v7  ;;  %1234 = vmatmul.f32.gmra.mxu2 %v2638_v27  ;;  %v302_v1 = vld [vmem:[#allocation5 + $0x490] sm:$0xff] }
 0x17f   :  { %1471 = vmatpush.msrb.mxu2 %v302_v1  ;;  %v362_v1 = vld [vmem:[#allocation5 + $0x670] sm:$0xff] }
 0x180   :  { %2134 = vst [vmem:[#allocation8 + $0xc0] sm:$0xff] %v911_v29  ;;  %1169 = vmatmul.f32.gmra.mxu1 %v2830_v9  ;;  %v174_v29 = vld [vmem:[#allocation5 + $0x90] sm:$0xff]  ;;  %1537 = vmatpush.msrb.mxu3 %v362_v1 }
 0x181   :  { %1299 = vmatmul.f32.gmra.mxu3 %v2643_v42  ;;  %v975_v30 = vpop.f32.mrf.mxu2  ;;  %v2842_v42 = vld [vmem:[#allocation2 + $0x168] sm:$0xff]  ;;  %1341 = vmatpush.msrb.mxu0 %v174_v29  ;;  %v234_v29 = vld [vmem:[#allocation5 + $0x270] sm:$0xff] }
 0x182   :  { %v976_v40 = vadd.f32 %v975_v30, %v2756_v36  ;;  %1407 = vmatpush.msrb.mxu1 %v234_v29 }
 0x183   :  { %v848_v11 = vpop.f32.mrf.mxu0 }
 0x184   :  { %v849_v27 = vadd.f32 %v848_v11, %v2663_v58  ;;  %v1040_v6 = vpop.f32.mrf.mxu3 }
 0x185   :  { %v2836_v13 = vadd.f32 %v1040_v6, %v976_v40  ;;  %v913_v44 = vpop.f32.mrf.mxu1  ;;  %v2850_v6 = vld [vmem:[#allocation2 + $0x190] sm:$0xff] }
 0x186   :  { %v914_v0 = vadd.f32 %v913_v44, %v849_v27  ;;  %1107 = vmatmul.f32.gmra.mxu0 %v2838_v35  ;;  %1237 = vmatmul.f32.gmra.mxu2 %v2649_v2  ;;  %v298_v44 = vld [vmem:[#allocation5 + $0x470] sm:$0xff] }
 0x187   :  { %1472 = vmatpush.msrb.mxu2 %v298_v44  ;;  %v358_v44 = vld [vmem:[#allocation5 + $0x650] sm:$0xff] }
 0x188   :  { %2138 = vst [vmem:[#allocation8 + $0xe0] sm:$0xff] %v914_v0  ;;  %1172 = vmatmul.f32.gmra.mxu1 %v2842_v42  ;;  %v170_v0 = vld [vmem:[#allocation5 + $0x70] sm:$0xff]  ;;  %1538 = vmatpush.msrb.mxu3 %v358_v44 }
 0x189   :  { %1302 = vmatmul.f32.gmra.mxu3 %v2654_v34  ;;  %v978_v58 = vpop.f32.mrf.mxu2  ;;  %v2854_v34 = vld [vmem:[#allocation2 + $0x198] sm:$0xff]  ;;  %1342 = vmatpush.msrb.mxu0 %v170_v0  ;;  %v230_v0 = vld [vmem:[#allocation5 + $0x250] sm:$0xff] }
 0x18a   :  { %v979_v30 = vadd.f32 %v978_v58, %v2756_v36  ;;  %1408 = vmatpush.msrb.mxu1 %v230_v0 }
 0x18b   :  { %v851_v24 = vpop.f32.mrf.mxu0 }
 0x18c   :  { %v852_v2 = vadd.f32 %v851_v24, %v2674_v62  ;;  %v1043_v40 = vpop.f32.mrf.mxu3 }
 0x18d   :  { %v2848_v39 = vadd.f32 %v1043_v40, %v979_v30  ;;  %v916_v11 = vpop.f32.mrf.mxu1  ;;  %v2862_v40 = vld [vmem:[#allocation2 + $0x1c0] sm:$0xff] }
 0x18e   :  { %v917_v27 = vadd.f32 %v916_v11, %v852_v2  ;;  %1110 = vmatmul.f32.gmra.mxu0 %v2850_v6  ;;  %1240 = vmatmul.f32.gmra.mxu2 %v2660_v56  ;;  %v294_v11 = vld [vmem:[#allocation5 + $0x450] sm:$0xff] }
 0x18f   :  { %1473 = vmatpush.msrb.mxu2 %v294_v11  ;;  %v354_v11 = vld [vmem:[#allocation5 + $0x630] sm:$0xff] }
 0x190   :  { %2142 = vst [vmem:[#allocation8 + $0x100] sm:$0xff] %v917_v27  ;;  %1175 = vmatmul.f32.gmra.mxu1 %v2854_v34  ;;  %v166_v27 = vld [vmem:[#allocation5 + $0x50] sm:$0xff]  ;;  %1539 = vmatpush.msrb.mxu3 %v354_v11 }
 0x191   :  { %1305 = vmatmul.f32.gmra.mxu3 %v2665_v18  ;;  %v981_v62 = vpop.f32.mrf.mxu2  ;;  %v2866_v18 = vld [vmem:[#allocation2 + $0x1c8] sm:$0xff]  ;;  %1343 = vmatpush.msrb.mxu0 %v166_v27  ;;  %v226_v27 = vld [vmem:[#allocation5 + $0x230] sm:$0xff] }
 0x192   :  { %v982_v58 = vadd.f32 %v981_v62, %v2756_v36  ;;  %1409 = vmatpush.msrb.mxu1 %v226_v27 }
 0x193   :  { %v854_v33 = vpop.f32.mrf.mxu0 }
 0x194   :  { %v855_v56 = vadd.f32 %v854_v33, %v2685_v54  ;;  %v1046_v30 = vpop.f32.mrf.mxu3 }
 0x195   :  { %v2860_v5 = vadd.f32 %v1046_v30, %v982_v58  ;;  %v919_v24 = vpop.f32.mrf.mxu1  ;;  %v2874_v30 = vld [vmem:[#allocation2 + $0x1f0] sm:$0xff] }
 0x196   :  { %v920_v2 = vadd.f32 %v919_v24, %v855_v56  ;;  %1113 = vmatmul.f32.gmra.mxu0 %v2862_v40  ;;  %1243 = vmatmul.f32.gmra.mxu2 %v2671_v50  ;;  %v290_v24 = vld [vmem:[#allocation5 + $0x430] sm:$0xff] }
 0x197   :  { %1474 = vmatpush.msrb.mxu2 %v290_v24  ;;  %v350_v24 = vld [vmem:[#allocation5 + $0x610] sm:$0xff] }
 0x198   :  { %2146 = vst [vmem:[#allocation8 + $0x120] sm:$0xff] %v920_v2  ;;  %1178 = vmatmul.f32.gmra.mxu1 %v2866_v18  ;;  %v162_v2 = vld [vmem:[#allocation5 + $0x30] sm:$0xff]  ;;  %1540 = vmatpush.msrb.mxu3 %v350_v24 }
 0x199   :  { %1308 = vmatmul.f32.gmra.mxu3 %v2676_v3  ;;  %v984_v54 = vpop.f32.mrf.mxu2  ;;  %v2878_v3 = vld [vmem:[#allocation2 + $0x1f8] sm:$0xff]  ;;  %1344 = vmatpush.msrb.mxu0 %v162_v2  ;;  %v222_v2 = vld [vmem:[#allocation5 + $0x210] sm:$0xff] }
 0x19a   :  { %v985_v62 = vadd.f32 %v984_v54, %v2756_v36  ;;  %1410 = vmatpush.msrb.mxu1 %v222_v2 }
 0x19b   :  { %v857_v1 = vpop.f32.mrf.mxu0 }
 0x19c   :  { %v858_v50 = vadd.f32 %v857_v1, %v2696_v26  ;;  %v1049_v58 = vpop.f32.mrf.mxu3 }
 0x19d   :  { %v2872_v29 = vadd.f32 %v1049_v58, %v985_v62  ;;  %v922_v33 = vpop.f32.mrf.mxu1  ;;  %v2886_v58 = vld [vmem:[#allocation2 + $0x220] sm:$0xff] }
 0x19e   :  { %v923_v56 = vadd.f32 %v922_v33, %v858_v50  ;;  %1116 = vmatmul.f32.gmra.mxu0 %v2874_v30  ;;  %1246 = vmatmul.f32.gmra.mxu2 %v2682_v12  ;;  %v286_v33 = vld [vmem:[#allocation5 + $0x410] sm:$0xff] }
 0x19f   :  { %1475 = vmatpush.msrb.mxu2 %v286_v33  ;;  %v283_v33 = vld [vmem:[#allocation5 + $0x3f8] sm:$0xff] }
 0x1a0   :  { %2150 = vst [vmem:[#allocation8 + $0x140] sm:$0xff] %v923_v56  ;;  %1181 = vmatmul.f32.gmra.mxu1 %v2878_v3  ;;  %v158_v56 = vld [vmem:[#allocation5 + $0x10] sm:$0xff]  ;;  %1785 = vmatpush.msra.mxu3 %v283_v33 }
 0x1a1   :  { %1311 = vmatmul.f32.gmra.mxu3 %v2687_v59  ;;  %v987_v26 = vpop.f32.mrf.mxu2  ;;  %v2890_v59 = vld [vmem:[#allocation2 + $0x228] sm:$0xff]  ;;  %1345 = vmatpush.msrb.mxu0 %v158_v56  ;;  %v538_v56 = vld [vmem:[#allocation5 + $0xbf0] sm:$0xff] }
 0x1a2   :  { %v988_v54 = vadd.f32 %v987_v26, %v2756_v36  ;;  %1655 = vmatpush.msra.mxu1 %v538_v56 }
 0x1a3   :  { %v860_v44 = vpop.f32.mrf.mxu0 }
 0x1a4   :  { %v861_v12 = vadd.f32 %v860_v44, %v2707_v4  ;;  %v1052_v62 = vpop.f32.mrf.mxu3 }
 0x1a5   :  { %v2884_v0 = vadd.f32 %v1052_v62, %v988_v54  ;;  %v925_v1 = vpop.f32.mrf.mxu1  ;;  %v2898_v62 = vld [vmem:[#allocation2 + $0x250] sm:$0xff] }
 0x1a6   :  { %v926_v50 = vadd.f32 %v925_v1, %v861_v12  ;;  %1119 = vmatmul.f32.gmra.mxu0 %v2886_v58  ;;  %1249 = vmatmul.f32.gmra.mxu2 %v2693_v23  ;;  %v2902_v1 = vld [vmem:[#allocation2 + $0x258] sm:$0xff] }
 0x1a8   :  { %2154 = vst [vmem:[#allocation8 + $0x160] sm:$0xff] %v926_v50  ;;  %1184 = vmatmul.f32.gmra.mxu1 %v2890_v59  ;;  %v474_v50 = vld [vmem:[#allocation5 + $0x9f0] sm:$0xff] }
 0x1a9   :  { %1314 = vmatmul.f32.gmra.mxu3 %v2698_v43  ;;  %v990_v4 = vpop.f32.mrf.mxu2  ;;  %v219_v43 = vld [vmem:[#allocation5 + $0x1f8] sm:$0xff]  ;;  %1590 = vmatpush.msra.mxu0 %v474_v50  ;;  %v534_v50 = vld [vmem:[#allocation5 + $0xbd0] sm:$0xff] }
 0x1aa   :  { %v991_v26 = vadd.f32 %v990_v4, %v2756_v36  ;;  %1720 = vmatpush.msra.mxu2 %v219_v43  ;;  %v279_v43 = vld [vmem:[#allocation5 + $0x3d8] sm:$0xff]  ;;  %1656 = vmatpush.msra.mxu1 %v534_v50 }
 0x1ab   :  { %v863_v11 = vpop.f32.mrf.mxu0  ;;  %1786 = vmatpush.msra.mxu3 %v279_v43 }
 0x1ac   :  { %v864_v23 = vadd.f32 %v863_v11, %v2718_v55  ;;  %v1055_v54 = vpop.f32.mrf.mxu3 }
 0x1ad   :  { %v2896_v27 = vadd.f32 %v1055_v54, %v991_v26  ;;  %v928_v44 = vpop.f32.mrf.mxu1  ;;  %v2910_v54 = vld [vmem:[#allocation2 + $0x280] sm:$0xff] }
 0x1ae   :  { %v929_v12 = vadd.f32 %v928_v44, %v864_v23  ;;  %1122 = vmatmul.f32.gmra.mxu0 %v2898_v62  ;;  %1252 = vmatmul.f32.gmra.mxu2 %v2704_v48  ;;  %v2914_v44 = vld [vmem:[#allocation2 + $0x288] sm:$0xff] }
 0x1b0   :  { %2158 = vst [vmem:[#allocation8 + $0x180] sm:$0xff] %v929_v12  ;;  %1187 = vmatmul.f32.gmra.mxu1 %v2902_v1  ;;  %v470_v12 = vld [vmem:[#allocation5 + $0x9d0] sm:$0xff] }
 0x1b1   :  { %1317 = vmatmul.f32.gmra.mxu3 %v2709_v17  ;;  %v993_v55 = vpop.f32.mrf.mxu2  ;;  %v215_v17 = vld [vmem:[#allocation5 + $0x1d8] sm:$0xff]  ;;  %1591 = vmatpush.msra.mxu0 %v470_v12  ;;  %v530_v12 = vld [vmem:[#allocation5 + $0xbb0] sm:$0xff] }
 0x1b2   :  { %v994_v4 = vadd.f32 %v993_v55, %v2756_v36  ;;  %1721 = vmatpush.msra.mxu2 %v215_v17  ;;  %v275_v17 = vld [vmem:[#allocation5 + $0x3b8] sm:$0xff]  ;;  %1657 = vmatpush.msra.mxu1 %v530_v12 }
 0x1b3   :  { %v866_v24 = vpop.f32.mrf.mxu0  ;;  %1787 = vmatpush.msra.mxu3 %v275_v17 }
 0x1b4   :  { %v867_v48 = vadd.f32 %v866_v24, %v2729_v10  ;;  %v1058_v26 = vpop.f32.mrf.mxu3 }
 0x1b5   :  { %v2908_v2 = vadd.f32 %v1058_v26, %v994_v4  ;;  %v931_v11 = vpop.f32.mrf.mxu1  ;;  %v2922_v26 = vld [vmem:[#allocation2 + $0x2b0] sm:$0xff] }
 0x1b6   :  { %v932_v23 = vadd.f32 %v931_v11, %v867_v48  ;;  %1125 = vmatmul.f32.gmra.mxu0 %v2910_v54  ;;  %1255 = vmatmul.f32.gmra.mxu2 %v2715_v51  ;;  %v2926_v11 = vld [vmem:[#allocation2 + $0x2b8] sm:$0xff] }
 0x1b8   :  { %2162 = vst [vmem:[#allocation8 + $0x1a0] sm:$0xff] %v932_v23  ;;  %1190 = vmatmul.f32.gmra.mxu1 %v2914_v44  ;;  %v466_v23 = vld [vmem:[#allocation5 + $0x9b0] sm:$0xff] }
 0x1b9   :  { %1320 = vmatmul.f32.gmra.mxu3 %v2720_v61  ;;  %v996_v10 = vpop.f32.mrf.mxu2  ;;  %v211_v61 = vld [vmem:[#allocation5 + $0x1b8] sm:$0xff]  ;;  %1592 = vmatpush.msra.mxu0 %v466_v23  ;;  %v526_v23 = vld [vmem:[#allocation5 + $0xb90] sm:$0xff] }
 0x1ba   :  { %v997_v55 = vadd.f32 %v996_v10, %v2756_v36  ;;  %1722 = vmatpush.msra.mxu2 %v211_v61  ;;  %v271_v61 = vld [vmem:[#allocation5 + $0x398] sm:$0xff]  ;;  %1658 = vmatpush.msra.mxu1 %v526_v23 }
 0x1bb   :  { %v869_v33 = vpop.f32.mrf.mxu0  ;;  %1788 = vmatpush.msra.mxu3 %v271_v61 }
 0x1bc   :  { %v870_v51 = vadd.f32 %v869_v33, %v2740_v38  ;;  %v1061_v4 = vpop.f32.mrf.mxu3 }
 0x1bd   :  { %v2920_v56 = vadd.f32 %v1061_v4, %v997_v55  ;;  %v934_v24 = vpop.f32.mrf.mxu1  ;;  %v2934_v4 = vld [vmem:[#allocation2 + $0x2e0] sm:$0xff] }
 0x1be   :  { %v935_v48 = vadd.f32 %v934_v24, %v870_v51  ;;  %1128 = vmatmul.f32.gmra.mxu0 %v2922_v26  ;;  %1258 = vmatmul.f32.gmra.mxu2 %v2726_v32  ;;  %v2938_v24 = vld [vmem:[#allocation2 + $0x2e8] sm:$0xff] }
 0x1c0   :  { %2166 = vst [vmem:[#allocation8 + $0x1c0] sm:$0xff] %v935_v48  ;;  %1193 = vmatmul.f32.gmra.mxu1 %v2926_v11  ;;  %v462_v48 = vld [vmem:[#allocation5 + $0x990] sm:$0xff] }
 0x1c1   :  { %1323 = vmatmul.f32.gmra.mxu3 %v2731_v28  ;;  %v999_v38 = vpop.f32.mrf.mxu2  ;;  %v207_v28 = vld [vmem:[#allocation5 + $0x198] sm:$0xff]  ;;  %1593 = vmatpush.msra.mxu0 %v462_v48 }
 0x1c2   :  { %v1000_v10 = vadd.f32 %v999_v38, %v2756_v36  ;;  %1723 = vmatpush.msra.mxu2 %v207_v28 }
 0x1c3   :  { %v872_v43 = vpop.f32.mrf.mxu0 }
 0x1c4   :  { %v873_v32 = vadd.f32 %v872_v43, %v2749_v52  ;;  %v1064_v55 = vpop.f32.mrf.mxu3 }
 0x1c5   :  { %v2932_v50 = vadd.f32 %v1064_v55, %v1000_v10  ;;  %v937_v33 = vpop.f32.mrf.mxu1 }
 0x1c6   :  { %v938_v51 = vadd.f32 %v937_v33, %v873_v32  ;;  %1131 = vmatmul.f32.gmra.mxu0 %v2934_v4  ;;  %1261 = vmatmul.f32.gmra.mxu2 %v2737_v22  ;;  %v2946_v32 = vld [vmem:[#allocation2] sm:$0xff] }
 0x1c8   :  { %2170 = vst [vmem:[#allocation8 + $0x1e0] sm:$0xff] %v938_v51  ;;  %1196 = vmatmul.f32.gmra.mxu1 %v2938_v24  ;;  %v267_v51 = vld [vmem:[#allocation5 + $0x378] sm:$0xff] }
 0x1c9   :  { %1326 = vmatmul.f32.gmra.mxu3 %v2742_v8  ;;  %v1002_v52 = vpop.f32.mrf.mxu2  ;;  %v203_v8 = vld [vmem:[#allocation5 + $0x178] sm:$0xff] }
 0x1ca   :  { %v1003_v38 = vadd.f32 %v1002_v52, %v2756_v36  ;;  %v2950_v36 = vld [vmem:[#allocation2 + $0x8] sm:$0xff]  ;;  %1724 = vmatpush.msra.mxu2 %v203_v8  ;;  %1789 = vmatpush.msra.mxu3 %v267_v51  ;;  %v522_v52 = vld [vmem:[#allocation5 + $0xb70] sm:$0xff]  ;;  %v263_v8 = vld [vmem:[#allocation5 + $0x358] sm:$0xff] }
 0x1cb   :  { %v1087_v17 = vpop.f32.mrf.mxu0  ;;  %1659 = vmatpush.msra.mxu1 %v522_v52 }
 0x1cc   :  { %v1067_v22 = vpop.f32.mrf.mxu3  ;;  %v1088_v10 = vadd.f32 %v1087_v17, %v2764_v63  ;;  %v458_v63 = vld [vmem:[#allocation5 + $0x970] sm:$0xff]  ;;  %1790 = vmatpush.msra.mxu3 %v263_v8 }
 0x1cd   :  { %v2944_v12 = vadd.f32 %v1067_v22, %v1003_v38  ;;  %v1152_v43 = vpop.f32.mrf.mxu1  ;;  %1594 = vmatpush.msra.mxu0 %v458_v63  ;;  %v2955_v17 = vld [vmem:[#allocation2 + $0x30] sm:$0xff] }
 0x1ce   :  { %1346 = vmatmul.f32.vlgmr.msrb.gmra.mxu0 %v2946_v32  ;;  %1476 = vmatmul.f32.vlgmr.msrb.gmra.mxu2 %v2751_v21  ;;  %v1153_v55 = vadd.f32 %v1152_v43, %v1088_v10  ;;  %v2959_v10 = vld [vmem:[#allocation2 + $0x38] sm:$0xff]  ;;  %v454_v43 = vld [vmem:[#allocation5 + $0x950] sm:$0xff] }
 0x1cf   :  { %1595 = vmatpush.msra.mxu0 %v454_v43 }
 0x1d0   :  { %1411 = vmatmul.f32.vlgmr.msrb.gmra.mxu1 %v2950_v36 }
 0x1d1   :  { %1541 = vmatmul.f32.vlgmr.msrb.gmra.mxu3 %v2758_v41  ;;  %v1217_v33 = vpop.f32.mrf.mxu2  ;;  %v199_v41 = vld [vmem:[#allocation5 + $0x158] sm:$0xff] }
 0x1d2   :  { %v1218_v28 = vadd.f32 %v1217_v33, %v1153_v55  ;;  %1725 = vmatpush.msra.mxu2 %v199_v41  ;;  %v518_v33 = vld [vmem:[#allocation5 + $0xb50] sm:$0xff] }
 0x1d3   :  { %v1090_v48 = vpop.f32.mrf.mxu0  ;;  %1660 = vmatpush.msra.mxu1 %v518_v33  ;;  %v2973_v33 = vld [vmem:[#allocation2 + $0x90] sm:$0xff] }
 0x1d4   :  { %v1091_v21 = vadd.f32 %v1090_v48, %v2776_v53  ;;  %v1282_v61 = vpop.f32.mrf.mxu3  ;;  %v2964_v48 = vld [vmem:[#allocation2 + $0x60] sm:$0xff] }
 0x1d5   :  { %v1283_v38 = vadd.f32 %v1282_v61, %v1218_v28  ;;  %v1155_v23 = vpop.f32.mrf.mxu1  ;;  %v2968_v61 = vld [vmem:[#allocation2 + $0x68] sm:$0xff] }
 0x1d6   :  { %1349 = vmatmul.f32.gmra.mxu0 %v2955_v17  ;;  %1479 = vmatmul.f32.gmra.mxu2 %v2766_v20  ;;  %v1156_v22 = vadd.f32 %v1155_v23, %v1091_v21  ;;  %v259_v23 = vld [vmem:[#allocation5 + $0x338] sm:$0xff] }
 0x1d7   :  { %2111 = vst [vmem:[#allocation8 + $0x8] sm:$0xff] %v1283_v38  ;;  %v450_v38 = vld [vmem:[#allocation5 + $0x930] sm:$0xff]  ;;  %1791 = vmatpush.msra.mxu3 %v259_v23 }
 0x1d8   :  { %1414 = vmatmul.f32.gmra.mxu1 %v2959_v10  ;;  %1596 = vmatpush.msra.mxu0 %v450_v38 }
 0x1d9   :  { %1544 = vmatmul.f32.gmra.mxu3 %v2770_v57  ;;  %v1220_v53 = vpop.f32.mrf.mxu2  ;;  %v195_v57 = vld [vmem:[#allocation5 + $0x138] sm:$0xff] }
 0x1da   :  { %v1221_v55 = vadd.f32 %v1220_v53, %v1156_v22  ;;  %1726 = vmatpush.msra.mxu2 %v195_v57  ;;  %v514_v22 = vld [vmem:[#allocation5 + $0xb30] sm:$0xff] }
 0x1db   :  { %v1093_v63 = vpop.f32.mrf.mxu0  ;;  %1661 = vmatpush.msra.mxu1 %v514_v22  ;;  %v510_v57 = vld [vmem:[#allocation5 + $0xb10] sm:$0xff] }
 0x1dc   :  { %v1094_v20 = vadd.f32 %v1093_v63, %v2788_v46  ;;  %v1285_v51 = vpop.f32.mrf.mxu3 }
 0x1dd   :  { %v1286_v28 = vadd.f32 %v1285_v51, %v1221_v55  ;;  %v1158_v52 = vpop.f32.mrf.mxu1  ;;  %v446_v51 = vld [vmem:[#allocation5 + $0x910] sm:$0xff]  ;;  %1662 = vmatpush.msra.mxu1 %v510_v57  ;;  %v2995_v57 = vld [vmem:[#allocation2 + $0xf8] sm:$0xff] }
 0x1de   :  { %1352 = vmatmul.f32.gmra.mxu0 %v2964_v48  ;;  %1482 = vmatmul.f32.gmra.mxu2 %v2778_v31  ;;  %v1159_v21 = vadd.f32 %v1158_v52, %v1094_v20  ;;  %v2977_v20 = vld [vmem:[#allocation2 + $0x98] sm:$0xff] }
 0x1df   :  { %2115 = vst [vmem:[#allocation8 + $0x28] sm:$0xff] %v1286_v28  ;;  %v255_v28 = vld [vmem:[#allocation5 + $0x318] sm:$0xff]  ;;  %1597 = vmatpush.msra.mxu0 %v446_v51 }
 0x1e0   :  { %1417 = vmatmul.f32.gmra.mxu1 %v2968_v61  ;;  %1792 = vmatpush.msra.mxu3 %v255_v28  ;;  %v2991_v28 = vld [vmem:[#allocation2 + $0xf0] sm:$0xff] }
 0x1e1   :  { %1547 = vmatmul.f32.gmra.mxu3 %v2782_v19  ;;  %v1223_v46 = vpop.f32.mrf.mxu2  ;;  %v191_v19 = vld [vmem:[#allocation5 + $0x118] sm:$0xff] }
 0x1e2   :  { %v1224_v41 = vadd.f32 %v1223_v46, %v1159_v21  ;;  %1727 = vmatpush.msra.mxu2 %v191_v19 }
 0x1e3   :  { %v1096_v53 = vpop.f32.mrf.mxu0 }
 0x1e4   :  { %v1097_v31 = vadd.f32 %v1096_v53, %v2800_v25  ;;  %v1288_v43 = vpop.f32.mrf.mxu3  ;;  %v2986_v53 = vld [vmem:[#allocation2 + $0xc8] sm:$0xff] }
 0x1e5   :  { %v1289_v8 = vadd.f32 %v1288_v43, %v1224_v41  ;;  %v1161_v55 = vpop.f32.mrf.mxu1  ;;  %v2982_v41 = vld [vmem:[#allocation2 + $0xc0] sm:$0xff]  ;;  %v251_v43 = vld [vmem:[#allocation5 + $0x2f8] sm:$0xff] }
 0x1e6   :  { %1355 = vmatmul.f32.gmra.mxu0 %v2973_v33  ;;  %1485 = vmatmul.f32.gmra.mxu2 %v2790_v60  ;;  %v1162_v63 = vadd.f32 %v1161_v55, %v1097_v31  ;;  %v442_v31 = vld [vmem:[#allocation5 + $0x8f0] sm:$0xff] }
 0x1e7   :  { %2119 = vst [vmem:[#allocation8 + $0x48] sm:$0xff] %v1289_v8  ;;  %1598 = vmatpush.msra.mxu0 %v442_v31  ;;  %1793 = vmatpush.msra.mxu3 %v251_v43  ;;  %v506_v55 = vld [vmem:[#allocation5 + $0xaf0] sm:$0xff]  ;;  %v3000_v31 = vld [vmem:[#allocation2 + $0x120] sm:$0xff] }
 0x1e8   :  { %1420 = vmatmul.f32.gmra.mxu1 %v2977_v20 }
 0x1e9   :  { %1550 = vmatmul.f32.gmra.mxu3 %v2794_v47  ;;  %v1226_v25 = vpop.f32.mrf.mxu2  ;;  %v187_v47 = vld [vmem:[#allocation5 + $0xf8] sm:$0xff]  ;;  %1663 = vmatpush.msra.mxu1 %v506_v55  ;;  %v434_v55 = vld [vmem:[#allocation5 + $0x8b0] sm:$0xff] }
 0x1ea   :  { %v1227_v52 = vadd.f32 %v1226_v25, %v1162_v63  ;;  %1728 = vmatpush.msra.mxu2 %v187_v47 }
 0x1eb   :  { %v1099_v21 = vpop.f32.mrf.mxu0 }
 0x1ec   :  { %v1100_v60 = vadd.f32 %v1099_v21, %v2812_v49  ;;  %v1291_v46 = vpop.f32.mrf.mxu3  ;;  %v438_v21 = vld [vmem:[#allocation5 + $0x8d0] sm:$0xff] }
 0x1ed   :  { %v1292_v38 = vadd.f32 %v1291_v46, %v1227_v52  ;;  %v1164_v23 = vpop.f32.mrf.mxu1  ;;  %1599 = vmatpush.msra.mxu0 %v438_v21 }
 0x1ee   :  { %1358 = vmatmul.f32.gmra.mxu0 %v2982_v41  ;;  %1488 = vmatmul.f32.gmra.mxu2 %v2802_v16  ;;  %v1165_v22 = vadd.f32 %v1164_v23, %v1100_v60  ;;  %v247_v60 = vld [vmem:[#allocation5 + $0x2d8] sm:$0xff] }
 0x1ef   :  { %2123 = vst [vmem:[#allocation8 + $0x68] sm:$0xff] %v1292_v38  ;;  %1794 = vmatpush.msra.mxu3 %v247_v60  ;;  %v502_v38 = vld [vmem:[#allocation5 + $0xad0] sm:$0xff]  ;;  %1600 = vmatpush.msra.mxu0 %v434_v55  ;;  %v3013_v60 = vld [vmem:[#allocation2 + $0x158] sm:$0xff]  ;;  %v3022_v55 = vld [vmem:[#allocation2 + $0x188] sm:$0xff] }
 0x1f0   :  { %1423 = vmatmul.f32.gmra.mxu1 %v2986_v53 }
 0x1f1   :  { %1553 = vmatmul.f32.gmra.mxu3 %v2806_v15  ;;  %v1229_v49 = vpop.f32.mrf.mxu2  ;;  %v183_v15 = vld [vmem:[#allocation5 + $0xd8] sm:$0xff]  ;;  %1664 = vmatpush.msra.mxu1 %v502_v38 }
 0x1f2   :  { %v1230_v8 = vadd.f32 %v1229_v49, %v1165_v22  ;;  %1729 = vmatpush.msra.mxu2 %v183_v15  ;;  %v239_v38 = vld [vmem:[#allocation5 + $0x298] sm:$0xff] }
 0x1f3   :  { %v1102_v19 = vpop.f32.mrf.mxu0 }
 0x1f4   :  { %v1103_v16 = vadd.f32 %v1102_v19, %v2824_v37  ;;  %v1294_v63 = vpop.f32.mrf.mxu3  ;;  %v243_v19 = vld [vmem:[#allocation5 + $0x2b8] sm:$0xff] }
 0x1f5   :  { %v1295_v25 = vadd.f32 %v1294_v63, %v1230_v8  ;;  %v1167_v51 = vpop.f32.mrf.mxu1  ;;  %v3004_v8 = vld [vmem:[#allocation2 + $0x128] sm:$0xff]  ;;  %1795 = vmatpush.msra.mxu3 %v243_v19  ;;  %v498_v63 = vld [vmem:[#allocation5 + $0xab0] sm:$0xff] }
 0x1f6   :  { %1361 = vmatmul.f32.gmra.mxu0 %v2991_v28  ;;  %1491 = vmatmul.f32.gmra.mxu2 %v2814_v45  ;;  %v1168_v52 = vadd.f32 %v1167_v51, %v1103_v16  ;;  %v426_v19 = vld [vmem:[#allocation5 + $0x870] sm:$0xff] }
 0x1f7   :  { %2127 = vst [vmem:[#allocation8 + $0x88] sm:$0xff] %v1295_v25  ;;  %1665 = vmatpush.msra.mxu1 %v498_v63  ;;  %1796 = vmatpush.msra.mxu3 %v239_v38  ;;  %v231_v38 = vld [vmem:[#allocation5 + $0x258] sm:$0xff] }
 0x1f8   :  { %1426 = vmatmul.f32.gmra.mxu1 %v2995_v57 }
 0x1f9   :  { %1556 = vmatmul.f32.gmra.mxu3 %v2818_v14  ;;  %v1232_v37 = vpop.f32.mrf.mxu2  ;;  %v179_v14 = vld [vmem:[#allocation5 + $0xb8] sm:$0xff] }
 0x1fa   :  { %v1233_v46 = vadd.f32 %v1232_v37, %v1168_v52  ;;  %1730 = vmatpush.msra.mxu2 %v179_v14  ;;  %v3009_v37 = vld [vmem:[#allocation2 + $0x150] sm:$0xff] }
 0x1fb   :  { %v1105_v23 = vpop.f32.mrf.mxu0 }
 0x1fc   :  { %v1106_v45 = vadd.f32 %v1105_v23, %v2836_v13  ;;  %v1297_v47 = vpop.f32.mrf.mxu3 }
 0x1fd   :  { %v1298_v22 = vadd.f32 %v1297_v47, %v1233_v46  ;;  %v1170_v49 = vpop.f32.mrf.mxu1  ;;  %v430_v46 = vld [vmem:[#allocation5 + $0x890] sm:$0xff] }
 0x1fe   :  { %1364 = vmatmul.f32.gmra.mxu0 %v3000_v31  ;;  %1494 = vmatmul.f32.gmra.mxu2 %v2826_v7  ;;  %v1171_v43 = vadd.f32 %v1170_v49, %v1106_v45  ;;  %v494_v45 = vld [vmem:[#allocation5 + $0xa90] sm:$0xff] }
 0x1ff   :  { %2131 = vst [vmem:[#allocation8 + $0xa8] sm:$0xff] %v1298_v22  ;;  %1601 = vmatpush.msra.mxu0 %v430_v46  ;;  %1666 = vmatpush.msra.mxu1 %v494_v45  ;;  %v422_v46 = vld [vmem:[#allocation5 + $0x850] sm:$0xff] }
 0x200   :  { %1429 = vmatmul.f32.gmra.mxu1 %v3004_v8  ;;  %v486_v45 = vld [vmem:[#allocation5 + $0xa50] sm:$0xff] }
 0x201   :  { %1559 = vmatmul.f32.gmra.mxu3 %v2830_v9  ;;  %v1235_v13 = vpop.f32.mrf.mxu2  ;;  %v175_v9 = vld [vmem:[#allocation5 + $0x98] sm:$0xff]  ;;  %1602 = vmatpush.msra.mxu0 %v426_v19 }
 0x202   :  { %v1236_v16 = vadd.f32 %v1235_v13, %v1171_v43  ;;  %1731 = vmatpush.msra.mxu2 %v175_v9  ;;  %v3018_v43 = vld [vmem:[#allocation2 + $0x180] sm:$0xff]  ;;  %v3027_v9 = vld [vmem:[#allocation2 + $0x1b0] sm:$0xff]  ;;  %v227_v19 = vld [vmem:[#allocation5 + $0x238] sm:$0xff] }
 0x203   :  { %v1108_v25 = vpop.f32.mrf.mxu0  ;;  %1603 = vmatpush.msra.mxu0 %v422_v46 }
 0x204   :  { %v1109_v7 = vadd.f32 %v1108_v25, %v2848_v39  ;;  %v1300_v51 = vpop.f32.mrf.mxu3  ;;  %v490_v25 = vld [vmem:[#allocation5 + $0xa70] sm:$0xff] }
 0x205   :  { %v1301_v15 = vadd.f32 %v1300_v51, %v1236_v16  ;;  %v1173_v52 = vpop.f32.mrf.mxu1  ;;  %v235_v16 = vld [vmem:[#allocation5 + $0x278] sm:$0xff]  ;;  %1667 = vmatpush.msra.mxu1 %v490_v25 }
 0x206   :  { %1367 = vmatmul.f32.gmra.mxu0 %v3009_v37  ;;  %1497 = vmatmul.f32.gmra.mxu2 %v2838_v35  ;;  %v1174_v21 = vadd.f32 %v1173_v52, %v1109_v7 }
 0x207   :  { %2135 = vst [vmem:[#allocation8 + $0xc8] sm:$0xff] %v1301_v15  ;;  %1797 = vmatpush.msra.mxu3 %v235_v16  ;;  %1668 = vmatpush.msra.mxu1 %v486_v45 }
 0x208   :  { %1432 = vmatmul.f32.gmra.mxu1 %v3013_v60 }
 0x209   :  { %1562 = vmatmul.f32.gmra.mxu3 %v2842_v42  ;;  %v1238_v39 = vpop.f32.mrf.mxu2  ;;  %v171_v42 = vld [vmem:[#allocation5 + $0x78] sm:$0xff] }
 0x20a   :  { %v1239_v23 = vadd.f32 %v1238_v39, %v1174_v21  ;;  %1732 = vmatpush.msra.mxu2 %v171_v42  ;;  %v3031_v39 = vld [vmem:[#allocation2 + $0x1b8] sm:$0xff]  ;;  %1798 = vmatpush.msra.mxu3 %v231_v38  ;;  %v478_v38 = vld [vmem:[#allocation5 + $0xa10] sm:$0xff] }
 0x20b   :  { %v1111_v47 = vpop.f32.mrf.mxu0 }
 0x20c   :  { %v1112_v35 = vadd.f32 %v1111_v47, %v2860_v5  ;;  %v1303_v22 = vpop.f32.mrf.mxu3  ;;  %1799 = vmatpush.msra.mxu3 %v227_v19 }
 0x20d   :  { %v1304_v49 = vadd.f32 %v1303_v22, %v1239_v23  ;;  %v1176_v14 = vpop.f32.mrf.mxu1 }
 0x20e   :  { %1370 = vmatmul.f32.gmra.mxu0 %v3018_v43  ;;  %1500 = vmatmul.f32.gmra.mxu2 %v2850_v6  ;;  %v1177_v13 = vadd.f32 %v1176_v14, %v1112_v35  ;;  %v3036_v14 = vld [vmem:[#allocation2 + $0x1e0] sm:$0xff] }
 0x20f   :  { %2139 = vst [vmem:[#allocation8 + $0xe8] sm:$0xff] %v1304_v49 }
 0x210   :  { %1435 = vmatmul.f32.gmra.mxu1 %v3022_v55 }
 0x211   :  { %1565 = vmatmul.f32.gmra.mxu3 %v2854_v34  ;;  %v1241_v5 = vpop.f32.mrf.mxu2  ;;  %v167_v34 = vld [vmem:[#allocation5 + $0x58] sm:$0xff] }
 0x212   :  { %v1242_v63 = vadd.f32 %v1241_v5, %v1177_v13  ;;  %1733 = vmatpush.msra.mxu2 %v167_v34  ;;  %v3040_v13 = vld [vmem:[#allocation2 + $0x1e8] sm:$0xff]  ;;  %v418_v5 = vld [vmem:[#allocation5 + $0x830] sm:$0xff]  ;;  %v3049_v34 = vld [vmem:[#allocation2 + $0x218] sm:$0xff] }
 0x213   :  { %v1114_v7 = vpop.f32.mrf.mxu0  ;;  %1604 = vmatpush.msra.mxu0 %v418_v5  ;;  %v411_v5 = vld [vmem:[#allocation5 + $0x7f8] sm:$0xff] }
 0x214   :  { %v1115_v6 = vadd.f32 %v1114_v7, %v2872_v29  ;;  %v1306_v51 = vpop.f32.mrf.mxu3 }
 0x215   :  { %v1307_v15 = vadd.f32 %v1306_v51, %v1242_v63  ;;  %v1179_v52 = vpop.f32.mrf.mxu1  ;;  %v482_v63 = vld [vmem:[#allocation5 + $0xa30] sm:$0xff] }
 0x216   :  { %1373 = vmatmul.f32.gmra.mxu0 %v3027_v9  ;;  %1503 = vmatmul.f32.gmra.mxu2 %v2862_v40  ;;  %v1180_v21 = vadd.f32 %v1179_v52, %v1115_v6 }
 0x217   :  { %2143 = vst [vmem:[#allocation8 + $0x108] sm:$0xff] %v1307_v15  ;;  %1669 = vmatpush.msra.mxu1 %v482_v63  ;;  %v3045_v15 = vld [vmem:[#allocation2 + $0x210] sm:$0xff] }
 0x218   :  { %1438 = vmatmul.f32.gmra.mxu1 %v3031_v39 }
 0x219   :  { %1568 = vmatmul.f32.gmra.mxu3 %v2866_v18  ;;  %v1244_v29 = vpop.f32.mrf.mxu2  ;;  %v163_v18 = vld [vmem:[#allocation5 + $0x38] sm:$0xff]  ;;  %1670 = vmatpush.msra.mxu1 %v478_v38 }
 0x21a   :  { %v1245_v23 = vadd.f32 %v1244_v29, %v1180_v21  ;;  %1734 = vmatpush.msra.mxu2 %v163_v18  ;;  %v414_v21 = vld [vmem:[#allocation5 + $0x810] sm:$0xff]  ;;  %v223_v29 = vld [vmem:[#allocation5 + $0x218] sm:$0xff] }
 0x21b   :  { %v1117_v47 = vpop.f32.mrf.mxu0  ;;  %1605 = vmatpush.msra.mxu0 %v414_v21  ;;  %1800 = vmatpush.msra.mxu3 %v223_v29  ;;  %v347_v18 = vld [vmem:[#allocation5 + $0x5f8] sm:$0xff] }
 0x21c   :  { %v1118_v40 = vadd.f32 %v1117_v47, %v2884_v0  ;;  %v1309_v35 = vpop.f32.mrf.mxu3  ;;  %1915 = vmatpush.msrb.mxu1 %v411_v5  ;;  %v3081_v5 = vld [vmem:[#allocation2 + $0x2d0] sm:$0xff] }
 0x21d   :  { %v1310_v22 = vadd.f32 %v1309_v35, %v1245_v23  ;;  %v1182_v49 = vpop.f32.mrf.mxu1  ;;  %v3054_v35 = vld [vmem:[#allocation2 + $0x240] sm:$0xff]  ;;  %1850 = vmatpush.msrb.mxu0 %v347_v18 }
 0x21e   :  { %1376 = vmatmul.f32.gmra.mxu0 %v3036_v14  ;;  %1506 = vmatmul.f32.gmra.mxu2 %v2874_v30  ;;  %v1183_v42 = vadd.f32 %v1182_v49, %v1118_v40  ;;  %v3058_v49 = vld [vmem:[#allocation2 + $0x248] sm:$0xff] }
 0x21f   :  { %2147 = vst [vmem:[#allocation8 + $0x128] sm:$0xff] %v1310_v22 }
 0x220   :  { %1441 = vmatmul.f32.gmra.mxu1 %v3040_v13 }
 0x221   :  { %1571 = vmatmul.f32.gmra.mxu3 %v2878_v3  ;;  %v1247_v0 = vpop.f32.mrf.mxu2  ;;  %v159_v3 = vld [vmem:[#allocation5 + $0x18] sm:$0xff] }
 0x222   :  { %v1248_v16 = vadd.f32 %v1247_v0, %v1183_v42  ;;  %1735 = vmatpush.msra.mxu2 %v159_v3  ;;  %v539_v42 = vld [vmem:[#allocation5 + $0xbf8] sm:$0xff] }
 0x223   :  { %v1120_v25 = vpop.f32.mrf.mxu0  ;;  %2045 = vmatpush.msrb.mxu3 %v539_v42  ;;  %v535_v3 = vld [vmem:[#allocation5 + $0xbd8] sm:$0xff] }
 0x224   :  { %v1121_v30 = vadd.f32 %v1120_v25, %v2896_v27  ;;  %v1312_v7 = vpop.f32.mrf.mxu3 }
 0x225   :  { %v1313_v6 = vadd.f32 %v1312_v7, %v1248_v16  ;;  %v1185_v51 = vpop.f32.mrf.mxu1  ;;  %2046 = vmatpush.msrb.mxu3 %v535_v3 }
 0x226   :  { %1379 = vmatmul.f32.gmra.mxu0 %v3045_v15  ;;  %1509 = vmatmul.f32.gmra.mxu2 %v2886_v58  ;;  %v1186_v52 = vadd.f32 %v1185_v51, %v1121_v30  ;;  %v3063_v30 = vld [vmem:[#allocation2 + $0x270] sm:$0xff]  ;;  %v343_v51 = vld [vmem:[#allocation5 + $0x5d8] sm:$0xff] }
 0x227   :  { %2151 = vst [vmem:[#allocation8 + $0x148] sm:$0xff] %v1313_v6  ;;  %v3067_v6 = vld [vmem:[#allocation2 + $0x278] sm:$0xff]  ;;  %1851 = vmatpush.msrb.mxu0 %v343_v51 }
 0x228   :  { %1444 = vmatmul.f32.gmra.mxu1 %v3049_v34 }
 0x229   :  { %1574 = vmatmul.f32.gmra.mxu3 %v2890_v59  ;;  %v1250_v27 = vpop.f32.mrf.mxu2  ;;  %v475_v59 = vld [vmem:[#allocation5 + $0x9f8] sm:$0xff] }
 0x22a   :  { %v1251_v46 = vadd.f32 %v1250_v27, %v1186_v52  ;;  %1980 = vmatpush.msrb.mxu2 %v475_v59  ;;  %v407_v27 = vld [vmem:[#allocation5 + $0x7d8] sm:$0xff] }
 0x22b   :  { %v1123_v23 = vpop.f32.mrf.mxu0  ;;  %1916 = vmatpush.msrb.mxu1 %v407_v27 }
 0x22c   :  { %v1124_v58 = vadd.f32 %v1123_v23, %v2908_v2  ;;  %v1315_v45 = vpop.f32.mrf.mxu3  ;;  %v3072_v23 = vld [vmem:[#allocation2 + $0x2a0] sm:$0xff] }
 0x22d   :  { %v1316_v47 = vadd.f32 %v1315_v45, %v1251_v46  ;;  %v1188_v40 = vpop.f32.mrf.mxu1  ;;  %v3076_v45 = vld [vmem:[#allocation2 + $0x2a8] sm:$0xff] }
 0x22e   :  { %1382 = vmatmul.f32.gmra.mxu0 %v3054_v35  ;;  %1512 = vmatmul.f32.gmra.mxu2 %v2898_v62  ;;  %v1189_v22 = vadd.f32 %v1188_v40, %v1124_v58  ;;  %v531_v40 = vld [vmem:[#allocation5 + $0xbb8] sm:$0xff] }
 0x22f   :  { %2155 = vst [vmem:[#allocation8 + $0x168] sm:$0xff] %v1316_v47  ;;  %v339_v47 = vld [vmem:[#allocation5 + $0x5b8] sm:$0xff]  ;;  %2047 = vmatpush.msrb.mxu3 %v531_v40 }
 0x230   :  { %1447 = vmatmul.f32.gmra.mxu1 %v3058_v49  ;;  %1852 = vmatpush.msrb.mxu0 %v339_v47 }
 0x231   :  { %1577 = vmatmul.f32.gmra.mxu3 %v2902_v1  ;;  %v1253_v2 = vpop.f32.mrf.mxu2  ;;  %v471_v1 = vld [vmem:[#allocation5 + $0x9d8] sm:$0xff] }
 0x232   :  { %v1254_v0 = vadd.f32 %v1253_v2, %v1189_v22  ;;  %1981 = vmatpush.msrb.mxu2 %v471_v1  ;;  %v403_v22 = vld [vmem:[#allocation5 + $0x7b8] sm:$0xff] }
 0x233   :  { %v1126_v19 = vpop.f32.mrf.mxu0  ;;  %1917 = vmatpush.msrb.mxu1 %v403_v22  ;;  %v527_v1 = vld [vmem:[#allocation5 + $0xb98] sm:$0xff] }
 0x234   :  { %v1127_v62 = vadd.f32 %v1126_v19, %v2920_v56  ;;  %v1318_v16 = vpop.f32.mrf.mxu3  ;;  %2048 = vmatpush.msrb.mxu3 %v527_v1 }
 0x235   :  { %v1319_v63 = vadd.f32 %v1318_v16, %v1254_v0  ;;  %v1191_v25 = vpop.f32.mrf.mxu1  ;;  %v3088_v16 = vld [vmem:[#allocation7] sm:$0xf] }
 0x236   :  { %1385 = vmatmul.f32.gmra.mxu0 %v3063_v30  ;;  %1515 = vmatmul.f32.gmra.mxu2 %v2910_v54  ;;  %v1192_v7 = vadd.f32 %v1191_v25, %v1127_v62  ;;  %v3085_v62 = vld [vmem:[#allocation2 + $0x2d8] sm:$0xff] }
 0x237   :  { %2159 = vst [vmem:[#allocation8 + $0x188] sm:$0xff] %v1319_v63  ;;  %v335_v25 = vld [vmem:[#allocation5 + $0x598] sm:$0xff] }
 0x238   :  { %1450 = vmatmul.f32.gmra.mxu1 %v3067_v6  ;;  %1853 = vmatpush.msrb.mxu0 %v335_v25 }
 0x239   :  { %1580 = vmatmul.f32.gmra.mxu3 %v2914_v44  ;;  %v1256_v56 = vpop.f32.mrf.mxu2  ;;  %v467_v44 = vld [vmem:[#allocation5 + $0x9b8] sm:$0xff] }
 0x23a   :  { %v1257_v52 = vadd.f32 %v1256_v56, %v1192_v7  ;;  %1982 = vmatpush.msrb.mxu2 %v467_v44  ;;  %v523_v44 = vld [vmem:[#allocation5 + $0xb78] sm:$0xff] }
 0x23b   :  { %v1129_v21 = vpop.f32.mrf.mxu0  ;;  %2049 = vmatpush.msrb.mxu3 %v523_v44 }
 0x23c   :  { %v1130_v54 = vadd.f32 %v1129_v21, %v2932_v50  ;;  %v1321_v29 = vpop.f32.mrf.mxu3 }
 0x23d   :  { %v1322_v46 = vadd.f32 %v1321_v29, %v1257_v52  ;;  %v1194_v38 = vpop.f32.mrf.mxu1  ;;  %v3099_v29 = vld [vmem:[#allocation2 + $0x28] sm:$0xff] }
 0x23e   :  { %1388 = vmatmul.f32.gmra.mxu0 %v3072_v23  ;;  %1518 = vmatmul.f32.gmra.mxu2 %v2922_v26  ;;  %v1195_v58 = vadd.f32 %v1194_v38, %v1130_v54  ;;  %v3095_v54 = vld [vmem:[#allocation2 + $0x20] sm:$0xff]  ;;  %v331_v38 = vld [vmem:[#allocation5 + $0x578] sm:$0xff] }
 0x23f   :  { %2163 = vst [vmem:[#allocation8 + $0x1a8] sm:$0xff] %v1322_v46  ;;  %1854 = vmatpush.msrb.mxu0 %v331_v38 }
 0x240   :  { %1453 = vmatmul.f32.gmra.mxu1 %v3076_v45 }
 0x241   :  { %1583 = vmatmul.f32.gmra.mxu3 %v2926_v11  ;;  %v1259_v50 = vpop.f32.mrf.mxu2  ;;  %v463_v11 = vld [vmem:[#allocation5 + $0x998] sm:$0xff] }
 0x242   :  { %v1260_v59 = vadd.f32 %v1259_v50, %v1195_v58  ;;  %1983 = vmatpush.msrb.mxu2 %v463_v11  ;;  %v395_v50 = vld [vmem:[#allocation5 + $0x778] sm:$0xff] }
 0x243   :  { %v1132_v2 = vpop.f32.mrf.mxu0  ;;  %v519_v11 = vld [vmem:[#allocation5 + $0xb58] sm:$0xff] }
 0x244   :  { %v1133_v26 = vadd.f32 %v1132_v2, %v2944_v12  ;;  %v1324_v18 = vpop.f32.mrf.mxu3  ;;  %v3091_v12 = vperm.slane %v3088_v16, 2  ;;  %2050 = vmatpush.msrb.mxu3 %v519_v11 }
 0x245   :  { %v1325_v42 = vadd.f32 %v1324_v18, %v1260_v59  ;;  %v1197_v0 = vpop.f32.mrf.mxu1  ;;  %v3110_v18 = vld [vmem:[#allocation2 + $0x58] sm:$0xff] }
 0x246   :  { %1391 = vmatmul.f32.gmra.mxu0 %v3081_v5  ;;  %1521 = vmatmul.f32.gmra.mxu2 %v2934_v4  ;;  %v1198_v19 = vadd.f32 %v1197_v0, %v1133_v26  ;;  %v399_v4 = vld [vmem:[#allocation5 + $0x798] sm:$0xff]  ;;  %v3106_v26 = vld [vmem:[#allocation2 + $0x50] sm:$0xff] }
 0x247   :  { %2167 = vst [vmem:[#allocation8 + $0x1c8] sm:$0xff] %v1325_v42  ;;  %1918 = vmatpush.msrb.mxu1 %v399_v4  ;;  %v327_v0 = vld [vmem:[#allocation5 + $0x558] sm:$0xff] }
 0x248   :  { %1456 = vmatmul.f32.gmra.mxu1 %v3085_v62  ;;  %1855 = vmatpush.msrb.mxu0 %v327_v0  ;;  %v383_v0 = vld [vmem:[#allocation5 + $0x718] sm:$0xff] }
 0x249   :  { %1586 = vmatmul.f32.gmra.mxu3 %v2938_v24  ;;  %v1262_v63 = vpop.f32.mrf.mxu2  ;;  %v459_v24 = vld [vmem:[#allocation5 + $0x978] sm:$0xff]  ;;  %1919 = vmatpush.msrb.mxu1 %v395_v50 }
 0x24a   :  { %v1263_v7 = vadd.f32 %v1262_v63, %v1198_v19  ;;  %1984 = vmatpush.msrb.mxu2 %v459_v24  ;;  %v391_v63 = vld [vmem:[#allocation5 + $0x758] sm:$0xff] }
 0x24b   :  { %v1347_v56 = vpop.f32.mrf.mxu0  ;;  %1920 = vmatpush.msrb.mxu1 %v391_v63 }
 0x24c   :  { %v1327_v51 = vpop.f32.mrf.mxu3  ;;  %v1348_v3 = vadd.f32 %v1347_v56, %v3091_v12 }
 0x24d   :  { %v1328_v52 = vadd.f32 %v1327_v51, %v1263_v7  ;;  %v1412_v27 = vpop.f32.mrf.mxu1  ;;  %v3117_v51 = vld [vmem:[#allocation2 + $0x80] sm:$0xff] }
 0x24e   :  { %v1413_v21 = vadd.f32 %v1412_v27, %v1348_v3  ;;  %1606 = vmatmul.f32.vlgmr.msra.gmra.mxu0 %v3095_v54  ;;  %1736 = vmatmul.f32.vlgmr.msra.gmra.mxu2 %v2946_v32  ;;  %v3121_v3 = vld [vmem:[#allocation2 + $0x88] sm:$0xff]  ;;  %v323_v27 = vld [vmem:[#allocation5 + $0x538] sm:$0xff] }
 0x24f   :  { %2171 = vst [vmem:[#allocation8 + $0x1e8] sm:$0xff] %v1328_v52  ;;  %1856 = vmatpush.msrb.mxu0 %v323_v27 }
 0x250   :  { %1671 = vmatmul.f32.vlgmr.msra.gmra.mxu1 %v3099_v29 }
 0x251   :  { %1801 = vmatmul.f32.vlgmr.msra.gmra.mxu3 %v2950_v36  ;;  %v1477_v46 = vpop.f32.mrf.mxu2  ;;  %v455_v36 = vld [vmem:[#allocation5 + $0x958] sm:$0xff] }
 0x252   :  { %v1478_v58 = vadd.f32 %v1477_v46, %v1413_v21  ;;  %1985 = vmatpush.msrb.mxu2 %v455_v36  ;;  %v515_v21 = vld [vmem:[#allocation5 + $0xb38] sm:$0xff] }
 0x253   :  { %v1350_v47 = vpop.f32.mrf.mxu0  ;;  %2051 = vmatpush.msrb.mxu3 %v515_v21  ;;  %v387_v46 = vld [vmem:[#allocation5 + $0x738] sm:$0xff] }
 0x254   :  { %v1351_v32 = vadd.f32 %v1350_v47, %v3091_v12  ;;  %v1542_v40 = vpop.f32.mrf.mxu3  ;;  %1921 = vmatpush.msrb.mxu1 %v387_v46  ;;  %v511_v36 = vld [vmem:[#allocation5 + $0xb18] sm:$0xff] }
 0x255   :  { %v3104_v59 = vadd.f32 %v1542_v40, %v1478_v58  ;;  %v1415_v22 = vpop.f32.mrf.mxu1  ;;  %v3132_v40 = vld [vmem:[#allocation2 + $0xb8] sm:$0xff]  ;;  %2052 = vmatpush.msrb.mxu3 %v511_v36 }
 0x256   :  { %v1416_v2 = vadd.f32 %v1415_v22, %v1351_v32  ;;  %1609 = vmatmul.f32.gmra.mxu0 %v3106_v26  ;;  %1739 = vmatmul.f32.gmra.mxu2 %v2955_v17  ;;  %v3128_v32 = vld [vmem:[#allocation2 + $0xb0] sm:$0xff]  ;;  %v379_v21 = vld [vmem:[#allocation5 + $0x6f8] sm:$0xff] }
 0x257   :  { %1922 = vmatpush.msrb.mxu1 %v383_v0 }
 0x258   :  { %1674 = vmatmul.f32.gmra.mxu1 %v3110_v18 }
 0x259   :  { %1804 = vmatmul.f32.gmra.mxu3 %v2959_v10  ;;  %v1480_v42 = vpop.f32.mrf.mxu2  ;;  %v451_v10 = vld [vmem:[#allocation5 + $0x938] sm:$0xff]  ;;  %1923 = vmatpush.msrb.mxu1 %v379_v21 }
 0x25a   :  { %v1481_v19 = vadd.f32 %v1480_v42, %v1416_v2  ;;  %1986 = vmatpush.msrb.mxu2 %v451_v10  ;;  %v319_v2 = vld [vmem:[#allocation5 + $0x518] sm:$0xff] }
 0x25b   :  { %v1353_v25 = vpop.f32.mrf.mxu0  ;;  %1857 = vmatpush.msrb.mxu0 %v319_v2  ;;  %v315_v10 = vld [vmem:[#allocation5 + $0x4f8] sm:$0xff] }
 0x25c   :  { %v1354_v1 = vadd.f32 %v1353_v25, %v3091_v12  ;;  %v1545_v17 = vpop.f32.mrf.mxu3  ;;  %v503_v2 = vld [vmem:[#allocation5 + $0xad8] sm:$0xff] }
 0x25d   :  { %v3115_v7 = vadd.f32 %v1545_v17, %v1481_v19  ;;  %v1418_v4 = vpop.f32.mrf.mxu1  ;;  %v3139_v17 = vld [vmem:[#allocation2 + $0xe0] sm:$0xff]  ;;  %1858 = vmatpush.msrb.mxu0 %v315_v10  ;;  %v307_v10 = vld [vmem:[#allocation5 + $0x4b8] sm:$0xff] }
 0x25e   :  { %v1419_v56 = vadd.f32 %v1418_v4, %v1354_v1  ;;  %1612 = vmatmul.f32.gmra.mxu0 %v3117_v51  ;;  %1742 = vmatmul.f32.gmra.mxu2 %v2964_v48  ;;  %v3143_v4 = vld [vmem:[#allocation2 + $0xe8] sm:$0xff]  ;;  %v371_v21 = vld [vmem:[#allocation5 + $0x6b8] sm:$0xff] }
 0x260   :  { %1677 = vmatmul.f32.gmra.mxu1 %v3121_v3 }
 0x261   :  { %1807 = vmatmul.f32.gmra.mxu3 %v2968_v61  ;;  %v1483_v52 = vpop.f32.mrf.mxu2  ;;  %v447_v61 = vld [vmem:[#allocation5 + $0x918] sm:$0xff] }
 0x262   :  { %v1484_v24 = vadd.f32 %v1483_v52, %v1419_v56  ;;  %1987 = vmatpush.msrb.mxu2 %v447_v61  ;;  %v507_v52 = vld [vmem:[#allocation5 + $0xaf8] sm:$0xff] }
 0x263   :  { %v1356_v38 = vpop.f32.mrf.mxu0  ;;  %2053 = vmatpush.msrb.mxu3 %v507_v52  ;;  %v499_v52 = vld [vmem:[#allocation5 + $0xab8] sm:$0xff] }
 0x264   :  { %v1357_v44 = vadd.f32 %v1356_v38, %v3091_v12  ;;  %v1548_v48 = vpop.f32.mrf.mxu3 }
 0x265   :  { %v3126_v58 = vadd.f32 %v1548_v48, %v1484_v24  ;;  %v1421_v50 = vpop.f32.mrf.mxu1  ;;  %2054 = vmatpush.msrb.mxu3 %v503_v2  ;;  %v303_v2 = vld [vmem:[#allocation5 + $0x498] sm:$0xff] }
 0x266   :  { %v1422_v47 = vadd.f32 %v1421_v50, %v1357_v44  ;;  %1615 = vmatmul.f32.gmra.mxu0 %v3128_v32  ;;  %1745 = vmatmul.f32.gmra.mxu2 %v2973_v33  ;;  %v3150_v50 = vld [vmem:[#allocation2 + $0x110] sm:$0xff] }
 0x267   :  { %2055 = vmatpush.msrb.mxu3 %v499_v52 }
 0x268   :  { %1680 = vmatmul.f32.gmra.mxu1 %v3132_v40 }
 0x269   :  { %1810 = vmatmul.f32.gmra.mxu3 %v2977_v20  ;;  %v1486_v22 = vpop.f32.mrf.mxu2  ;;  %v443_v20 = vld [vmem:[#allocation5 + $0x8f8] sm:$0xff] }
 0x26a   :  { %v1487_v42 = vadd.f32 %v1486_v22, %v1422_v47  ;;  %1988 = vmatpush.msrb.mxu2 %v443_v20  ;;  %v3154_v47 = vld [vmem:[#allocation2 + $0x118] sm:$0xff]  ;;  %v3165_v20 = vld [vmem:[#allocation2 + $0x148] sm:$0xff] }
 0x26b   :  { %v1359_v11 = vpop.f32.mrf.mxu0  ;;  %v311_v22 = vld [vmem:[#allocation5 + $0x4d8] sm:$0xff] }
 0x26c   :  { %v1360_v19 = vadd.f32 %v1359_v11, %v3091_v12  ;;  %v1551_v33 = vpop.f32.mrf.mxu3  ;;  %1859 = vmatpush.msrb.mxu0 %v311_v22 }
 0x26d   :  { %v3137_v63 = vadd.f32 %v1551_v33, %v1487_v42  ;;  %v1424_v25 = vpop.f32.mrf.mxu1  ;;  %v375_v42 = vld [vmem:[#allocation5 + $0x6d8] sm:$0xff] }
 0x26e   :  { %v1425_v1 = vadd.f32 %v1424_v25, %v1360_v19  ;;  %1618 = vmatmul.f32.gmra.mxu0 %v3139_v17  ;;  %1748 = vmatmul.f32.gmra.mxu2 %v2982_v41 }
 0x26f   :  { %1924 = vmatpush.msrb.mxu1 %v375_v42  ;;  %1860 = vmatpush.msrb.mxu0 %v307_v10  ;;  %v3187_v10 = vld [vmem:[#allocation2 + $0x1a8] sm:$0xff] }
 0x270   :  { %1683 = vmatmul.f32.gmra.mxu1 %v3143_v4 }
 0x271   :  { %1813 = vmatmul.f32.gmra.mxu3 %v2986_v53  ;;  %v1489_v56 = vpop.f32.mrf.mxu2  ;;  %v439_v53 = vld [vmem:[#allocation5 + $0x8d8] sm:$0xff]  ;;  %1925 = vmatpush.msrb.mxu1 %v371_v21 }
 0x272   :  { %v1490_v27 = vadd.f32 %v1489_v56, %v1425_v1  ;;  %1989 = vmatpush.msrb.mxu2 %v439_v53  ;;  %v3161_v1 = vld [vmem:[#allocation2 + $0x140] sm:$0xff]  ;;  %v3172_v53 = vld [vmem:[#allocation2 + $0x170] sm:$0xff]  ;;  %1861 = vmatpush.msrb.mxu0 %v303_v2  ;;  %v491_v21 = vld [vmem:[#allocation5 + $0xa78] sm:$0xff] }
 0x273   :  { %v1362_v24 = vpop.f32.mrf.mxu0  ;;  %v3194_v2 = vld [vmem:[#allocation2 + $0x1d0] sm:$0xff] }
 0x274   :  { %v1363_v46 = vadd.f32 %v1362_v24, %v3091_v12  ;;  %v1554_v41 = vpop.f32.mrf.mxu3 }
 0x275   :  { %v3148_v38 = vadd.f32 %v1554_v41, %v1490_v27  ;;  %v1427_v44 = vpop.f32.mrf.mxu1 }
 0x276   :  { %v1428_v48 = vadd.f32 %v1427_v44, %v1363_v46  ;;  %1621 = vmatmul.f32.gmra.mxu0 %v3150_v50  ;;  %1751 = vmatmul.f32.gmra.mxu2 %v2991_v28 }
 0x278   :  { %1686 = vmatmul.f32.gmra.mxu1 %v3154_v47 }
 0x279   :  { %1816 = vmatmul.f32.gmra.mxu3 %v2995_v57  ;;  %v1492_v61 = vpop.f32.mrf.mxu2  ;;  %v435_v57 = vld [vmem:[#allocation5 + $0x8b8] sm:$0xff] }
 0x27a   :  { %v1493_v36 = vadd.f32 %v1492_v61, %v1428_v48  ;;  %1990 = vmatpush.msrb.mxu2 %v435_v57  ;;  %v3176_v61 = vld [vmem:[#allocation2 + $0x178] sm:$0xff] }
 0x27b   :  { %v1365_v0 = vpop.f32.mrf.mxu0 }
 0x27c   :  { %v1366_v11 = vadd.f32 %v1365_v0, %v3091_v12  ;;  %v1557_v28 = vpop.f32.mrf.mxu3  ;;  %v367_v0 = vld [vmem:[#allocation5 + $0x698] sm:$0xff] }
 0x27d   :  { %v3159_v19 = vadd.f32 %v1557_v28, %v1493_v36  ;;  %v1430_v33 = vpop.f32.mrf.mxu1  ;;  %v495_v36 = vld [vmem:[#allocation5 + $0xa98] sm:$0xff]  ;;  %1926 = vmatpush.msrb.mxu1 %v367_v0 }
 0x27e   :  { %v1431_v25 = vadd.f32 %v1430_v33, %v1366_v11  ;;  %1624 = vmatmul.f32.gmra.mxu0 %v3161_v1  ;;  %1754 = vmatmul.f32.gmra.mxu2 %v3000_v31  ;;  %v295_v0 = vld [vmem:[#allocation5 + $0x458] sm:$0xff] }
 0x27f   :  { %2056 = vmatpush.msrb.mxu3 %v495_v36  ;;  %v3198_v36 = vld [vmem:[#allocation2 + $0x1d8] sm:$0xff] }
 0x280   :  { %1689 = vmatmul.f32.gmra.mxu1 %v3165_v20 }
 0x281   :  { %1819 = vmatmul.f32.gmra.mxu3 %v3004_v8  ;;  %v1495_v56 = vpop.f32.mrf.mxu2  ;;  %v431_v8 = vld [vmem:[#allocation5 + $0x898] sm:$0xff] }
 0x282   :  { %v1496_v27 = vadd.f32 %v1495_v56, %v1431_v25  ;;  %1991 = vmatpush.msrb.mxu2 %v431_v8  ;;  %v3183_v56 = vld [vmem:[#allocation2 + $0x1a0] sm:$0xff]  ;;  %2057 = vmatpush.msrb.mxu3 %v491_v21 }
 0x283   :  { %v1368_v24 = vpop.f32.mrf.mxu0  ;;  %v3205_v21 = vld [vmem:[#allocation2 + $0x200] sm:$0xff] }
 0x284   :  { %v1369_v46 = vadd.f32 %v1368_v24, %v3091_v12  ;;  %v1560_v31 = vpop.f32.mrf.mxu3 }
 0x285   :  { %v3170_v41 = vadd.f32 %v1560_v31, %v1496_v27  ;;  %v1433_v44 = vpop.f32.mrf.mxu1  ;;  %v299_v27 = vld [vmem:[#allocation5 + $0x478] sm:$0xff] }
 0x286   :  { %v1434_v48 = vadd.f32 %v1433_v44, %v1369_v46  ;;  %1627 = vmatmul.f32.gmra.mxu0 %v3172_v53  ;;  %1757 = vmatmul.f32.gmra.mxu2 %v3009_v37  ;;  %v363_v46 = vld [vmem:[#allocation5 + $0x678] sm:$0xff] }
 0x287   :  { %1862 = vmatpush.msrb.mxu0 %v299_v27  ;;  %1927 = vmatpush.msrb.mxu1 %v363_v46 }
 0x288   :  { %1692 = vmatmul.f32.gmra.mxu1 %v3176_v61 }
 0x289   :  { %1822 = vmatmul.f32.gmra.mxu3 %v3013_v60  ;;  %v1498_v22 = vpop.f32.mrf.mxu2  ;;  %v427_v60 = vld [vmem:[#allocation5 + $0x878] sm:$0xff]  ;;  %1863 = vmatpush.msrb.mxu0 %v295_v0 }
 0x28a   :  { %v1499_v42 = vadd.f32 %v1498_v22, %v1434_v48  ;;  %1992 = vmatpush.msrb.mxu2 %v427_v60 }
 0x28b   :  { %v1371_v11 = vpop.f32.mrf.mxu0 }
 0x28c   :  { %v1372_v28 = vadd.f32 %v1371_v11, %v3091_v12  ;;  %v1563_v37 = vpop.f32.mrf.mxu3  ;;  %v487_v11 = vld [vmem:[#allocation5 + $0xa58] sm:$0xff] }
 0x28d   :  { %v3181_v33 = vadd.f32 %v1563_v37, %v1499_v42  ;;  %v1436_v25 = vpop.f32.mrf.mxu1  ;;  %2058 = vmatpush.msrb.mxu3 %v487_v11  ;;  %v359_v37 = vld [vmem:[#allocation5 + $0x658] sm:$0xff] }
 0x28e   :  { %v1437_v57 = vadd.f32 %v1436_v25, %v1372_v28  ;;  %1630 = vmatmul.f32.gmra.mxu0 %v3183_v56  ;;  %1760 = vmatmul.f32.gmra.mxu2 %v3018_v43 }
 0x28f   :  { %1928 = vmatpush.msrb.mxu1 %v359_v37  ;;  %v3220_v37 = vld [vmem:[#allocation2 + $0x238] sm:$0xff] }
 0x290   :  { %1695 = vmatmul.f32.gmra.mxu1 %v3187_v10 }
 0x291   :  { %1825 = vmatmul.f32.gmra.mxu3 %v3022_v55  ;;  %v1501_v52 = vpop.f32.mrf.mxu2  ;;  %v423_v55 = vld [vmem:[#allocation5 + $0x858] sm:$0xff] }
 0x292   :  { %v1502_v24 = vadd.f32 %v1501_v52, %v1437_v57  ;;  %1993 = vmatpush.msrb.mxu2 %v423_v55 }
 0x293   :  { %v1374_v31 = vpop.f32.mrf.mxu0 }
 0x294   :  { %v1375_v44 = vadd.f32 %v1374_v31, %v3091_v12  ;;  %v1566_v43 = vpop.f32.mrf.mxu3  ;;  %v291_v31 = vld [vmem:[#allocation5 + $0x438] sm:$0xff] }
 0x295   :  { %v3192_v48 = vadd.f32 %v1566_v43, %v1502_v24  ;;  %v1439_v8 = vpop.f32.mrf.mxu1  ;;  %v3209_v24 = vld [vmem:[#allocation2 + $0x208] sm:$0xff]  ;;  %1864 = vmatpush.msrb.mxu0 %v291_v31 }
 0x296   :  { %v1440_v22 = vadd.f32 %v1439_v8, %v1375_v44  ;;  %1633 = vmatmul.f32.gmra.mxu0 %v3194_v2  ;;  %1763 = vmatmul.f32.gmra.mxu2 %v3027_v9  ;;  %v483_v44 = vld [vmem:[#allocation5 + $0xa38] sm:$0xff] }
 0x297   :  { %2059 = vmatpush.msrb.mxu3 %v483_v44  ;;  %v355_v8 = vld [vmem:[#allocation5 + $0x638] sm:$0xff] }
 0x298   :  { %1698 = vmatmul.f32.gmra.mxu1 %v3198_v36 }
 0x299   :  { %1828 = vmatmul.f32.gmra.mxu3 %v3031_v39  ;;  %v1504_v42 = vpop.f32.mrf.mxu2  ;;  %v419_v39 = vld [vmem:[#allocation5 + $0x838] sm:$0xff]  ;;  %1929 = vmatpush.msrb.mxu1 %v355_v8  ;;  %v3227_v8 = vld [vmem:[#allocation2 + $0x260] sm:$0xff] }
 0x29a   :  { %v1505_v28 = vadd.f32 %v1504_v42, %v1440_v22  ;;  %1994 = vmatpush.msrb.mxu2 %v419_v39 }
 0x29b   :  { %v1377_v25 = vpop.f32.mrf.mxu0 }
 0x29c   :  { %v1378_v57 = vadd.f32 %v1377_v25, %v3091_v12  ;;  %v1569_v9 = vpop.f32.mrf.mxu3 }
 0x29d   :  { %v3203_v60 = vadd.f32 %v1569_v9, %v1505_v28  ;;  %v1442_v52 = vpop.f32.mrf.mxu1  ;;  %v3216_v28 = vld [vmem:[#allocation2 + $0x230] sm:$0xff]  ;;  %v479_v9 = vld [vmem:[#allocation5 + $0xa18] sm:$0xff] }
 0x29e   :  { %v1443_v27 = vadd.f32 %v1442_v52, %v1378_v57  ;;  %1636 = vmatmul.f32.gmra.mxu0 %v3205_v21  ;;  %1766 = vmatmul.f32.gmra.mxu2 %v3036_v14  ;;  %v287_v57 = vld [vmem:[#allocation5 + $0x418] sm:$0xff] }
 0x29f   :  { %1865 = vmatpush.msrb.mxu0 %v287_v57  ;;  %2060 = vmatpush.msrb.mxu3 %v479_v9  ;;  %v3238_v9 = vld [vmem:[#allocation2 + $0x290] sm:$0xff] }
 0x2a0   :  { %1701 = vmatmul.f32.gmra.mxu1 %v3209_v24 }
 0x2a1   :  { %1831 = vmatmul.f32.gmra.mxu3 %v3040_v13  ;;  %v1507_v46 = vpop.f32.mrf.mxu2  ;;  %v415_v13 = vld [vmem:[#allocation5 + $0x818] sm:$0xff] }
 0x2a2   :  { %v1508_v43 = vadd.f32 %v1507_v46, %v1443_v27  ;;  %1995 = vmatpush.msrb.mxu2 %v415_v13  ;;  %v351_v27 = vld [vmem:[#allocation5 + $0x618] sm:$0xff] }
 0x2a3   :  { %v1380_v22 = vpop.f32.mrf.mxu0  ;;  %1930 = vmatpush.msrb.mxu1 %v351_v27 }
 0x2a4   :  { %v1381_v55 = vadd.f32 %v1380_v22, %v3091_v12  ;;  %v1572_v14 = vpop.f32.mrf.mxu3 }
 0x2a5   :  { %v3214_v42 = vadd.f32 %v1572_v14, %v1508_v43  ;;  %v1445_v0 = vpop.f32.mrf.mxu1 }
 0x2a6   :  { %v1446_v11 = vadd.f32 %v1445_v0, %v1381_v55  ;;  %1639 = vmatmul.f32.gmra.mxu0 %v3216_v28  ;;  %1769 = vmatmul.f32.gmra.mxu2 %v3045_v15 }
 0x2a8   :  { %1704 = vmatmul.f32.gmra.mxu1 %v3220_v37 }
 0x2a9   :  { %1834 = vmatmul.f32.gmra.mxu3 %v3049_v34  ;;  %v1510_v25 = vpop.f32.mrf.mxu2  ;;  %v3231_v34 = vld [vmem:[#allocation2 + $0x268] sm:$0xff] }
 0x2aa   :  { %v1511_v52 = vadd.f32 %v1510_v25, %v1446_v11 }
 0x2ab   :  { %v1383_v39 = vpop.f32.mrf.mxu0 }
 0x2ac   :  { %v1384_v46 = vadd.f32 %v1383_v39, %v3091_v12  ;;  %v1575_v15 = vpop.f32.mrf.mxu3 }
 0x2ad   :  { %v3225_v31 = vadd.f32 %v1575_v15, %v1511_v52  ;;  %v1448_v44 = vpop.f32.mrf.mxu1 }
 0x2ae   :  { %v1449_v43 = vadd.f32 %v1448_v44, %v1384_v46  ;;  %1642 = vmatmul.f32.gmra.mxu0 %v3227_v8  ;;  %1772 = vmatmul.f32.gmra.mxu2 %v3054_v35  ;;  %v3242_v35 = vld [vmem:[#allocation2 + $0x298] sm:$0xff] }
 0x2b0   :  { %1707 = vmatmul.f32.gmra.mxu1 %v3231_v34 }
 0x2b1   :  { %1837 = vmatmul.f32.gmra.mxu3 %v3058_v49  ;;  %v1513_v22 = vpop.f32.mrf.mxu2 }
 0x2b2   :  { %v1514_v55 = vadd.f32 %v1513_v22, %v1449_v43  ;;  %v3249_v22 = vld [vmem:[#allocation2 + $0x2c0] sm:$0xff] }
 0x2b3   :  { %v1386_v14 = vpop.f32.mrf.mxu0 }
 0x2b4   :  { %v1387_v0 = vadd.f32 %v1386_v14, %v3091_v12  ;;  %v1578_v11 = vpop.f32.mrf.mxu3 }
 0x2b5   :  { %v3236_v13 = vadd.f32 %v1578_v11, %v1514_v55  ;;  %v1451_v25 = vpop.f32.mrf.mxu1 }
 0x2b6   :  { %v1452_v57 = vadd.f32 %v1451_v25, %v1387_v0  ;;  %1645 = vmatmul.f32.gmra.mxu0 %v3238_v9  ;;  %1775 = vmatmul.f32.gmra.mxu2 %v3063_v30  ;;  %v3253_v30 = vld [vmem:[#allocation2 + $0x2c8] sm:$0xff] }
 0x2b8   :  { %1710 = vmatmul.f32.gmra.mxu1 %v3242_v35 }
 0x2b9   :  { %1840 = vmatmul.f32.gmra.mxu3 %v3067_v6  ;;  %v1516_v49 = vpop.f32.mrf.mxu2 }
 0x2ba   :  { %v1517_v52 = vadd.f32 %v1516_v49, %v1452_v57 }
 0x2bb   :  { %v1389_v27 = vpop.f32.mrf.mxu0 }
 0x2bc   :  { %v1390_v39 = vadd.f32 %v1389_v27, %v3091_v12  ;;  %v1581_v46 = vpop.f32.mrf.mxu3 }
 0x2bd   :  { %v3247_v15 = vadd.f32 %v1581_v46, %v1517_v52  ;;  %v1454_v44 = vpop.f32.mrf.mxu1  ;;  %v3260_v52 = vld [vmem:[#allocation2 + $0x2f0] sm:$0xff] }
 0x2be   :  { %v1455_v43 = vadd.f32 %v1454_v44, %v1390_v39  ;;  %1648 = vmatmul.f32.gmra.mxu0 %v3249_v22  ;;  %1778 = vmatmul.f32.gmra.mxu2 %v3072_v23  ;;  %v3264_v23 = vld [vmem:[#allocation2 + $0x2f8] sm:$0xff] }
 0x2c0   :  { %1713 = vmatmul.f32.gmra.mxu1 %v3253_v30 }
 0x2c1   :  { %1843 = vmatmul.f32.gmra.mxu3 %v3076_v45  ;;  %v1519_v6 = vpop.f32.mrf.mxu2 }
 0x2c2   :  { %v1520_v55 = vadd.f32 %v1519_v6, %v1455_v43 }
 0x2c3   :  { %v1392_v14 = vpop.f32.mrf.mxu0 }
 0x2c4   :  { %v1393_v0 = vadd.f32 %v1392_v14, %v3091_v12  ;;  %v1584_v11 = vpop.f32.mrf.mxu3  ;;  %v2300_v14 = vld [vmem:[#allocation2 + $0x18] sm:$0xff] }
 0x2c5   :  { %v3258_v25 = vadd.f32 %v1584_v11, %v1520_v55  ;;  %v1457_v57 = vpop.f32.mrf.mxu1  ;;  %v2299_v55 = vld [vmem:[#allocation2 + $0x10] sm:$0xff] }
 0x2c6   :  { %v1458_v49 = vadd.f32 %v1457_v57, %v1393_v0  ;;  %1651 = vmatmul.f32.gmra.mxu0 %v3260_v52  ;;  %1781 = vmatmul.f32.gmra.mxu2 %v3081_v5  ;;  %v3273_v5 = vperm.slane %v3088_v16, 3  ;;  %v2302_v16 = vld [vmem:[#allocation2 + $0x48] sm:$0xff] }
 0x2c8   :  { %1716 = vmatmul.f32.gmra.mxu1 %v3264_v23 }
 0x2c9   :  { %1846 = vmatmul.f32.gmra.mxu3 %v3085_v62  ;;  %v1522_v45 = vpop.f32.mrf.mxu2 }
 0x2ca   :  { %v1523_v27 = vadd.f32 %v1522_v45, %v1458_v49 }
 0x2cb   :  { %v1607_v12 = vpop.f32.mrf.mxu0 }
 0x2cc   :  { %v1587_v39 = vpop.f32.mrf.mxu3  ;;  %v1608_v46 = vadd.f32 %v1607_v12, %v3104_v59 }
 0x2cd   :  { %v3269_v44 = vadd.f32 %v1587_v39, %v1523_v27  ;;  %v1672_v43 = vpop.f32.mrf.mxu1 }
 0x2ce   :  { %v1673_v6 = vadd.f32 %v1672_v43, %v1608_v46  ;;  %1866 = vmatmul.f32.vlgmr.msrb.gmra.mxu0 %v2299_v55  ;;  %1996 = vmatmul.f32.vlgmr.msrb.gmra.mxu2 %v3095_v54  ;;  %v2301_v54 = vld [vmem:[#allocation2 + $0x40] sm:$0xff] }
 0x2d0   :  { %2112 = vst [vmem:[#allocation8 + $0x10] sm:$0xff] %v1673_v6  ;;  %1931 = vmatmul.f32.vlgmr.msrb.gmra.mxu1 %v2300_v14  ;;  %v2303_v14 = vld [vmem:[#allocation2 + $0x70] sm:$0xff] }
 0x2d1   :  { %2061 = vmatmul.f32.vlgmr.msrb.gmra.mxu3 %v3099_v29  ;;  %v1737_v62 = vpop.f32.mrf.mxu2 }
 0x2d2   :  { %v1738_v0 = vadd.f32 %v1737_v62, %v3273_v5 }
 0x2d3   :  { %v1610_v59 = vpop.f32.mrf.mxu0 }
 0x2d4   :  { %v1611_v11 = vadd.f32 %v1610_v59, %v3115_v7  ;;  %v1802_v57 = vpop.f32.mrf.mxu3 }
 0x2d5   :  { %v3278_v49 = vadd.f32 %v1802_v57, %v1738_v0  ;;  %v1675_v45 = vpop.f32.mrf.mxu1 }
 0x2d6   :  { %v1676_v27 = vadd.f32 %v1675_v45, %v1611_v11  ;;  %1869 = vmatmul.f32.gmra.mxu0 %v2301_v54  ;;  %1999 = vmatmul.f32.gmra.mxu2 %v3106_v26  ;;  %v2304_v26 = vld [vmem:[#allocation2 + $0x78] sm:$0xff] }
 0x2d8   :  { %2116 = vst [vmem:[#allocation8 + $0x30] sm:$0xff] %v1676_v27  ;;  %1934 = vmatmul.f32.gmra.mxu1 %v2302_v16  ;;  %v2305_v27 = vld [vmem:[#allocation2 + $0xa0] sm:$0xff] }
 0x2d9   :  { %2064 = vmatmul.f32.gmra.mxu3 %v3110_v18  ;;  %v1740_v29 = vpop.f32.mrf.mxu2 }
 0x2da   :  { %v1741_v12 = vadd.f32 %v1740_v29, %v3273_v5 }
 0x2db   :  { %v1613_v39 = vpop.f32.mrf.mxu0 }
 0x2dc   :  { %v1614_v7 = vadd.f32 %v1613_v39, %v3126_v58  ;;  %v1805_v46 = vpop.f32.mrf.mxu3 }
 0x2dd   :  { %v3284_v43 = vadd.f32 %v1805_v46, %v1741_v12  ;;  %v1678_v6 = vpop.f32.mrf.mxu1  ;;  %v2307_v46 = vld [vmem:[#allocation2 + $0xd0] sm:$0xff] }
 0x2de   :  { %v1679_v55 = vadd.f32 %v1678_v6, %v1614_v7  ;;  %1872 = vmatmul.f32.gmra.mxu0 %v2303_v14  ;;  %2002 = vmatmul.f32.gmra.mxu2 %v3117_v51  ;;  %v2306_v51 = vld [vmem:[#allocation2 + $0xa8] sm:$0xff] }
 0x2e0   :  { %2120 = vst [vmem:[#allocation8 + $0x50] sm:$0xff] %v1679_v55  ;;  %1937 = vmatmul.f32.gmra.mxu1 %v2304_v26 }
 0x2e1   :  { %2067 = vmatmul.f32.gmra.mxu3 %v3121_v3  ;;  %v1743_v18 = vpop.f32.mrf.mxu2 }
 0x2e2   :  { %v1744_v62 = vadd.f32 %v1743_v18, %v3273_v5 }
 0x2e3   :  { %v1616_v0 = vpop.f32.mrf.mxu0 }
 0x2e4   :  { %v1617_v58 = vadd.f32 %v1616_v0, %v3137_v63  ;;  %v1808_v59 = vpop.f32.mrf.mxu3  ;;  %v2309_v0 = vld [vmem:[#allocation2 + $0x100] sm:$0xff] }
 0x2e5   :  { %v3290_v11 = vadd.f32 %v1808_v59, %v1744_v62  ;;  %v1681_v57 = vpop.f32.mrf.mxu1 }
 0x2e6   :  { %v1682_v45 = vadd.f32 %v1681_v57, %v1617_v58  ;;  %1875 = vmatmul.f32.gmra.mxu0 %v2305_v27  ;;  %2005 = vmatmul.f32.gmra.mxu2 %v3128_v32  ;;  %v2308_v32 = vld [vmem:[#allocation2 + $0xd8] sm:$0xff] }
 0x2e8   :  { %2124 = vst [vmem:[#allocation8 + $0x70] sm:$0xff] %v1682_v45  ;;  %1940 = vmatmul.f32.gmra.mxu1 %v2306_v51 }
 0x2e9   :  { %2070 = vmatmul.f32.gmra.mxu3 %v3132_v40  ;;  %v1746_v3 = vpop.f32.mrf.mxu2 }
 0x2ea   :  { %v1747_v54 = vadd.f32 %v1746_v3, %v3273_v5  ;;  %v2311_v3 = vld [vmem:[#allocation2 + $0x130] sm:$0xff] }
 0x2eb   :  { %v1619_v16 = vpop.f32.mrf.mxu0 }
 0x2ec   :  { %v1620_v63 = vadd.f32 %v1619_v16, %v3148_v38  ;;  %v1811_v29 = vpop.f32.mrf.mxu3 }
 0x2ed   :  { %v3296_v12 = vadd.f32 %v1811_v29, %v1747_v54  ;;  %v1684_v39 = vpop.f32.mrf.mxu1 }
 0x2ee   :  { %v1685_v7 = vadd.f32 %v1684_v39, %v1620_v63  ;;  %1878 = vmatmul.f32.gmra.mxu0 %v2307_v46  ;;  %2008 = vmatmul.f32.gmra.mxu2 %v3139_v17  ;;  %v2310_v17 = vld [vmem:[#allocation2 + $0x108] sm:$0xff]  ;;  %v2313_v46 = vld [vmem:[#allocation2 + $0x160] sm:$0xff] }
 0x2f0   :  { %2128 = vst [vmem:[#allocation8 + $0x90] sm:$0xff] %v1685_v7  ;;  %1943 = vmatmul.f32.gmra.mxu1 %v2308_v32 }
 0x2f1   :  { %2073 = vmatmul.f32.gmra.mxu3 %v3143_v4  ;;  %v1749_v40 = vpop.f32.mrf.mxu2 }
 0x2f2   :  { %v1750_v6 = vadd.f32 %v1749_v40, %v3273_v5 }
 0x2f3   :  { %v1622_v55 = vpop.f32.mrf.mxu0 }
 0x2f4   :  { %v1623_v38 = vadd.f32 %v1622_v55, %v3159_v19  ;;  %v1814_v14 = vpop.f32.mrf.mxu3 }
 0x2f5   :  { %v3302_v26 = vadd.f32 %v1814_v14, %v1750_v6  ;;  %v1687_v18 = vpop.f32.mrf.mxu1 }
 0x2f6   :  { %v1688_v62 = vadd.f32 %v1687_v18, %v1623_v38  ;;  %1881 = vmatmul.f32.gmra.mxu0 %v2309_v0  ;;  %2011 = vmatmul.f32.gmra.mxu2 %v3150_v50  ;;  %v2312_v50 = vld [vmem:[#allocation2 + $0x138] sm:$0xff]  ;;  %v2315_v18 = vld [vmem:[#allocation2 + $0x190] sm:$0xff] }
 0x2f8   :  { %2132 = vst [vmem:[#allocation8 + $0xb0] sm:$0xff] %v1688_v62  ;;  %1946 = vmatmul.f32.gmra.mxu1 %v2310_v17 }
 0x2f9   :  { %2076 = vmatmul.f32.gmra.mxu3 %v3154_v47  ;;  %v1752_v4 = vpop.f32.mrf.mxu2 }
 0x2fa   :  { %v1753_v58 = vadd.f32 %v1752_v4, %v3273_v5 }
 0x2fb   :  { %v1625_v59 = vpop.f32.mrf.mxu0 }
 0x2fc   :  { %v1626_v19 = vadd.f32 %v1625_v59, %v3170_v41  ;;  %v1817_v57 = vpop.f32.mrf.mxu3 }
 0x2fd   :  { %v3308_v45 = vadd.f32 %v1817_v57, %v1753_v58  ;;  %v1690_v27 = vpop.f32.mrf.mxu1 }
 0x2fe   :  { %v1691_v51 = vadd.f32 %v1690_v27, %v1626_v19  ;;  %1884 = vmatmul.f32.gmra.mxu0 %v2311_v3  ;;  %2014 = vmatmul.f32.gmra.mxu2 %v3161_v1  ;;  %v2314_v1 = vld [vmem:[#allocation2 + $0x168] sm:$0xff]  ;;  %v2317_v19 = vld [vmem:[#allocation2 + $0x1c0] sm:$0xff] }
 0x300   :  { %2136 = vst [vmem:[#allocation8 + $0xd0] sm:$0xff] %v1691_v51  ;;  %1949 = vmatmul.f32.gmra.mxu1 %v2312_v50 }
 0x301   :  { %2079 = vmatmul.f32.gmra.mxu3 %v3165_v20  ;;  %v1755_v47 = vpop.f32.mrf.mxu2 }
 0x302   :  { %v1756_v54 = vadd.f32 %v1755_v47, %v3273_v5 }
 0x303   :  { %v1628_v16 = vpop.f32.mrf.mxu0 }
 0x304   :  { %v1629_v41 = vadd.f32 %v1628_v16, %v3181_v33  ;;  %v1820_v63 = vpop.f32.mrf.mxu3 }
 0x305   :  { %v3314_v29 = vadd.f32 %v1820_v63, %v1756_v54  ;;  %v1693_v39 = vpop.f32.mrf.mxu1  ;;  %v2319_v54 = vld [vmem:[#allocation2 + $0x1f0] sm:$0xff] }
 0x306   :  { %v1694_v7 = vadd.f32 %v1693_v39, %v1629_v41  ;;  %1887 = vmatmul.f32.gmra.mxu0 %v2313_v46  ;;  %2017 = vmatmul.f32.gmra.mxu2 %v3172_v53  ;;  %v2316_v53 = vld [vmem:[#allocation2 + $0x198] sm:$0xff] }
 0x308   :  { %2140 = vst [vmem:[#allocation8 + $0xf0] sm:$0xff] %v1694_v7  ;;  %1952 = vmatmul.f32.gmra.mxu1 %v2314_v1  ;;  %v2321_v1 = vld [vmem:[#allocation2 + $0x220] sm:$0xff] }
 0x309   :  { %2082 = vmatmul.f32.gmra.mxu3 %v3176_v61  ;;  %v1758_v20 = vpop.f32.mrf.mxu2 }
 0x30a   :  { %v1759_v32 = vadd.f32 %v1758_v20, %v3273_v5 }
 0x30b   :  { %v1631_v40 = vpop.f32.mrf.mxu0 }
 0x30c   :  { %v1632_v33 = vadd.f32 %v1631_v40, %v3192_v48  ;;  %v1823_v6 = vpop.f32.mrf.mxu3 }
 0x30d   :  { %v3320_v55 = vadd.f32 %v1823_v6, %v1759_v32  ;;  %v1696_v38 = vpop.f32.mrf.mxu1 }
 0x30e   :  { %v1697_v14 = vadd.f32 %v1696_v38, %v1632_v33  ;;  %1890 = vmatmul.f32.gmra.mxu0 %v2315_v18  ;;  %2020 = vmatmul.f32.gmra.mxu2 %v3183_v56  ;;  %v2318_v56 = vld [vmem:[#allocation2 + $0x1c8] sm:$0xff] }
 0x310   :  { %2144 = vst [vmem:[#allocation8 + $0x110] sm:$0xff] %v1697_v14  ;;  %1955 = vmatmul.f32.gmra.mxu1 %v2316_v53  ;;  %v2323_v14 = vld [vmem:[#allocation2 + $0x250] sm:$0xff] }
 0x311   :  { %2085 = vmatmul.f32.gmra.mxu3 %v3187_v10  ;;  %v1761_v61 = vpop.f32.mrf.mxu2 }
 0x312   :  { %v1762_v62 = vadd.f32 %v1761_v61, %v3273_v5 }
 0x313   :  { %v1634_v0 = vpop.f32.mrf.mxu0 }
 0x314   :  { %v1635_v48 = vadd.f32 %v1634_v0, %v3203_v60  ;;  %v1826_v17 = vpop.f32.mrf.mxu3 }
 0x315   :  { %v3326_v4 = vadd.f32 %v1826_v17, %v1762_v62  ;;  %v1699_v58 = vpop.f32.mrf.mxu1  ;;  %v2325_v17 = vld [vmem:[#allocation2 + $0x280] sm:$0xff] }
 0x316   :  { %v1700_v59 = vadd.f32 %v1699_v58, %v1635_v48  ;;  %1893 = vmatmul.f32.gmra.mxu0 %v2317_v19  ;;  %2023 = vmatmul.f32.gmra.mxu2 %v3194_v2  ;;  %v2320_v2 = vld [vmem:[#allocation2 + $0x1f8] sm:$0xff] }
 0x318   :  { %2148 = vst [vmem:[#allocation8 + $0x130] sm:$0xff] %v1700_v59  ;;  %1958 = vmatmul.f32.gmra.mxu1 %v2318_v56 }
 0x319   :  { %2088 = vmatmul.f32.gmra.mxu3 %v3198_v36  ;;  %v1764_v10 = vpop.f32.mrf.mxu2 }
 0x31a   :  { %v1765_v57 = vadd.f32 %v1764_v10, %v3273_v5 }
 0x31b   :  { %v1637_v27 = vpop.f32.mrf.mxu0 }
 0x31c   :  { %v1638_v60 = vadd.f32 %v1637_v27, %v3214_v42  ;;  %v1829_v51 = vpop.f32.mrf.mxu3  ;;  %v2327_v27 = vld [vmem:[#allocation2 + $0x2b0] sm:$0xff] }
 0x31d   :  { %v3332_v3 = vadd.f32 %v1829_v51, %v1765_v57  ;;  %v1702_v50 = vpop.f32.mrf.mxu1 }
 0x31e   :  { %v1703_v47 = vadd.f32 %v1702_v50, %v1638_v60  ;;  %1896 = vmatmul.f32.gmra.mxu0 %v2319_v54  ;;  %2026 = vmatmul.f32.gmra.mxu2 %v3205_v21  ;;  %v2322_v21 = vld [vmem:[#allocation2 + $0x228] sm:$0xff] }
 0x320   :  { %2152 = vst [vmem:[#allocation8 + $0x150] sm:$0xff] %v1703_v47  ;;  %1961 = vmatmul.f32.gmra.mxu1 %v2320_v2 }
 0x321   :  { %2091 = vmatmul.f32.gmra.mxu3 %v3209_v24  ;;  %v1767_v36 = vpop.f32.mrf.mxu2 }
 0x322   :  { %v1768_v16 = vadd.f32 %v1767_v36, %v3273_v5  ;;  %v2329_v36 = vld [vmem:[#allocation2 + $0x2e0] sm:$0xff] }
 0x323   :  { %v1640_v41 = vpop.f32.mrf.mxu0 }
 0x324   :  { %v1641_v42 = vadd.f32 %v1640_v41, %v3225_v31  ;;  %v1832_v63 = vpop.f32.mrf.mxu3 }
 0x325   :  { %v3338_v39 = vadd.f32 %v1832_v63, %v1768_v16  ;;  %v1705_v7 = vpop.f32.mrf.mxu1 }
 0x326   :  { %v1706_v46 = vadd.f32 %v1705_v7, %v1641_v42  ;;  %1899 = vmatmul.f32.gmra.mxu0 %v2321_v1  ;;  %2029 = vmatmul.f32.gmra.mxu2 %v3216_v28  ;;  %v2324_v28 = vld [vmem:[#allocation2 + $0x258] sm:$0xff] }
 0x328   :  { %2156 = vst [vmem:[#allocation8 + $0x170] sm:$0xff] %v1706_v46  ;;  %1964 = vmatmul.f32.gmra.mxu1 %v2322_v21 }
 0x329   :  { %2094 = vmatmul.f32.gmra.mxu3 %v3220_v37  ;;  %v1770_v24 = vpop.f32.mrf.mxu2 }
 0x32a   :  { %v1771_v20 = vadd.f32 %v1770_v24, %v3273_v5 }
 0x32b   :  { %v1643_v32 = vpop.f32.mrf.mxu0 }
 0x32c   :  { %v1644_v31 = vadd.f32 %v1643_v32, %v3236_v13  ;;  %v1835_v40 = vpop.f32.mrf.mxu3 }
 0x32d   :  { %v3344_v33 = vadd.f32 %v1835_v40, %v1771_v20  ;;  %v1708_v6 = vpop.f32.mrf.mxu1 }
 0x32e   :  { %v1709_v38 = vadd.f32 %v1708_v6, %v1644_v31  ;;  %1902 = vmatmul.f32.gmra.mxu0 %v2323_v14  ;;  %2032 = vmatmul.f32.gmra.mxu2 %v3227_v8  ;;  %v2326_v8 = vld [vmem:[#allocation2 + $0x288] sm:$0xff] }
 0x330   :  { %2160 = vst [vmem:[#allocation8 + $0x190] sm:$0xff] %v1709_v38  ;;  %1967 = vmatmul.f32.gmra.mxu1 %v2324_v28 }
 0x331   :  { %2097 = vmatmul.f32.gmra.mxu3 %v3231_v34  ;;  %v1773_v37 = vpop.f32.mrf.mxu2 }
 0x332   :  { %v1774_v18 = vadd.f32 %v1773_v37, %v3273_v5 }
 0x333   :  { %v1646_v53 = vpop.f32.mrf.mxu0 }
 0x334   :  { %v1647_v13 = vadd.f32 %v1646_v53, %v3247_v15  ;;  %v1838_v61 = vpop.f32.mrf.mxu3 }
 0x335   :  { %v3350_v62 = vadd.f32 %v1838_v61, %v1774_v18  ;;  %v1711_v0 = vpop.f32.mrf.mxu1 }
 0x336   :  { %v1712_v48 = vadd.f32 %v1711_v0, %v1647_v13  ;;  %1905 = vmatmul.f32.gmra.mxu0 %v2325_v17  ;;  %2035 = vmatmul.f32.gmra.mxu2 %v3238_v9  ;;  %v2328_v9 = vld [vmem:[#allocation2 + $0x2b8] sm:$0xff] }
 0x338   :  { %2164 = vst [vmem:[#allocation8 + $0x1b0] sm:$0xff] %v1712_v48  ;;  %1970 = vmatmul.f32.gmra.mxu1 %v2326_v8 }
 0x339   :  { %2100 = vmatmul.f32.gmra.mxu3 %v3242_v35  ;;  %v1776_v34 = vpop.f32.mrf.mxu2 }
 0x33a   :  { %v1777_v58 = vadd.f32 %v1776_v34, %v3273_v5 }
 0x33b   :  { %v1649_v59 = vpop.f32.mrf.mxu0 }
 0x33c   :  { %v1650_v15 = vadd.f32 %v1649_v59, %v3258_v25  ;;  %v1841_v19 = vpop.f32.mrf.mxu3 }
 0x33d   :  { %v3356_v56 = vadd.f32 %v1841_v19, %v1777_v58  ;;  %v1714_v10 = vpop.f32.mrf.mxu1 }
 0x33e   :  { %v1715_v57 = vadd.f32 %v1714_v10, %v1650_v15  ;;  %1908 = vmatmul.f32.gmra.mxu0 %v2327_v27  ;;  %2038 = vmatmul.f32.gmra.mxu2 %v3249_v22  ;;  %v2330_v22 = vld [vmem:[#allocation2 + $0x2e8] sm:$0xff] }
 0x340   :  { %2168 = vst [vmem:[#allocation8 + $0x1d0] sm:$0xff] %v1715_v57  ;;  %1973 = vmatmul.f32.gmra.mxu1 %v2328_v9 }
 0x341   :  { %2103 = vmatmul.f32.gmra.mxu3 %v3253_v30  ;;  %v1779_v35 = vpop.f32.mrf.mxu2 }
 0x342   :  { %v1780_v60 = vadd.f32 %v1779_v35, %v3273_v5 }
 0x343   :  { %v1652_v51 = vpop.f32.mrf.mxu0 }
 0x344   :  { %v1653_v25 = vadd.f32 %v1652_v51, %v3269_v44  ;;  %v1844_v50 = vpop.f32.mrf.mxu3 }
 0x345   :  { %v3362_v47 = vadd.f32 %v1844_v50, %v1780_v60  ;;  %v1717_v54 = vpop.f32.mrf.mxu1 }
 0x346   :  { %v1718_v2 = vadd.f32 %v1717_v54, %v1653_v25  ;;  %1911 = vmatmul.f32.gmra.mxu0 %v2329_v36  ;;  %2041 = vmatmul.f32.gmra.mxu2 %v3260_v52 }
 0x348   :  { %2172 = vst [vmem:[#allocation8 + $0x1f0] sm:$0xff] %v1718_v2  ;;  %1976 = vmatmul.f32.gmra.mxu1 %v2330_v22 }
 0x349   :  { %2106 = vmatmul.f32.gmra.mxu3 %v3264_v23  ;;  %v1782_v30 = vpop.f32.mrf.mxu2 }
 0x34a   :  { %v1783_v16 = vadd.f32 %v1782_v30, %v3273_v5 }
 0x34b   :  { %v1867_v41 = vpop.f32.mrf.mxu0 }
 0x34c   :  { %v1847_v42 = vpop.f32.mrf.mxu3  ;;  %v1868_v44 = vadd.f32 %v1867_v41, %v3278_v49 }
 0x34d   :  { %v3368_v63 = vadd.f32 %v1847_v42, %v1783_v16  ;;  %v1932_v7 = vpop.f32.mrf.mxu1 }
 0x34e   :  { %v1933_v46 = vadd.f32 %v1932_v7, %v1868_v44 }
 0x351   :  { %v1997_v1 = vpop.f32.mrf.mxu2 }
 0x352   :  { %v1998_v21 = vadd.f32 %v1997_v1, %v1933_v46 }
 0x353   :  { %v1870_v24 = vpop.f32.mrf.mxu0 }
 0x354   :  { %v1871_v52 = vadd.f32 %v1870_v24, %v3284_v43  ;;  %v2062_v20 = vpop.f32.mrf.mxu3 }
 0x355   :  { %v2063_v32 = vadd.f32 %v2062_v20, %v1998_v21  ;;  %v1935_v31 = vpop.f32.mrf.mxu1 }
 0x356   :  { %v1936_v23 = vadd.f32 %v1935_v31, %v1871_v52 }
 0x357   :  { %2113 = vst [vmem:[#allocation8 + $0x18] sm:$0xff] %v2063_v32 }
 0x359   :  { %v2000_v40 = vpop.f32.mrf.mxu2 }
 0x35a   :  { %v2001_v5 = vadd.f32 %v2000_v40, %v1936_v23 }
 0x35b   :  { %v1873_v6 = vpop.f32.mrf.mxu0 }
 0x35c   :  { %v1874_v38 = vadd.f32 %v1873_v6, %v3290_v11  ;;  %v2065_v49 = vpop.f32.mrf.mxu3 }
 0x35d   :  { %v2066_v14 = vadd.f32 %v2065_v49, %v2001_v5  ;;  %v1938_v28 = vpop.f32.mrf.mxu1 }
 0x35e   :  { %v1939_v37 = vadd.f32 %v1938_v28, %v1874_v38 }
 0x35f   :  { %2117 = vst [vmem:[#allocation8 + $0x38] sm:$0xff] %v2066_v14 }
 0x361   :  { %v2003_v18 = vpop.f32.mrf.mxu2 }
 0x362   :  { %v2004_v53 = vadd.f32 %v2003_v18, %v1939_v37 }
 0x363   :  { %v1876_v13 = vpop.f32.mrf.mxu0 }
 0x364   :  { %v1877_v43 = vadd.f32 %v1876_v13, %v3296_v12  ;;  %v2068_v61 = vpop.f32.mrf.mxu3 }
 0x365   :  { %v2069_v0 = vadd.f32 %v2068_v61, %v2004_v53  ;;  %v1941_v48 = vpop.f32.mrf.mxu1 }
 0x366   :  { %v1942_v17 = vadd.f32 %v1941_v48, %v1877_v43 }
 0x367   :  { %2121 = vst [vmem:[#allocation8 + $0x58] sm:$0xff] %v2069_v0 }
 0x369   :  { %v2006_v8 = vpop.f32.mrf.mxu2 }
 0x36a   :  { %v2007_v34 = vadd.f32 %v2006_v8, %v1942_v17 }
 0x36b   :  { %v1879_v58 = vpop.f32.mrf.mxu0 }
 0x36c   :  { %v1880_v11 = vadd.f32 %v1879_v58, %v3302_v26  ;;  %v2071_v59 = vpop.f32.mrf.mxu3 }
 0x36d   :  { %v2072_v15 = vadd.f32 %v2071_v59, %v2007_v34  ;;  %v1944_v19 = vpop.f32.mrf.mxu1 }
 0x36e   :  { %v1945_v10 = vadd.f32 %v1944_v19, %v1880_v11 }
 0x36f   :  { %2125 = vst [vmem:[#allocation8 + $0x78] sm:$0xff] %v2072_v15 }
 0x371   :  { %v2009_v57 = vpop.f32.mrf.mxu2 }
 0x372   :  { %v2010_v27 = vadd.f32 %v2009_v57, %v1945_v10 }
 0x373   :  { %v1882_v9 = vpop.f32.mrf.mxu0 }
 0x374   :  { %v1883_v12 = vadd.f32 %v1882_v9, %v3308_v45  ;;  %v2074_v35 = vpop.f32.mrf.mxu3 }
 0x375   :  { %v2075_v60 = vadd.f32 %v2074_v35, %v2010_v27  ;;  %v1947_v51 = vpop.f32.mrf.mxu1 }
 0x376   :  { %v1948_v25 = vadd.f32 %v1947_v51, %v1883_v12 }
 0x377   :  { %2129 = vst [vmem:[#allocation8 + $0x98] sm:$0xff] %v2075_v60 }
 0x379   :  { %v2012_v50 = vpop.f32.mrf.mxu2 }
 0x37a   :  { %v2013_v54 = vadd.f32 %v2012_v50, %v1948_v25 }
 0x37b   :  { %v1885_v2 = vpop.f32.mrf.mxu0 }
 0x37c   :  { %v1886_v26 = vadd.f32 %v1885_v2, %v3314_v29  ;;  %v2077_v36 = vpop.f32.mrf.mxu3 }
 0x37d   :  { %v2078_v22 = vadd.f32 %v2077_v36, %v2013_v54  ;;  %v1950_v30 = vpop.f32.mrf.mxu1 }
 0x37e   :  { %v1951_v16 = vadd.f32 %v1950_v30, %v1886_v26 }
 0x37f   :  { %2133 = vst [vmem:[#allocation8 + $0xb8] sm:$0xff] %v2078_v22 }
 0x381   :  { %v2015_v41 = vpop.f32.mrf.mxu2 }
 0x382   :  { %v2016_v42 = vadd.f32 %v2015_v41, %v1951_v16 }
 0x383   :  { %v1888_v44 = vpop.f32.mrf.mxu0 }
 0x384   :  { %v1889_v45 = vadd.f32 %v1888_v44, %v3320_v55  ;;  %v2080_v7 = vpop.f32.mrf.mxu3 }
 0x385   :  { %v2081_v46 = vadd.f32 %v2080_v7, %v2016_v42  ;;  %v1953_v1 = vpop.f32.mrf.mxu1 }
 0x386   :  { %v1954_v21 = vadd.f32 %v1953_v1, %v1889_v45 }
 0x387   :  { %2137 = vst [vmem:[#allocation8 + $0xd8] sm:$0xff] %v2081_v46 }
 0x389   :  { %v2018_v24 = vpop.f32.mrf.mxu2 }
 0x38a   :  { %v2019_v52 = vadd.f32 %v2018_v24, %v1954_v21 }
 0x38b   :  { %v1891_v20 = vpop.f32.mrf.mxu0 }
 0x38c   :  { %v1892_v29 = vadd.f32 %v1891_v20, %v3326_v4  ;;  %v2083_v32 = vpop.f32.mrf.mxu3 }
 0x38d   :  { %v2084_v31 = vadd.f32 %v2083_v32, %v2019_v52  ;;  %v1956_v23 = vpop.f32.mrf.mxu1 }
 0x38e   :  { %v1957_v40 = vadd.f32 %v1956_v23, %v1892_v29 }
 0x38f   :  { %2141 = vst [vmem:[#allocation8 + $0xf8] sm:$0xff] %v2084_v31 }
 0x391   :  { %v2021_v5 = vpop.f32.mrf.mxu2 }
 0x392   :  { %v2022_v6 = vadd.f32 %v2021_v5, %v1957_v40 }
 0x393   :  { %v1894_v38 = vpop.f32.mrf.mxu0 }
 0x394   :  { %v1895_v55 = vadd.f32 %v1894_v38, %v3332_v3  ;;  %v2086_v49 = vpop.f32.mrf.mxu3 }
 0x395   :  { %v2087_v14 = vadd.f32 %v2086_v49, %v2022_v6  ;;  %v1959_v28 = vpop.f32.mrf.mxu1 }
 0x396   :  { %v1960_v37 = vadd.f32 %v1959_v28, %v1895_v55 }
 0x397   :  { %2145 = vst [vmem:[#allocation8 + $0x118] sm:$0xff] %v2087_v14 }
 0x399   :  { %v2024_v18 = vpop.f32.mrf.mxu2 }
 0x39a   :  { %v2025_v53 = vadd.f32 %v2024_v18, %v1960_v37 }
 0x39b   :  { %v1897_v13 = vpop.f32.mrf.mxu0 }
 0x39c   :  { %v1898_v4 = vadd.f32 %v1897_v13, %v3338_v39  ;;  %v2089_v43 = vpop.f32.mrf.mxu3 }
 0x39d   :  { %v2090_v61 = vadd.f32 %v2089_v43, %v2025_v53  ;;  %v1962_v0 = vpop.f32.mrf.mxu1 }
 0x39e   :  { %v1963_v48 = vadd.f32 %v1962_v0, %v1898_v4 }
 0x39f   :  { %2149 = vst [vmem:[#allocation8 + $0x138] sm:$0xff] %v2090_v61 }
 0x3a1   :  { %v2027_v17 = vpop.f32.mrf.mxu2 }
 0x3a2   :  { %v2028_v8 = vadd.f32 %v2027_v17, %v1963_v48 }
 0x3a3   :  { %v1900_v34 = vpop.f32.mrf.mxu0 }
 0x3a4   :  { %v1901_v3 = vadd.f32 %v1900_v34, %v3344_v33  ;;  %v2092_v58 = vpop.f32.mrf.mxu3 }
 0x3a5   :  { %v2093_v11 = vadd.f32 %v2092_v58, %v2028_v8  ;;  %v1965_v59 = vpop.f32.mrf.mxu1 }
 0x3a6   :  { %v1966_v15 = vadd.f32 %v1965_v59, %v1901_v3 }
 0x3a7   :  { %2153 = vst [vmem:[#allocation8 + $0x158] sm:$0xff] %v2093_v11 }
 0x3a9   :  { %v2030_v19 = vpop.f32.mrf.mxu2 }
 0x3aa   :  { %v2031_v10 = vadd.f32 %v2030_v19, %v1966_v15 }
 0x3ab   :  { %v1903_v57 = vpop.f32.mrf.mxu0 }
 0x3ac   :  { %v1904_v39 = vadd.f32 %v1903_v57, %v3350_v62  ;;  %v2095_v27 = vpop.f32.mrf.mxu3 }
 0x3ad   :  { %v2096_v9 = vadd.f32 %v2095_v27, %v2031_v10  ;;  %v1968_v12 = vpop.f32.mrf.mxu1 }
 0x3ae   :  { %v1969_v35 = vadd.f32 %v1968_v12, %v1904_v39 }
 0x3af   :  { %2157 = vst [vmem:[#allocation8 + $0x178] sm:$0xff] %v2096_v9 }
 0x3b1   :  { %v2033_v60 = vpop.f32.mrf.mxu2 }
 0x3b2   :  { %v2034_v51 = vadd.f32 %v2033_v60, %v1969_v35 }
 0x3b3   :  { %v1906_v25 = vpop.f32.mrf.mxu0 }
 0x3b4   :  { %v1907_v33 = vadd.f32 %v1906_v25, %v3356_v56  ;;  %v2098_v50 = vpop.f32.mrf.mxu3 }
 0x3b5   :  { %v2099_v54 = vadd.f32 %v2098_v50, %v2034_v51  ;;  %v1971_v2 = vpop.f32.mrf.mxu1 }
 0x3b6   :  { %v1972_v26 = vadd.f32 %v1971_v2, %v1907_v33 }
 0x3b7   :  { %2161 = vst [vmem:[#allocation8 + $0x198] sm:$0xff] %v2099_v54 }
 0x3b9   :  { %v2036_v36 = vpop.f32.mrf.mxu2 }
 0x3ba   :  { %v2037_v22 = vadd.f32 %v2036_v36, %v1972_v26 }
 0x3bb   :  { %v1909_v30 = vpop.f32.mrf.mxu0 }
 0x3bc   :  { %v1910_v62 = vadd.f32 %v1909_v30, %v3362_v47  ;;  %v2101_v16 = vpop.f32.mrf.mxu3 }
 0x3bd   :  { %v2102_v41 = vadd.f32 %v2101_v16, %v2037_v22  ;;  %v1974_v42 = vpop.f32.mrf.mxu1 }
 0x3be   :  { %v1975_v44 = vadd.f32 %v1974_v42, %v1910_v62 }
 0x3bf   :  { %2165 = vst [vmem:[#allocation8 + $0x1b8] sm:$0xff] %v2102_v41 }
 0x3c1   :  { %v2039_v45 = vpop.f32.mrf.mxu2 }
 0x3c2   :  { %v2040_v7 = vadd.f32 %v2039_v45, %v1975_v44 }
 0x3c3   :  { %v1912_v46 = vpop.f32.mrf.mxu0 }
 0x3c4   :  { %v1913_v56 = vadd.f32 %v1912_v46, %v3368_v63  ;;  %v2104_v1 = vpop.f32.mrf.mxu3 }
 0x3c5   :  { %v2105_v21 = vadd.f32 %v2104_v1, %v2040_v7  ;;  %v1977_v24 = vpop.f32.mrf.mxu1 }
 0x3c6   :  { %v1978_v52 = vadd.f32 %v1977_v24, %v1913_v56 }
 0x3c7   :  { %2169 = vst [vmem:[#allocation8 + $0x1d8] sm:$0xff] %v2105_v21 }
 0x3c9   :  { %v2042_v20 = vpop.f32.mrf.mxu2 }
 0x3ca   :  { %v2043_v29 = vadd.f32 %v2042_v20, %v1978_v52 }
 0x3cc   :  { %v2107_v47 = vpop.f32.mrf.mxu3 }
 0x3cd   :  { %v2108_v32 = vadd.f32 %v2107_v47, %v2043_v29 }
 0x3cf   :  { %2173 = vst [vmem:[#allocation8 + $0x1f8] sm:$0xff] %v2108_v32 }
 0x3d0   :  { %2186 = dma.vmem_to_hbm [thread:$0]  %s2179_s29, 8192, %s2181_s5, [#allocation4], %s2434_s20, %s2434_s20, %s2435_s21  }
 0x3d1   :  { %2431 = dma.done.wait [#allocation4], 8192  }
 0x3d2   :  { %2432 = vsyncadd [#allocation4], 4294959104 }
 0x3d3   :  { %2191 = vsyncpa [#allocation3], 1 }
 0x3d4   :  { %2192 = vsyncpa [#allocation6], 1 }
 0x3d5   :  { %2193 = vsyncpa [#allocation4], 1 }

</bundles_post_ra>
